<compile_context>
chip_gen: v6e
topology: v6e:2x2x1
jax: 0.10.0
libtpu: 0.0.40
codegen_flags: <defaults>
</compile_context>

<pallas_src>
import functools

import jax
import jax.numpy as jnp
from jax.experimental import pallas as pl
from jax.experimental.pallas import tpu as pltpu


def _entity_attention_kernel(ent_ref, pmask_ref, w_in_ref, w_out_ref, b_out_ref,
                             out_ref, *, n_heads):
    # ent_ref   : (TB*ne, in_dim)   entities for TB batch elements, row-major
    # pmask_ref : (TB, nq, 1)       post_mask for this batch block
    # w_in_ref  : (in_dim, 3E)      in_trans weight (pre-transposed)
    # w_out_ref : (E, out_dim)      out_trans weight (pre-transposed)
    # b_out_ref : (1, out_dim)      out_trans bias
    # out_ref   : (TB, nq, out_dim)
    tb, nq, out_dim = out_ref.shape
    rows, _ = ent_ref.shape
    ne = rows // tb
    E = w_out_ref.shape[0]
    hd = E // n_heads
    inv_scale = 1.0 / (float(hd) ** 0.5)

    # Fused QKV projection for the whole batch block: one dense MXU matmul.
    qkv = jnp.dot(ent_ref[...], w_in_ref[...],
                  preferred_element_type=jnp.float32)        # (TB*ne, 3E)
    qkv3 = qkv.reshape(tb, ne, 3 * E)                        # aligned (ne % 8 == 0)

    # Multi-head attention, batched over the TB batch elements per head.
    # Static head loop; each iteration is a single batched dot_general.
    head_outs = []
    for h in range(n_heads):
        q_h = qkv3[:, :, h * hd:(h + 1) * hd]                # (TB, ne, hd)
        k_h = qkv3[:, :, E + h * hd:E + (h + 1) * hd]        # (TB, ne, hd)
        v_h = qkv3[:, :, 2 * E + h * hd:2 * E + (h + 1) * hd]

        logits = jnp.einsum('bqd,bkd->bqk', q_h, k_h,
                            preferred_element_type=jnp.float32) * inv_scale

        # softmax over entities (EUP exp + approx reciprocal; no NaN possible
        # here since the logits fed to softmax are never -inf masked).
        m = jnp.max(logits, axis=-1, keepdims=True)
        e = jnp.exp(logits - m)
        denom = jnp.sum(e, axis=-1, keepdims=True)
        w = e * pl.reciprocal(denom, approx=True)

        head_outs.append(jnp.einsum('bqk,bkd->bqd', w, v_h,
                                    preferred_element_type=jnp.float32))

    attn = jnp.concatenate(head_outs, axis=-1)               # (TB, ne, E)
    attn2d = attn.reshape(tb * ne, E)                        # aligned merge

    # out_trans (Linear with bias) on all rows (keeps the matmul 2-D / dense);
    # only the first nq rows per batch element are kept.
    y = jnp.dot(attn2d, w_out_ref[...],
                preferred_element_type=jnp.float32) + b_out_ref[...]
    y3 = y.reshape(tb, ne, out_dim)[:, :nq, :]               # (TB, nq, out_dim)

    # post_mask zeroing.
    pm = pmask_ref[...]                                      # (TB, nq, 1)
    out_ref[...] = jnp.where(pm != 0, 0.0, y3).astype(out_ref.dtype)


def _pick_batch_block(bs, ne):
    """Pick TB: ~256 projected rows per grid step, >=2 steps, 8-row alignment."""
    target_rows = 256                      # fills v6e/v7x MXU; >=128 for v5e
    cap = max(1, target_rows // max(1, ne))
    if bs >= 2:
        cap = min(cap, max(1, bs // 2))    # keep >=2 grid steps (v7x dual-TC)
    tb = 1
    for d in range(1, cap + 1):
        if bs % d == 0:
            tb = d
    # (tb*ne, in_dim) input block needs its second-to-last dim % 8 == 0
    # (or to cover the full array).
    if (tb * ne) % 8 != 0 and tb != bs:
        tb = bs
    return tb


def entity_attention_forward(entities, post_mask, w_in_t, w_out_t, b_out,
                             *, n_heads, pre_mask=None, batch_block=None):
    """Pallas implementation of EntityAttentionLayer.forward (3-D branch).

    entities : (bs, ne, in_dim) float32
    post_mask: (bs, n_queries)  {0,1}
    pre_mask : ignored -- in the reference 3-D branch the masked logits are
               never fed to softmax, so pre_mask has no effect on the output.
    """
    del pre_mask
    bs, ne, in_dim = entities.shape
    nq = post_mask.shape[1]
    three_e = w_in_t.shape[1]
    embed_dim = three_e // 3
    out_dim = w_out_t.shape[1]
    assert embed_dim % n_heads == 0
    assert nq <= ne

    tb = batch_block if batch_block is not None else _pick_batch_block(bs, ne)
    assert bs % tb == 0
    grid = (bs // tb,)

    # Lane/sublane-dense 2-D entities slab; batched mask / bias layouts.
    ent2d = entities.reshape(bs * ne, in_dim)
    pm = post_mask.astype(jnp.float32).reshape(bs, nq, 1)
    b_out_2d = b_out.reshape(1, out_dim)

    kernel = functools.partial(_entity_attention_kernel, n_heads=n_heads)

    # NOTE: weight/bias BlockSpecs have constant index_maps, so the pipeline
    # only DMAs them once; explicit single-buffering is skipped (negligible
    # VMEM at these sizes).
    return pl.pallas_call(
        kernel,
        out_shape=jax.ShapeDtypeStruct((bs, nq, out_dim), jnp.float32),
        grid_spec=pltpu.PrefetchScalarGridSpec(
            num_scalar_prefetch=0,
            grid=grid,
            in_specs=[
                pl.BlockSpec((tb * ne, in_dim), lambda b: (b, 0)),
                pl.BlockSpec((tb, nq, 1), lambda b: (b, 0, 0)),
                pl.BlockSpec((in_dim, three_e), lambda b: (0, 0)),
                pl.BlockSpec((embed_dim, out_dim), lambda b: (0, 0)),
                pl.BlockSpec((1, out_dim), lambda b: (0, 0)),
            ],
            out_specs=pl.BlockSpec((tb, nq, out_dim), lambda b: (b, 0, 0)),
        ),
        compiler_params=pltpu.CompilerParams(
            dimension_semantics=("parallel",),
            vmem_limit_bytes=32 * 1024 * 1024),   # safe on v5e/v6e/v7x
    )(ent2d, pm, w_in_t, w_out_t, b_out_2d)


def _reference_forward(entities, post_mask, w_in_t, w_out_t, b_out, n_heads):
    """Plain-JAX mirror of the PyTorch 3-D branch (for verification)."""
    bs, ne, _ = entities.shape
    nq = post_mask.shape[1]
    E = w_in_t.shape[1] // 3
    hd = E // n_heads

    qkv = entities @ w_in_t                            # (bs, ne, 3E)
    q, k, v = qkv[..., :E], qkv[..., E:2 * E], qkv[..., 2 * E:]
    q = q[:, :nq]

    qh = q.reshape(bs, nq, n_heads, hd).transpose(0, 2, 1, 3)
    kh = k.reshape(bs, ne, n_heads, hd).transpose(0, 2, 1, 3)
    vh = v.reshape(bs, ne, n_heads, hd).transpose(0, 2, 1, 3)

    logits = jnp.einsum('bhqd,bhkd->bhqk', qh, kh) / jnp.sqrt(jnp.float32(hd))
    w = jax.nn.softmax(logits, axis=-1)
    w = jnp.where(jnp.isnan(w), 0.0, w)
    o = jnp.einsum('bhqk,bhkd->bhqd', w, vh).transpose(0, 2, 1, 3).reshape(bs, nq, E)
    y = o @ w_out_t + b_out
    return jnp.where(post_mask[:, :, None] != 0, 0.0, y)


if __name__ == "__main__":
    # Small shapes consistent with the module (bs large enough that the batch
    # blocking actually kicks in: TB=16 -> grid=(2,), 128-row matmuls/step).
    bs, ne = 32, 8           # batch, number of entities
    in_dim = 32
    embed_dim = 32
    out_dim = 32
    n_heads = 4              # args.mixing_attn_heads
    n_agents = 3             # args.n_agents -> n_queries (post_mask.shape[1])

    key = jax.random.PRNGKey(0)
    k_ent, k_win, k_wout, k_bout, k_msk = jax.random.split(key, 5)

    entities = jax.random.normal(k_ent, (bs, ne, in_dim), dtype=jnp.float32)

    # Deterministic parameter init (synthetic, not a checkpoint load).
    w_in_t = (jax.random.normal(k_win, (in_dim, 3 * embed_dim), dtype=jnp.float32)
              * (1.0 / jnp.sqrt(jnp.float32(in_dim))))
    w_out_t = (jax.random.normal(k_wout, (embed_dim, out_dim), dtype=jnp.float32)
               * (1.0 / jnp.sqrt(jnp.float32(embed_dim))))
    b_out = jax.random.normal(k_bout, (out_dim,), dtype=jnp.float32) * 0.01

    # post_mask: (bs, n_agents), ~20% of agent slots masked out.
    post_mask = (jax.random.uniform(k_msk, (bs, n_agents)) < 0.2).astype(jnp.int32)

    out = entity_attention_forward(entities, post_mask, w_in_t, w_out_t, b_out,
                                   n_heads=n_heads)
    out = jax.block_until_ready(out)

    ref = _reference_forward(entities, post_mask, w_in_t, w_out_t, b_out, n_heads)
    assert out.shape == (bs, n_agents, out_dim)
    max_err = float(jnp.max(jnp.abs(out - ref)))
    # Tolerance accounts for the approximate (EUP) reciprocal in the softmax.
    assert jnp.allclose(out, ref, atol=5e-3, rtol=5e-3), \
        f"mismatch vs reference (max abs err {max_err})"

    print("KERNEL_OK")
</pallas_src>

<mosaic_0001>
module attributes {stable_mosaic.version = 11 : i64} {
  func.func @_entity_attention_kernel(%arg0: i32, %arg1: memref<128x32xf32, #tpu.memory_space<vmem>>, %arg2: memref<16x3x1xf32, #tpu.memory_space<vmem>>, %arg3: memref<32x96xf32, #tpu.memory_space<vmem>>, %arg4: memref<32x32xf32, #tpu.memory_space<vmem>>, %arg5: memref<1x32xf32, #tpu.memory_space<vmem>>, %arg6: memref<16x3x32xf32, #tpu.memory_space<vmem>>) attributes {dimension_semantics = [#tpu.dimension_semantics<parallel>], iteration_bounds = array<i64: 2>, scalar_prefetch = 0 : i64, scratch_operands = 0 : i64, tpu.core_type = #tpu.core_type<tc>, window_params = [{transform_indices = @transform_0, window_bounds = array<i64: 128, 32>}, {transform_indices = @transform_1, window_bounds = array<i64: 16, 3, 1>}, {pipeline_mode = #tpu.pipeline_mode<synchronous>, transform_indices = @transform_2, window_bounds = array<i64: 32, 96>}, {pipeline_mode = #tpu.pipeline_mode<synchronous>, transform_indices = @transform_3, window_bounds = array<i64: 32, 32>}, {pipeline_mode = #tpu.pipeline_mode<synchronous>, transform_indices = @transform_4, window_bounds = array<i64: 1, 32>}, {transform_indices = @transform_5, window_bounds = array<i64: 16, 3, 32>}]} {
    %c0 = arith.constant 0 : index
    %c0_0 = arith.constant 0 : index
    %0 = vector.load %arg1[%c0, %c0_0] : memref<128x32xf32, #tpu.memory_space<vmem>>, vector<128x32xf32>
    %c0_1 = arith.constant 0 : index
    %c0_2 = arith.constant 0 : index
    %1 = vector.load %arg3[%c0_1, %c0_2] : memref<32x96xf32, #tpu.memory_space<vmem>>, vector<32x96xf32>
    %cst = arith.constant dense<0.000000e+00> : vector<128x96xf32>
    %2 = tpu.matmul %0, %1, %cst {dimension_numbers = #tpu.dot_dimension_numbers<[1], [0], [0], [1], [0, 0, 1, 1], [], []>} : vector<128x32xf32>, vector<32x96xf32>, vector<128x96xf32> -> vector<128x96xf32>
    %3 = vector.shape_cast %2 : vector<128x96xf32> to vector<16x8x96xf32>
    %4 = vector.extract_strided_slice %3 {offsets = [0, 0, 0], sizes = [16, 8, 8], strides = [1, 1, 1]} : vector<16x8x96xf32> to vector<16x8x8xf32>
    %5 = vector.extract_strided_slice %3 {offsets = [0, 0, 32], sizes = [16, 8, 8], strides = [1, 1, 1]} : vector<16x8x96xf32> to vector<16x8x8xf32>
    %6 = vector.extract_strided_slice %3 {offsets = [0, 0, 64], sizes = [16, 8, 8], strides = [1, 1, 1]} : vector<16x8x96xf32> to vector<16x8x8xf32>
    "tpu.trace_start"() <{level = 10 : i32, message = "bqd,bkd->bqk"}> : () -> ()
    %cst_3 = arith.constant dense<0.000000e+00> : vector<16x8x8xf32>
    %7 = tpu.matmul %4, %5, %cst_3 {dimension_numbers = #tpu.dot_dimension_numbers<[2], [2], [1], [1], [0, 0, 0, 1, 1, 1], [0], [0]>} : vector<16x8x8xf32>, vector<16x8x8xf32>, vector<16x8x8xf32> -> vector<16x8x8xf32>
    "tpu.trace_stop"() : () -> ()
    %cst_4 = arith.constant 0.353553385 : f32
    %8 = vector.broadcast %cst_4 : f32 to vector<16x8x8xf32>
    %9 = arith.mulf %7, %8 : vector<16x8x8xf32>
    %cst_5 = arith.constant dense<0xFF800000> : vector<16x8xf32>
    %10 = vector.multi_reduction <maximumf>, %9, %cst_5 [2] : vector<16x8x8xf32> to vector<16x8xf32>
    %11 = vector.shape_cast %10 : vector<16x8xf32> to vector<16x8x1xf32>
    %12 = vector.broadcast %11 : vector<16x8x1xf32> to vector<16x8x8xf32>
    %13 = arith.subf %9, %12 : vector<16x8x8xf32>
    %14 = math.exp %13 : vector<16x8x8xf32>
    %cst_6 = arith.constant dense<0.000000e+00> : vector<16x8xf32>
    %15 = vector.multi_reduction <add>, %14, %cst_6 [2] : vector<16x8x8xf32> to vector<16x8xf32>
    %16 = vector.shape_cast %15 : vector<16x8xf32> to vector<16x8x1xf32>
    %17 = tpu.reciprocal %16 {approx = true} : vector<16x8x1xf32> -> vector<16x8x1xf32>
    %18 = vector.broadcast %17 : vector<16x8x1xf32> to vector<16x8x8xf32>
    %19 = arith.mulf %14, %18 : vector<16x8x8xf32>
    "tpu.trace_start"() <{level = 10 : i32, message = "bqk,bkd->bqd"}> : () -> ()
    %cst_7 = arith.constant dense<0.000000e+00> : vector<16x8x8xf32>
    %20 = tpu.matmul %19, %6, %cst_7 {dimension_numbers = #tpu.dot_dimension_numbers<[2], [1], [1], [2], [0, 0, 0, 1, 1, 2], [0], [0]>} : vector<16x8x8xf32>, vector<16x8x8xf32>, vector<16x8x8xf32> -> vector<16x8x8xf32>
    "tpu.trace_stop"() : () -> ()
    %21 = vector.extract_strided_slice %3 {offsets = [0, 0, 8], sizes = [16, 8, 8], strides = [1, 1, 1]} : vector<16x8x96xf32> to vector<16x8x8xf32>
    %22 = vector.extract_strided_slice %3 {offsets = [0, 0, 40], sizes = [16, 8, 8], strides = [1, 1, 1]} : vector<16x8x96xf32> to vector<16x8x8xf32>
    %23 = vector.extract_strided_slice %3 {offsets = [0, 0, 72], sizes = [16, 8, 8], strides = [1, 1, 1]} : vector<16x8x96xf32> to vector<16x8x8xf32>
    "tpu.trace_start"() <{level = 10 : i32, message = "bqd,bkd->bqk"}> : () -> ()
    %cst_8 = arith.constant dense<0.000000e+00> : vector<16x8x8xf32>
    %24 = tpu.matmul %21, %22, %cst_8 {dimension_numbers = #tpu.dot_dimension_numbers<[2], [2], [1], [1], [0, 0, 0, 1, 1, 1], [0], [0]>} : vector<16x8x8xf32>, vector<16x8x8xf32>, vector<16x8x8xf32> -> vector<16x8x8xf32>
    "tpu.trace_stop"() : () -> ()
    %cst_9 = arith.constant 0.353553385 : f32
    %25 = vector.broadcast %cst_9 : f32 to vector<16x8x8xf32>
    %26 = arith.mulf %24, %25 : vector<16x8x8xf32>
    %cst_10 = arith.constant dense<0xFF800000> : vector<16x8xf32>
    %27 = vector.multi_reduction <maximumf>, %26, %cst_10 [2] : vector<16x8x8xf32> to vector<16x8xf32>
    %28 = vector.shape_cast %27 : vector<16x8xf32> to vector<16x8x1xf32>
    %29 = vector.broadcast %28 : vector<16x8x1xf32> to vector<16x8x8xf32>
    %30 = arith.subf %26, %29 : vector<16x8x8xf32>
    %31 = math.exp %30 : vector<16x8x8xf32>
    %cst_11 = arith.constant dense<0.000000e+00> : vector<16x8xf32>
    %32 = vector.multi_reduction <add>, %31, %cst_11 [2] : vector<16x8x8xf32> to vector<16x8xf32>
    %33 = vector.shape_cast %32 : vector<16x8xf32> to vector<16x8x1xf32>
    %34 = tpu.reciprocal %33 {approx = true} : vector<16x8x1xf32> -> vector<16x8x1xf32>
    %35 = vector.broadcast %34 : vector<16x8x1xf32> to vector<16x8x8xf32>
    %36 = arith.mulf %31, %35 : vector<16x8x8xf32>
    "tpu.trace_start"() <{level = 10 : i32, message = "bqk,bkd->bqd"}> : () -> ()
    %cst_12 = arith.constant dense<0.000000e+00> : vector<16x8x8xf32>
    %37 = tpu.matmul %36, %23, %cst_12 {dimension_numbers = #tpu.dot_dimension_numbers<[2], [1], [1], [2], [0, 0, 0, 1, 1, 2], [0], [0]>} : vector<16x8x8xf32>, vector<16x8x8xf32>, vector<16x8x8xf32> -> vector<16x8x8xf32>
    "tpu.trace_stop"() : () -> ()
    %38 = vector.extract_strided_slice %3 {offsets = [0, 0, 16], sizes = [16, 8, 8], strides = [1, 1, 1]} : vector<16x8x96xf32> to vector<16x8x8xf32>
    %39 = vector.extract_strided_slice %3 {offsets = [0, 0, 48], sizes = [16, 8, 8], strides = [1, 1, 1]} : vector<16x8x96xf32> to vector<16x8x8xf32>
    %40 = vector.extract_strided_slice %3 {offsets = [0, 0, 80], sizes = [16, 8, 8], strides = [1, 1, 1]} : vector<16x8x96xf32> to vector<16x8x8xf32>
    "tpu.trace_start"() <{level = 10 : i32, message = "bqd,bkd->bqk"}> : () -> ()
    %cst_13 = arith.constant dense<0.000000e+00> : vector<16x8x8xf32>
    %41 = tpu.matmul %38, %39, %cst_13 {dimension_numbers = #tpu.dot_dimension_numbers<[2], [2], [1], [1], [0, 0, 0, 1, 1, 1], [0], [0]>} : vector<16x8x8xf32>, vector<16x8x8xf32>, vector<16x8x8xf32> -> vector<16x8x8xf32>
    "tpu.trace_stop"() : () -> ()
    %cst_14 = arith.constant 0.353553385 : f32
    %42 = vector.broadcast %cst_14 : f32 to vector<16x8x8xf32>
    %43 = arith.mulf %41, %42 : vector<16x8x8xf32>
    %cst_15 = arith.constant dense<0xFF800000> : vector<16x8xf32>
    %44 = vector.multi_reduction <maximumf>, %43, %cst_15 [2] : vector<16x8x8xf32> to vector<16x8xf32>
    %45 = vector.shape_cast %44 : vector<16x8xf32> to vector<16x8x1xf32>
    %46 = vector.broadcast %45 : vector<16x8x1xf32> to vector<16x8x8xf32>
    %47 = arith.subf %43, %46 : vector<16x8x8xf32>
    %48 = math.exp %47 : vector<16x8x8xf32>
    %cst_16 = arith.constant dense<0.000000e+00> : vector<16x8xf32>
    %49 = vector.multi_reduction <add>, %48, %cst_16 [2] : vector<16x8x8xf32> to vector<16x8xf32>
    %50 = vector.shape_cast %49 : vector<16x8xf32> to vector<16x8x1xf32>
    %51 = tpu.reciprocal %50 {approx = true} : vector<16x8x1xf32> -> vector<16x8x1xf32>
    %52 = vector.broadcast %51 : vector<16x8x1xf32> to vector<16x8x8xf32>
    %53 = arith.mulf %48, %52 : vector<16x8x8xf32>
    "tpu.trace_start"() <{level = 10 : i32, message = "bqk,bkd->bqd"}> : () -> ()
    %cst_17 = arith.constant dense<0.000000e+00> : vector<16x8x8xf32>
    %54 = tpu.matmul %53, %40, %cst_17 {dimension_numbers = #tpu.dot_dimension_numbers<[2], [1], [1], [2], [0, 0, 0, 1, 1, 2], [0], [0]>} : vector<16x8x8xf32>, vector<16x8x8xf32>, vector<16x8x8xf32> -> vector<16x8x8xf32>
    "tpu.trace_stop"() : () -> ()
    %55 = vector.extract_strided_slice %3 {offsets = [0, 0, 24], sizes = [16, 8, 8], strides = [1, 1, 1]} : vector<16x8x96xf32> to vector<16x8x8xf32>
    %56 = vector.extract_strided_slice %3 {offsets = [0, 0, 56], sizes = [16, 8, 8], strides = [1, 1, 1]} : vector<16x8x96xf32> to vector<16x8x8xf32>
    %57 = vector.extract_strided_slice %3 {offsets = [0, 0, 88], sizes = [16, 8, 8], strides = [1, 1, 1]} : vector<16x8x96xf32> to vector<16x8x8xf32>
    "tpu.trace_start"() <{level = 10 : i32, message = "bqd,bkd->bqk"}> : () -> ()
    %cst_18 = arith.constant dense<0.000000e+00> : vector<16x8x8xf32>
    %58 = tpu.matmul %55, %56, %cst_18 {dimension_numbers = #tpu.dot_dimension_numbers<[2], [2], [1], [1], [0, 0, 0, 1, 1, 1], [0], [0]>} : vector<16x8x8xf32>, vector<16x8x8xf32>, vector<16x8x8xf32> -> vector<16x8x8xf32>
    "tpu.trace_stop"() : () -> ()
    %cst_19 = arith.constant 0.353553385 : f32
    %59 = vector.broadcast %cst_19 : f32 to vector<16x8x8xf32>
    %60 = arith.mulf %58, %59 : vector<16x8x8xf32>
    %cst_20 = arith.constant dense<0xFF800000> : vector<16x8xf32>
    %61 = vector.multi_reduction <maximumf>, %60, %cst_20 [2] : vector<16x8x8xf32> to vector<16x8xf32>
    %62 = vector.shape_cast %61 : vector<16x8xf32> to vector<16x8x1xf32>
    %63 = vector.broadcast %62 : vector<16x8x1xf32> to vector<16x8x8xf32>
    %64 = arith.subf %60, %63 : vector<16x8x8xf32>
    %65 = math.exp %64 : vector<16x8x8xf32>
    %cst_21 = arith.constant dense<0.000000e+00> : vector<16x8xf32>
    %66 = vector.multi_reduction <add>, %65, %cst_21 [2] : vector<16x8x8xf32> to vector<16x8xf32>
    %67 = vector.shape_cast %66 : vector<16x8xf32> to vector<16x8x1xf32>
    %68 = tpu.reciprocal %67 {approx = true} : vector<16x8x1xf32> -> vector<16x8x1xf32>
    %69 = vector.broadcast %68 : vector<16x8x1xf32> to vector<16x8x8xf32>
    %70 = arith.mulf %65, %69 : vector<16x8x8xf32>
    "tpu.trace_start"() <{level = 10 : i32, message = "bqk,bkd->bqd"}> : () -> ()
    %cst_22 = arith.constant dense<0.000000e+00> : vector<16x8x8xf32>
    %71 = tpu.matmul %70, %57, %cst_22 {dimension_numbers = #tpu.dot_dimension_numbers<[2], [1], [1], [2], [0, 0, 0, 1, 1, 2], [0], [0]>} : vector<16x8x8xf32>, vector<16x8x8xf32>, vector<16x8x8xf32> -> vector<16x8x8xf32>
    "tpu.trace_stop"() : () -> ()
    %72 = tpu.concatenate %20, %37, %54, %71 in 2 : vector<16x8x8xf32>, vector<16x8x8xf32>, vector<16x8x8xf32>, vector<16x8x8xf32> -> vector<16x8x32xf32>
    %73 = vector.shape_cast %72 : vector<16x8x32xf32> to vector<128x32xf32>
    %c0_23 = arith.constant 0 : index
    %c0_24 = arith.constant 0 : index
    %74 = vector.load %arg4[%c0_23, %c0_24] : memref<32x32xf32, #tpu.memory_space<vmem>>, vector<32x32xf32>
    %cst_25 = arith.constant dense<0.000000e+00> : vector<128x32xf32>
    %75 = tpu.matmul %73, %74, %cst_25 {dimension_numbers = #tpu.dot_dimension_numbers<[1], [0], [0], [1], [0, 0, 1, 1], [], []>} : vector<128x32xf32>, vector<32x32xf32>, vector<128x32xf32> -> vector<128x32xf32>
    %c0_26 = arith.constant 0 : index
    %c0_27 = arith.constant 0 : index
    %76 = vector.load %arg5[%c0_26, %c0_27] : memref<1x32xf32, #tpu.memory_space<vmem>>, vector<1x32xf32>
    %77 = vector.broadcast %76 : vector<1x32xf32> to vector<128x32xf32>
    %78 = arith.addf %75, %77 : vector<128x32xf32>
    %79 = vector.shape_cast %78 : vector<128x32xf32> to vector<16x8x32xf32>
    %80 = vector.extract_strided_slice %79 {offsets = [0, 0, 0], sizes = [16, 3, 32], strides = [1, 1, 1]} : vector<16x8x32xf32> to vector<16x3x32xf32>
    %c0_28 = arith.constant 0 : index
    %c0_29 = arith.constant 0 : index
    %c0_30 = arith.constant 0 : index
    %81 = vector.load %arg2[%c0_28, %c0_29, %c0_30] : memref<16x3x1xf32, #tpu.memory_space<vmem>>, vector<16x3x1xf32>
    %cst_31 = arith.constant 0.000000e+00 : f32
    %82 = vector.broadcast %cst_31 : f32 to vector<16x3x1xf32>
    %83 = arith.cmpf one, %81, %82 : vector<16x3x1xf32>
    %cst_32 = arith.constant 0.000000e+00 : f32
    %84 = vector.shape_cast %83 : vector<16x3x1xi1> to vector<16x3x1xi1>
    %85 = vector.broadcast %84 : vector<16x3x1xi1> to vector<16x3x32xi1>
    %86 = vector.broadcast %cst_32 : f32 to vector<16x3x32xf32>
    %87 = arith.select %85, %86, %80 : vector<16x3x32xi1>, vector<16x3x32xf32>
    %c0_33 = arith.constant 0 : index
    %c0_34 = arith.constant 0 : index
    %c0_35 = arith.constant 0 : index
    %88 = vector.load %arg6[%c0_33, %c0_34, %c0_35] : memref<16x3x32xf32, #tpu.memory_space<vmem>>, vector<16x3x32xf32>
    tpu.vector_store %arg6[%c0_33, %c0_34, %c0_35], %87 {strides = array<i32>} : memref<16x3x32xf32, #tpu.memory_space<vmem>>, vector<16x3x32xf32>,
    return
  }
  func.func @transform_0(%arg0: i32) -> (i32, i32) {
    %c0_i32 = arith.constant 0 : i32
    %c0_i32_0 = arith.constant 0 : i32
    return %arg0, %c0_i32 : i32, i32
  }
  func.func @transform_1(%arg0: i32) -> (i32, i32, i32) {
    %c0_i32 = arith.constant 0 : i32
    %c0_i32_0 = arith.constant 0 : i32
    %c0_i32_1 = arith.constant 0 : i32
    return %arg0, %c0_i32, %c0_i32_0 : i32, i32, i32
  }
  func.func @transform_2(%arg0: i32) -> (i32, i32) {
    %c0_i32 = arith.constant 0 : i32
    %c0_i32_0 = arith.constant 0 : i32
    %c0_i32_1 = arith.constant 0 : i32
    return %c0_i32, %c0_i32_0 : i32, i32
  }
  func.func @transform_3(%arg0: i32) -> (i32, i32) {
    %c0_i32 = arith.constant 0 : i32
    %c0_i32_0 = arith.constant 0 : i32
    %c0_i32_1 = arith.constant 0 : i32
    return %c0_i32, %c0_i32_0 : i32, i32
  }
  func.func @transform_4(%arg0: i32) -> (i32, i32) {
    %c0_i32 = arith.constant 0 : i32
    %c0_i32_0 = arith.constant 0 : i32
    %c0_i32_1 = arith.constant 0 : i32
    return %c0_i32, %c0_i32_0 : i32, i32
  }
  func.func @transform_5(%arg0: i32) -> (i32, i32, i32) {
    %c0_i32 = arith.constant 0 : i32
    %c0_i32_0 = arith.constant 0 : i32
    %c0_i32_1 = arith.constant 0 : i32
    return %arg0, %c0_i32, %c0_i32_0 : i32, i32, i32
  }
}

</mosaic_0001>

<bundles_post_ra>
// kernel: tpu_custom_call.1
= control target key start
LH: loop header
LB: loop body
LE: loop exit
PB: predicated region body
PF: predicated region fallthrough
CT: control target
= control target key end

     0   :  { %s13316_s18 = smov 0   ;;  %s15675_s0 = inlined_call_operand.vmem [shape: f32[256,32], index: 0, kind: input, shape index: {}]   ;;  %s15676_s1 = inlined_call_operand.vmem [shape: f32[32,3,1], index: 1, kind: input, shape index: {}]   ;;  %s15677_s2 = inlined_call_operand.vmem [shape: f32[32,96], index: 2, kind: input, shape index: {}]   ;;  %s15678_s3 = inlined_call_operand.vmem [shape: f32[32,32], index: 3, kind: input, shape index: {}]   ;;  %s15679_s4 = inlined_call_operand.vmem [shape: f32[1,32], index: 4, kind: input, shape index: {}]   ;;  %s15680_s5 = inlined_call_operand.vmem [shape: f32[32,3,32], index: 5, kind: output, shape index: {}]  }
   0x1 LB: > { %s11732_s19 = sadd.s32 4294967295, %s13267_s18   ;;  %p11736_p0 = scmp.ge.s32.totalorder %s13267_s18, 1  ;;  %s13267_s18 = sphi %s13316_s18, %s15_s18  }
   0x2   : > { %p199_p1 = scmp.lt.s32.totalorder %s13267_s18, 3 }
   0x4   : > { %p200_p2 = pnand %p11736_p0, %p199_p1 }
   0x6   : > { %203 = sbr.rel (%p200_p2) target bundleno = 3251 (0xcb3), region = 40 }
   0xb   : > { %v269_v0 = vld [vmem:[%s15677_s2 + $0x18] sm:$0xff]  ;;  %v268_v1 = vld [vmem:[%s15677_s2 + $0x10] sm:$0xff]  ;;  %s11737_s24 = sshll.u32 %s11732_s19, 4  ;;  %v267_v2 = vld [vmem:[%s15677_s2 + $0x8] sm:$0xff]  ;;  %vm270_vm0 = vcmask 261120   ;;  %v15681_v20 = vmov 0.0  }
   0xc   : > { %12266 = vmatprep.subr.mxu0 %v269_v0  ;;  %p233_p3 = scmp.lt.s32.totalorder %s11737_s24, 31  ;;  %v266_v3 = vld [vmem:[%s15677_s2] sm:$0xff]  ;;  %12298 = vmatprep.subr.mxu1 %v15681_v20  ;;  %vm13270_vm1 = vmmov 0   ;;  %s13271_s8 = smov 96   ;;  %vm467_vm2 = vcmask 64512   ;;  %vm11281_vm3 = vcmask 130048  }
   0xd   : > { %12267 = vmatpush3.msra.mxu0 %v269_v0  ;;  %12300 = vmatprep.mubr.msk.f32.mxu1 %vm13270_vm1, %v15681_v20  ;;  %s13272_s9 = smov 64   ;;  %s13273_s10 = smov 88   ;;  %vm11298_vm8 = vcmask 195584  }
   0xe   : > { %12268 = vmatprep.subr.mxu0 %v268_v1  ;;  %s15811_s24 = smov (!%p233_p3, %s11737_s24), 31  ;;  %s13274_s11 = smov 120  }
   0xf   : > { %12269 = vmatpush3.msra.mxu0 %v268_v1  ;;  %s11738_s29 = sshll.u32 %s15811_s24, 3  ;;  %s13275_s12 = smov 56  }
  0x10   : > { %12270 = vmatprep.subr.mxu0 %v267_v2  ;;  %s13342_s7 = scalar_lea.vmem %s15675_s0, %s11738_s29  ;;  %s13276_s13 = smov 80  }
  0x11   : > { %12271 = vmatpush3.msra.mxu0 %v267_v2  ;;  %v250_v4 = vld [vmem:[%s13342_s7] sm:$0xff]  ;;  %v251_v5 = vld [vmem:[%s13342_s7 + $0x8] sm:$0xff]  ;;  %v252_v6 = vld [vmem:[%s13342_s7 + $0x10] sm:$0xff]  ;;  %s13277_s14 = smov 112   ;;  %s13278_s15 = smov 48  }
  0x12   : > { %12272 = vmatprep.subr.mxu0 %v266_v3  ;;  %12274 = vmatprep.mubr.msk.f32.mxu0 %vm270_vm0, %v250_v4  ;;  %v253_v7 = vld [vmem:[%s13342_s7 + $0x18] sm:$0xff]  ;;  %v254_v8 = vld [vmem:[%s13342_s7 + $0x20] sm:$0xff]  ;;  %v255_v9 = vld [vmem:[%s13342_s7 + $0x28] sm:$0xff]  ;;  %s13279_s16 = smov 72   ;;  %s13280_s17 = smov 104  }
  0x13   : > { %12273 = vmatpush3.msra.mxu0 %v266_v3  ;;  %v256_v10 = vld [vmem:[%s13342_s7 + $0x30] sm:$0xff]  ;;  %v257_v11 = vld [vmem:[%s13342_s7 + $0x38] sm:$0xff]  ;;  %v258_v12 = vld [vmem:[%s13342_s7 + $0x40] sm:$0xff]  ;;  %s13281_s19 = smov 40   ;;  %s13282_s20 = smov 8  }
  0x14   : > { %12275 = vmatmul.mubr.msk.f32.vlgmr.msra.gmra.mxu0 %vm270_vm0, %v251_v5  ;;  %v259_v13 = vld [vmem:[%s13342_s7 + $0x48] sm:$0xff]  ;;  %v260_v14 = vld [vmem:[%s13342_s7 + $0x50] sm:$0xff]  ;;  %v261_v15 = vld [vmem:[%s13342_s7 + $0x58] sm:$0xff]  ;;  %12343 = vmatprep.subr.mxu0 %v15681_v20  ;;  %s13283_s21 = smov 16   ;;  %s13284_s22 = smov 24  }
  0x15   : > { %12277 = vmatprep.mubr.msk.f32.mxu0 %vm270_vm0, %v252_v6  ;;  %v262_v16 = vld [vmem:[%s13342_s7 + $0x60] sm:$0xff]  ;;  %v263_v17 = vld [vmem:[%s13342_s7 + $0x68] sm:$0xff]  ;;  %v264_v18 = vld [vmem:[%s13342_s7 + $0x70] sm:$0xff] }
  0x16   : > { %v265_v19 = vld [vmem:[%s13342_s7 + $0x78] sm:$0xff]  ;;  %s11740_s7 = sshll.u32 %s15811_s24, 2 }
  0x18   : > { %12278 = vmatmul.mubr.msk.f32.gmra.mxu0 %vm270_vm0, %v253_v7 }
  0x19   : > { %12280 = vmatprep.mubr.msk.f32.mxu0 %vm270_vm0, %v254_v8 }
  0x1c   : > { %12281 = vmatmul.mubr.msk.f32.gmra.mxu0 %vm270_vm0, %v255_v9 }
  0x1d   : > { %12283 = vmatprep.mubr.msk.f32.mxu0 %vm270_vm0, %v256_v10 }
  0x20   : > { %12284 = vmatmul.mubr.msk.f32.gmra.mxu0 %vm270_vm0, %v257_v11 }
  0x21   : > { %12286 = vmatprep.mubr.msk.f32.mxu0 %vm270_vm0, %v258_v12 }
  0x24   : > { %12287 = vmatmul.mubr.msk.f32.gmra.mxu0 %vm270_vm0, %v259_v13 }
  0x25   : > { %12289 = vmatprep.mubr.msk.f32.mxu0 %vm270_vm0, %v260_v14 }
  0x28   : > { %12290 = vmatmul.mubr.msk.f32.gmra.mxu0 %vm270_vm0, %v261_v15 }
  0x29   : > { %12292 = vmatprep.mubr.msk.f32.mxu0 %vm270_vm0, %v262_v16 }
  0x2c   : > { %12293 = vmatmul.mubr.msk.f32.gmra.mxu0 %vm270_vm0, %v263_v17 }
  0x2d   : > { %12295 = vmatprep.mubr.msk.f32.mxu0 %vm270_vm0, %v264_v18 }
  0x30   : > { %12296 = vmatmul.mubr.msk.f32.gmra.mxu0 %vm270_vm0, %v265_v19 }
  0x31   : > { %12345 = vmatprep.mubr.msk.f32.mxu0 %vm13270_vm1, %v15681_v20 }
  0xd4   : > { %v13382_v21 = vpop.f32.mrf.mxu0 }
  0xd5   : > { %15693 = vst [vmem:[#allocation2_spill] sm:$0xff] %v13382_v21 }
  0xd6   : > { %v13384_v22 = vpop.f32.mrf.mxu0 }
  0xd7   : > { %15694 = vst [vmem:[#allocation3_spill] sm:$0xff] %v13384_v22  ;;  %465 = vrot.lane.b32.xlu0 %v13384_v22, %s13271_s8 }
  0xd8   : > { %v13387_v23 = vpop.f32.mrf.mxu0 }
  0xd9   : > { %15695 = vst [vmem:[#allocation4_spill] sm:$0xff] %v13387_v23 }
  0xda   : > { %v13389_v24 = vpop.f32.mrf.mxu0 }
  0xdb   : > { %15696 = vst [vmem:[#allocation5_spill] sm:$0xff] %v13389_v24  ;;  %543 = vrot.lane.b32.xlu0 %v13382_v21, %s13271_s8  ;;  %620 = vrot.lane.b32.xlu1 %v13389_v24, %s13271_s8 }
  0xdc   : > { %v13393_v25 = vpop.f32.mrf.mxu0 }
  0xdd   : > { %15697 = vst [vmem:[#allocation6_spill] sm:$0xff] %v13393_v25 }
  0xde   : > { %v13395_v26 = vpop.f32.mrf.mxu0 }
  0xdf   : > { %15698 = vst [vmem:[#allocation7_spill] sm:$0xff] %v13395_v26  ;;  %697 = vrot.lane.b32.xlu1 %v13387_v23, %s13271_s8  ;;  %774 = vrot.lane.b32.xlu0 %v13395_v26, %s13271_s8 }
  0xe0   : > { %v13399_v27 = vpop.f32.mrf.mxu0 }
  0xe2   : > { %v13401_v28 = vpop.f32.mrf.mxu0 }
  0xe3   : > { %15699 = vst [vmem:[#allocation8_spill] sm:$0xff] %v13401_v28  ;;  %851 = vrot.lane.b32.xlu1 %v13393_v25, %s13271_s8  ;;  %928 = vrot.lane.b32.xlu0 %v13401_v28, %s13271_s8 }
  0xe4   : > { %v13405_v29 = vpop.f32.mrf.mxu0 }
  0xe6   : > { %v13407_v30 = vpop.f32.mrf.mxu0 }
  0xe7   : > { %1005 = vrot.lane.b32.xlu1 %v13399_v27, %s13271_s8  ;;  %1082 = vrot.lane.b32.xlu0 %v13407_v30, %s13271_s8 }
  0xe8   : > { %v13411_v31 = vpop.f32.mrf.mxu0 }
  0xea   : > { %v13413_v32 = vpop.f32.mrf.mxu0 }
  0xeb   : > { %15700 = vst [vmem:[#allocation9_spill] sm:$0xff] %v13413_v32  ;;  %1159 = vrot.lane.b32.xlu1 %v13405_v29, %s13271_s8  ;;  %1236 = vrot.lane.b32.xlu0 %v13413_v32, %s13271_s8 }
  0xec   : > { %v13417_v33 = vpop.f32.mrf.mxu0 }
  0xee   : > { %v13419_v34 = vpop.f32.mrf.mxu0 }
  0xef   : > { %1313 = vrot.lane.b32.xlu1 %v13411_v31, %s13271_s8  ;;  %1390 = vrot.lane.b32.xlu0 %v13419_v34, %s13271_s8 }
  0xf0   : > { %v13423_v35 = vpop.f32.mrf.mxu0 }
  0xf1   : > { %15701 = vst [vmem:[#allocation10_spill] sm:$0xff] %v13423_v35 }
  0xf2   : > { %v13425_v36 = vpop.f32.mrf.mxu0 }
  0xf3   : > { %15702 = vst [vmem:[#allocation11_spill] sm:$0xff] %v13425_v36  ;;  %1467 = vrot.lane.b32.xlu1 %v13417_v33, %s13271_s8  ;;  %1544 = vrot.lane.b32.xlu0 %v13425_v36, %s13271_s8 }
  0xf7   : > { %1621 = vrot.lane.b32.xlu1 %v13423_v35, %s13271_s8  ;;  %1965 = vrot.lane.b32.xlu0 %v13382_v21, %s13272_s9 }
  0xfb   : > { %1889 = vrot.lane.b32.xlu1 %v13384_v22, %s13272_s9  ;;  %2041 = vrot.lane.b32.xlu0 %v13389_v24, %s13272_s9 }
  0xff   : > { %2573 = vrot.lane.b32.xlu1 %v13405_v29, %s13272_s9  ;;  %2117 = vrot.lane.b32.xlu0 %v13387_v23, %s13272_s9 }
 0x103   : > { %3107 = vrot.lane.b32.xlu1 %v13384_v22, %s13273_s10  ;;  %2193 = vrot.lane.b32.xlu0 %v13395_v26, %s13272_s9 }
 0x107   : > { %3105 = vrot.lane.b32.xlu1 %v13384_v22, %s13274_s11  ;;  %2269 = vrot.lane.b32.xlu0 %v13393_v25, %s13272_s9 }
 0x10b   : > { %3263 = vrot.lane.b32.xlu1 %v13389_v24, %s13273_s10  ;;  %2345 = vrot.lane.b32.xlu0 %v13401_v28, %s13272_s9 }
 0x10f   : > { %3261 = vrot.lane.b32.xlu1 %v13389_v24, %s13274_s11  ;;  %2421 = vrot.lane.b32.xlu0 %v13399_v27, %s13272_s9 }
 0x113   : > { %3419 = vrot.lane.b32.xlu1 %v13395_v26, %s13273_s10  ;;  %2497 = vrot.lane.b32.xlu0 %v13407_v30, %s13272_s9 }
 0x117   : > { %3417 = vrot.lane.b32.xlu1 %v13395_v26, %s13274_s11  ;;  %2649 = vrot.lane.b32.xlu0 %v13413_v32, %s13272_s9 }
 0x11b   : > { %2953 = vrot.lane.b32.xlu1 %v13425_v36, %s13272_s9  ;;  %2725 = vrot.lane.b32.xlu0 %v13411_v31, %s13272_s9 }
 0x11f   : > { %2801 = vrot.lane.b32.xlu0 %v13419_v34, %s13272_s9 }
 0x123   : > { %2877 = vrot.lane.b32.xlu0 %v13417_v33, %s13272_s9 }
 0x127   : > { %3029 = vrot.lane.b32.xlu0 %v13423_v35, %s13272_s9 }
 0x12b   : > { %3185 = vrot.lane.b32.xlu0 %v13382_v21, %s13273_s10 }
 0x12f   : > { %3183 = vrot.lane.b32.xlu0 %v13382_v21, %s13274_s11 }
 0x133   : > { %3341 = vrot.lane.b32.xlu0 %v13387_v23, %s13273_s10 }
 0x137   : > { %3339 = vrot.lane.b32.xlu0 %v13387_v23, %s13274_s11 }
 0x13b   : > { %3497 = vrot.lane.b32.xlu0 %v13393_v25, %s13273_s10 }
 0x149   : > { %v466_v37 = vpop.permute.xlu0 %465 }
 0x14a   : > { %12299 = vmatpush3.xpose.msk.msra.mxu1 %vm467_vm2, %v466_v37 }
 0x14b   : > { %12303 = vmatprep.subr.mxu1 %v15681_v20 }
 0x14d   : > { %12301 = vmatmul.mubr.msk.f32.vlgmr.msra.gmra.mxu1 %vm467_vm2, %v13384_v22  ;;  %v544_v38 = vpop.permute.xlu0 %543  ;;  %v621_v39 = vpop.permute.xlu1 %620 }
 0x14e   : > { %12304 = vmatpush3.xpose.msk.msra.mxu1 %vm467_vm2, %v544_v38  ;;  %12305 = vmatprep.mubr.msk.f32.mxu1 %vm13270_vm1, %v15681_v20 }
 0x14f   : > { %12308 = vmatprep.subr.mxu1 %v15681_v20 }
 0x151   : > { %12306 = vmatmul.mubr.msk.f32.vlgmr.msra.gmra.mxu1 %vm467_vm2, %v13382_v21  ;;  %v698_v40 = vpop.permute.xlu1 %697  ;;  %v775_v41 = vpop.permute.xlu0 %774 }
 0x152   : > { %12309 = vmatpush3.xpose.msk.msra.mxu1 %vm467_vm2, %v621_v39  ;;  %12310 = vmatprep.mubr.msk.f32.mxu1 %vm13270_vm1, %v15681_v20 }
 0x153   : > { %12313 = vmatprep.subr.mxu1 %v15681_v20 }
 0x155   : > { %12311 = vmatmul.mubr.msk.f32.vlgmr.msra.gmra.mxu1 %vm467_vm2, %v13389_v24  ;;  %v852_v42 = vpop.permute.xlu1 %851  ;;  %v929_v43 = vpop.permute.xlu0 %928 }
 0x156   : > { %12314 = vmatpush3.xpose.msk.msra.mxu1 %vm467_vm2, %v698_v40  ;;  %12315 = vmatprep.mubr.msk.f32.mxu1 %vm13270_vm1, %v15681_v20 }
 0x157   : > { %12318 = vmatprep.subr.mxu1 %v15681_v20 }
 0x159   : > { %12316 = vmatmul.mubr.msk.f32.vlgmr.msra.gmra.mxu1 %vm467_vm2, %v13387_v23  ;;  %v1006_v44 = vpop.permute.xlu1 %1005  ;;  %v1083_v45 = vpop.permute.xlu0 %1082 }
 0x15a   : > { %12319 = vmatpush3.xpose.msk.msra.mxu1 %vm467_vm2, %v775_v41  ;;  %12320 = vmatprep.mubr.msk.f32.mxu1 %vm13270_vm1, %v15681_v20 }
 0x15b   : > { %12323 = vmatprep.subr.mxu1 %v15681_v20 }
 0x15d   : > { %12321 = vmatmul.mubr.msk.f32.vlgmr.msra.gmra.mxu1 %vm467_vm2, %v13395_v26  ;;  %v1160_v46 = vpop.permute.xlu1 %1159  ;;  %v1237_v47 = vpop.permute.xlu0 %1236 }
 0x15e   : > { %12324 = vmatpush3.xpose.msk.msra.mxu1 %vm467_vm2, %v852_v42  ;;  %12344 = vmatpush3.xpose.msk.msra.mxu0 %vm467_vm2, %v1160_v46 }
 0x15f   : > { %12325 = vmatprep.mubr.msk.f32.mxu1 %vm13270_vm1, %v15681_v20  ;;  %12328 = vmatprep.subr.mxu1 %v15681_v20 }
 0x160   : > { %12353 = vmatprep.subr.mxu0 %v15681_v20 }
 0x161   : > { %12326 = vmatmul.mubr.msk.f32.vlgmr.msra.gmra.mxu1 %vm467_vm2, %v13393_v25  ;;  %12346 = vmatmul.mubr.msk.f32.vlgmr.msra.gmra.mxu0 %vm467_vm2, %v13405_v29  ;;  %v1314_v48 = vpop.permute.xlu1 %1313  ;;  %v1391_v49 = vpop.permute.xlu0 %1390 }
 0x162   : > { %12329 = vmatpush3.xpose.msk.msra.mxu1 %vm467_vm2, %v929_v43  ;;  %12354 = vmatpush3.xpose.msk.msra.mxu0 %vm467_vm2, %v1314_v48 }
 0x163   : > { %12330 = vmatprep.mubr.msk.f32.mxu1 %vm13270_vm1, %v15681_v20  ;;  %12355 = vmatprep.mubr.msk.f32.mxu0 %vm13270_vm1, %v15681_v20 }
 0x164   : > { %12333 = vmatprep.subr.mxu1 %v15681_v20  ;;  %12363 = vmatprep.subr.mxu0 %v15681_v20 }
 0x165   : > { %12331 = vmatmul.mubr.msk.f32.vlgmr.msra.gmra.mxu1 %vm467_vm2, %v13401_v28  ;;  %12356 = vmatmul.mubr.msk.f32.vlgmr.msra.gmra.mxu0 %vm467_vm2, %v13411_v31  ;;  %v1468_v50 = vpop.permute.xlu1 %1467  ;;  %v1545_v51 = vpop.permute.xlu0 %1544 }
 0x166   : > { %12334 = vmatpush3.xpose.msk.msra.mxu1 %vm467_vm2, %v1006_v44  ;;  %12364 = vmatpush3.xpose.msk.msra.mxu0 %vm467_vm2, %v1468_v50 }
 0x167   : > { %12335 = vmatprep.mubr.msk.f32.mxu1 %vm13270_vm1, %v15681_v20  ;;  %12365 = vmatprep.mubr.msk.f32.mxu0 %vm13270_vm1, %v15681_v20 }
 0x168   : > { %12338 = vmatprep.subr.mxu1 %v15681_v20  ;;  %12373 = vmatprep.subr.mxu0 %v15681_v20 }
 0x169   : > { %12336 = vmatmul.mubr.msk.f32.vlgmr.msra.gmra.mxu1 %vm467_vm2, %v13399_v27  ;;  %12366 = vmatmul.mubr.msk.f32.vlgmr.msra.gmra.mxu0 %vm467_vm2, %v13417_v33  ;;  %v1622_v52 = vpop.permute.xlu1 %1621  ;;  %v1966_v53 = vpop.permute.xlu0 %1965 }
 0x16a   : > { %12339 = vmatpush3.xpose.msk.msra.mxu1 %vm467_vm2, %v1083_v45  ;;  %12374 = vmatpush3.xpose.msk.msra.mxu0 %vm467_vm2, %v1622_v52 }
 0x16b   : > { %12340 = vmatprep.mubr.msk.f32.mxu1 %vm13270_vm1, %v15681_v20  ;;  %12375 = vmatprep.mubr.msk.f32.mxu0 %vm13270_vm1, %v15681_v20 }
 0x16c   : > { %12348 = vmatprep.subr.mxu1 %v15681_v20  ;;  %12383 = vmatprep.subr.mxu0 %v15681_v20 }
 0x16d   : > { %12341 = vmatmul.mubr.msk.f32.vlgmr.msra.gmra.mxu1 %vm467_vm2, %v13407_v30  ;;  %12376 = vmatmul.mubr.msk.f32.vlgmr.msra.gmra.mxu0 %vm467_vm2, %v13423_v35  ;;  %v1890_v54 = vpop.permute.xlu1 %1889 }
 0x16e   : > { %12349 = vmatpush3.xpose.msk.msra.mxu1 %vm467_vm2, %v1237_v47  ;;  %12384 = vmatpush3.msra.mxu0 %v1966_v53 }
 0x16f   : > { %12350 = vmatprep.mubr.msk.f32.mxu1 %vm13270_vm1, %v15681_v20  ;;  %12358 = vmatprep.subr.mxu1 %v15681_v20 }
 0x170   : > { %12385 = vmatprep.mubr.msk.f32.mxu0 %vm13270_vm1, %v15681_v20  ;;  %12393 = vmatprep.subr.mxu0 %v15681_v20 }
 0x171   : > { %12351 = vmatmul.mubr.msk.f32.vlgmr.msra.gmra.mxu1 %vm467_vm2, %v13413_v32 }
 0x172   : > { %12359 = vmatpush3.xpose.msk.msra.mxu1 %vm467_vm2, %v1391_v49  ;;  %12360 = vmatprep.mubr.msk.f32.mxu1 %vm13270_vm1, %v15681_v20 }
 0x173   : > { %12368 = vmatprep.subr.mxu1 %v15681_v20 }
 0x175   : > { %12361 = vmatmul.mubr.msk.f32.vlgmr.msra.gmra.mxu1 %vm467_vm2, %v13419_v34 }
 0x176   : > { %12369 = vmatpush3.xpose.msk.msra.mxu1 %vm467_vm2, %v1545_v51  ;;  %12370 = vmatprep.mubr.msk.f32.mxu1 %vm13270_vm1, %v15681_v20 }
 0x177   : > { %12378 = vmatprep.subr.mxu1 %v15681_v20 }
 0x179   : > { %12371 = vmatmul.mubr.msk.f32.vlgmr.msra.gmra.mxu1 %vm467_vm2, %v13425_v36 }
 0x17a   : > { %12379 = vmatpush3.msra.mxu1 %v1890_v54  ;;  %12380 = vmatprep.mubr.msk.f32.mxu1 %vm13270_vm1, %v15681_v20 }
 0x17b   : > { %12388 = vmatprep.subr.mxu1 %v15681_v20 }
 0x20d   : > { %v538_v55 = vpop.f32.mrf.mxu1 }
 0x20e   : > { %v13566_v56 = vmul.f32 0.35355338, %v538_v55 }
 0x20f   : > { %v12302_v57 = vpop.f32.mrf.mxu1 }
 0x210   : > { %v1713_v58 = vsel %vm467_vm2, %v13566_v56, -inf }
 0x211   : > { %v615_v59 = vpop.f32.mrf.mxu1  ;;  %1714 = vmax.xlane.f32.xlu0 %v1713_v58 }
 0x212   : > { %v13570_v60 = vmul.f32 0.35355338, %v615_v59 }
 0x213   : > { %v12307_v61 = vpop.f32.mrf.mxu1 }
 0x214   : > { %v1716_v62 = vsel %vm467_vm2, %v13570_v60, -inf }
 0x215   : > { %v692_v63 = vpop.f32.mrf.mxu1  ;;  %1717 = vmax.xlane.f32.xlu1 %v1716_v62 }
 0x216   : > { %v13574_v0 = vmul.f32 0.35355338, %v692_v63 }
 0x217   : > { %v12312_v1 = vpop.f32.mrf.mxu1 }
 0x218   : > { %v1719_v2 = vsel %vm467_vm2, %v13574_v0, -inf }
 0x219   : > { %v769_v3 = vpop.f32.mrf.mxu1  ;;  %1720 = vmax.xlane.f32.xlu0 %v1719_v2 }
 0x21a   : > { %v13578_v4 = vmul.f32 0.35355338, %v769_v3  ;;  %v13620_v3 = vpop.permute.xlu0 %2041 }
 0x21b   : > { %v12317_v5 = vpop.f32.mrf.mxu1 }
 0x21c   : > { %v1722_v6 = vsel %vm467_vm2, %v13578_v4, -inf }
 0x21d   : > { %v846_v7 = vpop.f32.mrf.mxu1  ;;  %1723 = vmax.xlane.f32.xlu0 %v1722_v6 }
 0x21e   : > { %v13582_v8 = vmul.f32 0.35355338, %v846_v7 }
 0x21f   : > { %v12322_v9 = vpop.f32.mrf.mxu1 }
 0x220   : > { %v1725_v10 = vsel %vm467_vm2, %v13582_v8, -inf }
 0x221   : > { %v923_v11 = vpop.f32.mrf.mxu1  ;;  %1726 = vmax.xlane.f32.xlu1 %v1725_v10  ;;  %v1231_v12 = vpop.f32.mrf.mxu0 }
 0x222   : > { %v13586_v13 = vmul.f32 0.35355338, %v1231_v12  ;;  %v13594_v40 = vmul.f32 0.35355338, %v923_v11 }
 0x223   : > { %v12327_v14 = vpop.f32.mrf.mxu1  ;;  %v12347_v15 = vpop.f32.mrf.mxu0 }
 0x224   : > { %v1740_v16 = vsel %vm467_vm2, %v13586_v13, -inf  ;;  %v1728_v48 = vsel %vm467_vm2, %v13594_v40, -inf  ;;  %v13630_v14 = vpop.permute.xlu0 %2117 }
 0x225   : > { %v1000_v17 = vpop.f32.mrf.mxu1  ;;  %1741 = vmax.xlane.f32.xlu0 %v1740_v16  ;;  %v1385_v18 = vpop.f32.mrf.mxu0 }
 0x226   : > { %v13590_v19 = vmul.f32 0.35355338, %v1000_v17  ;;  %v13592_v37 = vmul.f32 0.35355338, %v1385_v18 }
 0x227   : > { %v12332_v38 = vpop.f32.mrf.mxu1  ;;  %v12357_v39 = vpop.f32.mrf.mxu0 }
 0x228   : > { %v1731_v41 = vsel %vm467_vm2, %v13590_v19, -inf  ;;  %v1746_v42 = vsel %vm467_vm2, %v13592_v37, -inf  ;;  %v13634_v16 = vpop.permute.xlu0 %2193 }
 0x229   : > { %v1077_v43 = vpop.f32.mrf.mxu1  ;;  %1732 = vmax.xlane.f32.xlu1 %v1731_v41  ;;  %1747 = vmax.xlane.f32.xlu0 %v1746_v42  ;;  %v1539_v44 = vpop.f32.mrf.mxu0 }
 0x22a   : > { %v13600_v47 = vmul.f32 0.35355338, %v1539_v44  ;;  %v13614_v62 = vmul.f32 0.35355338, %v1077_v43  ;;  %v13654_v44 = vpop.permute.xlu1 %2573 }
 0x22b   : > { %v12337_v45 = vpop.f32.mrf.mxu1  ;;  %v12367_v46 = vpop.f32.mrf.mxu0 }
 0x22c   : > { %v1752_v57 = vsel %vm467_vm2, %v13600_v47, -inf  ;;  %v1734_v9 = vsel %vm467_vm2, %v13614_v62, -inf  ;;  %v13636_v17 = vpop.permute.xlu0 %2269 }
 0x22d   : > { %v1154_v49 = vpop.f32.mrf.mxu1  ;;  %1729 = vmax.xlane.f32.xlu0 %v1728_v48  ;;  %v1693_v50 = vpop.f32.mrf.mxu0 }
 0x22e   : > { %v13604_v51 = vmul.f32 0.35355338, %v1154_v49  ;;  %v13606_v54 = vmul.f32 0.35355338, %v1693_v50  ;;  %v13658_v46 = vpop.permute.xlu1 %3107 }
 0x22f   : > { %v12342_v52 = vpop.f32.mrf.mxu1  ;;  %v12377_v53 = vpop.f32.mrf.mxu0  ;;  %15703 = vst [vmem:[#allocation12_spill] sm:$0xff] %v13658_v46 }
 0x230   : > { %v1737_v55 = vsel %vm467_vm2, %v13604_v51, -inf  ;;  %v1758_v1 = vsel %vm467_vm2, %v13606_v54, -inf  ;;  %v13638_v18 = vpop.permute.xlu0 %2345 }
 0x231   : > { %v1308_v58 = vpop.f32.mrf.mxu1  ;;  %1738 = vmax.xlane.f32.xlu1 %v1737_v55  ;;  %1753 = vmax.xlane.f32.xlu0 %v1752_v57 }
 0x232   : > { %v13612_v59 = vmul.f32 0.35355338, %v1308_v58  ;;  %v13662_v49 = vpop.permute.xlu1 %3105 }
 0x233   : > { %v12352_v61 = vpop.f32.mrf.mxu1  ;;  %15704 = vst [vmem:[#allocation13_spill] sm:$0xff] %v13662_v49 }
 0x234   : > { %v1743_v63 = vsel %vm467_vm2, %v13612_v59, -inf  ;;  %v13644_v38 = vpop.permute.xlu0 %2421 }
 0x235   : > { %v1462_v2 = vpop.f32.mrf.mxu1  ;;  %1744 = vmax.xlane.f32.xlu1 %v1743_v63  ;;  %1759 = vmax.xlane.f32.xlu0 %v1758_v1 }
 0x236   : > { %v13622_v5 = vmul.f32 0.35355338, %v1462_v2  ;;  %v13666_v52 = vpop.permute.xlu1 %3263 }
 0x237   : > { %v12362_v6 = vpop.f32.mrf.mxu1  ;;  %15705 = vst [vmem:[#allocation14_spill] sm:$0xff] %v13666_v52 }
 0x238   : > { %v1749_v7 = vsel %vm467_vm2, %v13622_v5, -inf  ;;  %v13646_v39 = vpop.permute.xlu0 %2497 }
 0x239   : > { %1750 = vmax.xlane.f32.xlu1 %v1749_v7  ;;  %v1616_v10 = vpop.f32.mrf.mxu1  ;;  %1735 = vmax.xlane.f32.xlu0 %v1734_v9 }
 0x23a   : > { %v13628_v11 = vmul.f32 0.35355338, %v1616_v10  ;;  %v13670_v55 = vpop.permute.xlu1 %3261 }
 0x23b   : > { %v12372_v12 = vpop.f32.mrf.mxu1  ;;  %15706 = vst [vmem:[#allocation15_spill] sm:$0xff] %v13670_v55 }
 0x23c   : > { %v1755_v15 = vsel %vm467_vm2, %v13628_v11, -inf  ;;  %v13648_v41 = vpop.permute.xlu0 %2649 }
 0x23d   : > { %1756 = vmax.xlane.f32.xlu1 %v1755_v15 }
 0x23e   : > { %v13674_v58 = vpop.permute.xlu1 %3419 }
 0x23f   : > { %15707 = vst [vmem:[#allocation16_spill] sm:$0xff] %v13674_v58 }
 0x240   : > { %v13650_v42 = vpop.permute.xlu0 %2725 }
 0x242   : > { %v13678_v63 = vpop.permute.xlu1 %3417 }
 0x243   : > { %15708 = vst [vmem:[#allocation17_spill] sm:$0xff] %v13678_v63 }
 0x244   : > { %v13652_v43 = vpop.permute.xlu0 %2801 }
 0x246   : > { %v13682_v2 = vpop.permute.xlu1 %2953 }
 0x247   : > { %15709 = vst [vmem:[#allocation18_spill] sm:$0xff] %v13682_v2 }
 0x248   : > { %v13656_v45 = vpop.permute.xlu0 %2877 }
 0x24c   : > { %v13660_v48 = vpop.permute.xlu0 %3029 }
 0x24e   : > { %3575 = vrot.lane.b32.xlu1 %v13401_v28, %s13273_s10 }
 0x24f   : > { %3495 = vrot.lane.b32.xlu0 %v13393_v25, %s13274_s11 }
 0x250   : > { %v13664_v50 = vpop.permute.xlu0 %3185 }
 0x254   : > { %v13668_v53 = vpop.permute.xlu0 %3183 }
 0x258   : > { %v13672_v57 = vpop.permute.xlu0 %3341 }
 0x25c   : > { %v13676_v61 = vpop.permute.xlu0 %3339 }
 0x260   : > { %v13680_v1 = vpop.permute.xlu0 %3497 }
 0x29a   : > { %v1715_v6 = vpop.xlane.xlu0 %1714 }
 0x29b   : > { %v1761_v7 = vsub.f32 %v13566_v56, %v1715_v6 }
 0x29d   : > { %v1777_v9 = vmul.f32 1.442695, %v1761_v7 }
 0x29e   : > { %v1718_v10 = vpop.xlane.xlu1 %1717 }
 0x29f   : > { %13005 = vpow2.f32 %v1777_v9  ;;  %v1762_v12 = vsub.f32 %v13570_v60, %v1718_v10 }
 0x2a1   : > { %v1779_v15 = vmul.f32 1.442695, %v1762_v12 }
 0x2a2   : > { %v1721_v20 = vpop.xlane.xlu0 %1720 }
 0x2a3   : > { %13007 = vpow2.f32 %v1779_v15  ;;  %v1763_v58 = vsub.f32 %v13574_v0, %v1721_v20 }
 0x2a5   : > { %v1781_v55 = vmul.f32 1.442695, %v1763_v58 }
 0x2a6   : > { %v1724_v52 = vpop.xlane.xlu0 %1723 }
 0x2a7   : > { %13009 = vpow2.f32 %v1781_v55  ;;  %v1764_v63 = vsub.f32 %v13578_v4, %v1724_v52 }
 0x2a9   : > { %v1783_v49 = vmul.f32 1.442695, %v1764_v63 }
 0x2aa   : > { %v1727_v46 = vpop.xlane.xlu1 %1726 }
 0x2ab   : > { %13011 = vpow2.f32 %v1783_v49  ;;  %v1765_v56 = vsub.f32 %v13582_v8, %v1727_v46 }
 0x2ac   : > { %v13689_v6 = vpop.eup %13005 }
 0x2ad   : > { %v1785_v7 = vmul.f32 1.442695, %v1765_v56  ;;  %v1809_v60 = vsel %vm467_vm2, %v13689_v6, 0.0 }
 0x2ae   : > { %1810 = vadd.xlane.f32.xlu1 %v1809_v60  ;;  %v1742_v9 = vpop.xlane.xlu0 %1741 }
 0x2af   : > { %13013 = vpow2.f32 %v1785_v7  ;;  %v1770_v20 = vsub.f32 %v13586_v13, %v1742_v9 }
 0x2b0   : > { %v13694_v0 = vpop.eup %13007 }
 0x2b1   : > { %v1795_v55 = vmul.f32 1.442695, %v1770_v20  ;;  %v1812_v4 = vsel %vm467_vm2, %v13694_v0, 0.0 }
 0x2b2   : > { %v1733_v49 = vpop.xlane.xlu1 %1732  ;;  %v1748_v52 = vpop.xlane.xlu0 %1747  ;;  %1813 = vadd.xlane.f32.xlu0 %v1812_v4 }
 0x2b3   : > { %13015 = vpow2.f32 %v1795_v55  ;;  %v1767_v8 = vsub.f32 %v13590_v19, %v1733_v49  ;;  %v1772_v46 = vsub.f32 %v13592_v37, %v1748_v52 }
 0x2b4   : > { %v13700_v58 = vpop.eup %13009 }
 0x2b5   : > { %v1789_v63 = vmul.f32 1.442695, %v1767_v8  ;;  %v1799_v10 = vmul.f32 1.442695, %v1772_v46  ;;  %v1815_v13 = vsel %vm467_vm2, %v13700_v58, 0.0 }
 0x2b6   : > { %1816 = vadd.xlane.f32.xlu1 %v1815_v13  ;;  %v1730_v12 = vpop.xlane.xlu0 %1729 }
 0x2b7   : > { %13017 = vpow2.f32 %v1789_v63  ;;  %v1766_v15 = vsub.f32 %v13594_v40, %v1730_v12 }
 0x2b8   : > { %v13705_v56 = vpop.eup %13011  ;;  %13019 = vpow2.f32 %v1799_v10 }
 0x2b9   : > { %v1787_v7 = vmul.f32 1.442695, %v1766_v15  ;;  %v1818_v19 = vsel %vm467_vm2, %v13705_v56, 0.0 }
 0x2ba   : > { %v1754_v37 = vpop.xlane.xlu0 %1753  ;;  %1819 = vadd.xlane.f32.xlu0 %v1818_v19 }
 0x2bb   : > { %13021 = vpow2.f32 %v1787_v7  ;;  %v1774_v60 = vsub.f32 %v13600_v47, %v1754_v37 }
 0x2bc   : > { %v13710_v9 = vpop.eup %13013 }
 0x2bd   : > { %v1803_v20 = vmul.f32 1.442695, %v1774_v60  ;;  %v1821_v55 = vsel %vm467_vm2, %v13710_v9, 0.0 }
 0x2be   : > { %1822 = vadd.xlane.f32.xlu1 %v1821_v55  ;;  %v1760_v40 = vpop.xlane.xlu0 %1759 }
 0x2bf   : > { %v1776_v4 = vsub.f32 %v13606_v54, %v1760_v40  ;;  %13023 = vpow2.f32 %v1803_v20  ;;  %v1739_v40 = vpop.xlane.xlu1 %1738 }
 0x2c0   : > { %v13715_v49 = vpop.eup %13015 }
 0x2c1   : > { %v1807_v52 = vmul.f32 1.442695, %v1776_v4  ;;  %v1836_v8 = vsel %vm467_vm2, %v13715_v49, 0.0 }
 0x2c2   : > { %1837 = vadd.xlane.f32.xlu0 %v1836_v8  ;;  %v1736_v46 = vpop.xlane.xlu0 %1735  ;;  %v1769_v8 = vsub.f32 %v13604_v51, %v1739_v40 }
 0x2c3   : > { %v1768_v47 = vsub.f32 %v13614_v62, %v1736_v46  ;;  %13025 = vpow2.f32 %v1807_v52  ;;  %v1745_v4 = vpop.xlane.xlu1 %1744 }
 0x2c4   : > { %v13720_v63 = vpop.eup %13017 }
 0x2c5   : > { %v13722_v10 = vpop.eup %13019  ;;  %v1791_v13 = vmul.f32 1.442695, %v1768_v47  ;;  %v1827_v54 = vsel %vm467_vm2, %v13720_v63, 0.0  ;;  %v1771_v47 = vsub.f32 %v13612_v59, %v1745_v4 }
 0x2c6   : > { %1828 = vadd.xlane.f32.xlu1 %v1827_v54  ;;  %v1842_v12 = vsel %vm467_vm2, %v13722_v10, 0.0 }
 0x2c7   : > { %1843 = vadd.xlane.f32.xlu0 %v1842_v12  ;;  %13027 = vpow2.f32 %v1791_v13  ;;  %v1751_v52 = vpop.xlane.xlu1 %1750  ;;  %v1793_v13 = vmul.f32 1.442695, %v1769_v8  ;;  %v1797_v12 = vmul.f32 1.442695, %v1771_v47  ;;  %v13794_v8 = vpop.permute.xlu0 %3495 }
 0x2c8   : > { %v13728_v15 = vpop.eup %13021 }
 0x2c9   : > { %v1824_v62 = vsel %vm467_vm2, %v13728_v15, 0.0  ;;  %13029 = vpow2.f32 %v1793_v13 }
 0x2ca   : > { %13031 = vpow2.f32 %v1797_v12 }
 0x2cb   : > { %1825 = vadd.xlane.f32.xlu0 %v1824_v62  ;;  %v1757_v46 = vpop.xlane.xlu1 %1756  ;;  %v1773_v62 = vsub.f32 %v13622_v5, %v1751_v52 }
 0x2cc   : > { %v13732_v7 = vpop.eup %13023  ;;  %v1775_v54 = vsub.f32 %v13628_v11, %v1757_v46 }
 0x2cd   : > { %v1848_v19 = vsel %vm467_vm2, %v13732_v7, 0.0 }
 0x2cf   : > { %1849 = vadd.xlane.f32.xlu0 %v1848_v19  ;;  %v1805_v19 = vmul.f32 1.442695, %v1775_v54  ;;  %v13788_v52 = vpop.permute.xlu1 %3575 }
 0x2d0   : > { %v13736_v37 = vpop.eup %13025 }
 0x2d1   : > { %v1854_v60 = vsel %vm467_vm2, %v13736_v37, 0.0  ;;  %13033 = vpow2.f32 %v1805_v19 }
 0x2d2   : > { %1855 = vadd.xlane.f32.xlu1 %v1854_v60  ;;  %v1801_v60 = vmul.f32 1.442695, %v1773_v62 }
 0x2d4   : > { %v13740_v20 = vpop.eup %13027  ;;  %13035 = vpow2.f32 %v1801_v60 }
 0x2d5   : > { %v1830_v55 = vsel %vm467_vm2, %v13740_v20, 0.0 }
 0x2d6   : > { %1831 = vadd.xlane.f32.xlu0 %v1830_v55  ;;  %v13752_v55 = vpop.eup %13029 }
 0x2d7   : > { %v13754_v2 = vpop.eup %13031  ;;  %v1833_v51 = vsel %vm467_vm2, %v13752_v55, 0.0 }
 0x2d8   : > { %v1839_v11 = vsel %vm467_vm2, %v13754_v2, 0.0 }
 0x2de   : > { %v13758_v59 = vpop.eup %13033 }
 0x2df   : > { %v1851_v5 = vsel %vm467_vm2, %v13758_v59, 0.0 }
 0x2e1   : > { %v13764_v40 = vpop.eup %13035 }
 0x2e2   : > { %v1845_v4 = vsel %vm467_vm2, %v13764_v40, 0.0 }
 0x2e3   : > { %3573 = vrot.lane.b32.xlu1 %v13401_v28, %s13274_s11 }
 0x2ec   : > { %3653 = vrot.lane.b32.xlu0 %v13399_v27, %s13273_s10 }
 0x307   : > { %1834 = vadd.xlane.f32.xlu1 %v1833_v51 }
 0x30b   : > { %1840 = vadd.xlane.f32.xlu1 %v1839_v11  ;;  %1852 = vadd.xlane.f32.xlu0 %v1851_v5  ;;  %v15710_v11 = vmov 0.0  }
 0x30f   : > { %1846 = vadd.xlane.f32.xlu1 %v1845_v4 }
 0x320   : > { %3731 = vrot.lane.b32.xlu1 %v13407_v30, %s13273_s10 }
 0x321   : > { %3651 = vrot.lane.b32.xlu0 %v13399_v27, %s13274_s11 }
 0x324   : > { %3729 = vrot.lane.b32.xlu1 %v13407_v30, %s13274_s11 }
 0x325   : > { %3809 = vrot.lane.b32.xlu0 %v13405_v29, %s13273_s10 }
 0x328   : > { %3887 = vrot.lane.b32.xlu1 %v13413_v32, %s13273_s10 }
 0x329   : > { %3807 = vrot.lane.b32.xlu0 %v13405_v29, %s13274_s11 }
 0x32c   : > { %3885 = vrot.lane.b32.xlu1 %v13413_v32, %s13274_s11 }
 0x32d   : > { %3965 = vrot.lane.b32.xlu0 %v13411_v31, %s13273_s10 }
 0x330   : > { %4043 = vrot.lane.b32.xlu1 %v13419_v34, %s13273_s10 }
 0x331   : > { %3963 = vrot.lane.b32.xlu0 %v13411_v31, %s13274_s11 }
 0x334   : > { %4041 = vrot.lane.b32.xlu1 %v13419_v34, %s13274_s11 }
 0x335   : > { %4121 = vrot.lane.b32.xlu0 %v13417_v33, %s13273_s10 }
 0x337   : > { %v1811_v46 = vpop.xlane.xlu1 %1810 }
 0x338   : > { %13037 = vrcp.f32 %v1811_v46  ;;  %4199 = vrot.lane.b32.xlu1 %v13425_v36, %s13273_s10 }
 0x339   : > { %4119 = vrot.lane.b32.xlu0 %v13417_v33, %s13274_s11 }
 0x33b   : > { %v1814_v47 = vpop.xlane.xlu0 %1813 }
 0x33c   : > { %13039 = vrcp.f32 %v1814_v47  ;;  %4197 = vrot.lane.b32.xlu1 %v13425_v36, %s13274_s11 }
 0x33d   : > { %4277 = vrot.lane.b32.xlu0 %v13423_v35, %s13273_s10  ;;  %s15492_s10 = scalar_lea.vmem %s15676_s1, %s11740_s7 }
 0x33f   : > { %v1817_v13 = vpop.xlane.xlu1 %1816 }
 0x340   : > { %13041 = vrcp.f32 %v1817_v13  ;;  %4621 = vrot.lane.b32.xlu1 %v13382_v21, %s13275_s12 }
 0x341   : > { %4275 = vrot.lane.b32.xlu0 %v13423_v35, %s13274_s11 }
 0x343   : > { %v1820_v54 = vpop.xlane.xlu0 %1819 }
 0x344   : > { %13043 = vrcp.f32 %v1820_v54  ;;  %4697 = vrot.lane.b32.xlu1 %v13389_v24, %s13275_s12 }
 0x345   : > { %v13038_v12 = vpop.eup %13037  ;;  %4545 = vrot.lane.b32.xlu0 %v13384_v22, %s13275_s12 }
 0x346   : > { %v1873_v62 = vmul.f32 %v13038_v12, %v13689_v6 }
 0x347   : > { %v1823_v19 = vpop.xlane.xlu1 %1822 }
 0x348   : > { %13045 = vrcp.f32 %v1823_v19  ;;  %12381 = vmatmul.mubr.msk.f32.vlgmr.msra.gmra.mxu1 %vm467_vm2, %v1873_v62  ;;  %4773 = vrot.lane.b32.xlu1 %v13387_v23, %s13275_s12 }
 0x349   : > { %v13040_v60 = vpop.eup %13039  ;;  %12389 = vmatpush3.msra.mxu1 %v13620_v3  ;;  %5305 = vrot.lane.b32.xlu0 %v13413_v32, %s13275_s12 }
 0x34a   : > { %v1874_v51 = vmul.f32 %v13040_v60, %v13694_v0  ;;  %12390 = vmatprep.mubr.msk.f32.mxu1 %vm13270_vm1, %v15710_v11  ;;  %12398 = vmatprep.subr.mxu1 %v15710_v11 }
 0x34b   : > { %v1838_v5 = vpop.xlane.xlu0 %1837 }
 0x34c   : > { %12386 = vmatmul.mubr.msk.f32.vlgmr.msra.gmra.mxu0 %vm467_vm2, %v1874_v51  ;;  %4849 = vrot.lane.b32.xlu1 %v13395_v26, %s13275_s12 }
 0x34d   : > { %v13042_v6 = vpop.eup %13041  ;;  %12394 = vmatpush3.msra.mxu0 %v13630_v14  ;;  %5763 = vrot.lane.b32.xlu0 %v13384_v22, %s13276_s13 }
 0x34e   : > { %v1875_v3 = vmul.f32 %v13042_v6, %v13700_v58  ;;  %12395 = vmatprep.mubr.msk.f32.mxu0 %vm13270_vm1, %v15710_v11  ;;  %12403 = vmatprep.subr.mxu0 %v15710_v11 }
 0x34f   : > { %v1829_v0 = vpop.xlane.xlu1 %1828 }
 0x350   : > { %13047 = vrcp.f32 %v1829_v0  ;;  %v1844_v4 = vpop.xlane.xlu0 %1843  ;;  %12391 = vmatmul.mubr.msk.f32.vlgmr.msra.gmra.mxu1 %vm467_vm2, %v1875_v3  ;;  %4925 = vrot.lane.b32.xlu1 %v13393_v25, %s13275_s12 }
 0x351   : > { %v13044_v46 = vpop.eup %13043  ;;  %12399 = vmatpush3.msra.mxu1 %v13634_v16  ;;  %5761 = vrot.lane.b32.xlu0 %v13384_v22, %s13277_s14 }
 0x352   : > { %v1876_v14 = vmul.f32 %v13044_v46, %v13705_v56  ;;  %12400 = vmatprep.mubr.msk.f32.mxu1 %vm13270_vm1, %v15710_v11  ;;  %12408 = vmatprep.subr.mxu1 %v15710_v11 }
 0x354   : > { %v1826_v58 = vpop.xlane.xlu0 %1825  ;;  %12396 = vmatmul.mubr.msk.f32.vlgmr.msra.gmra.mxu0 %vm467_vm2, %v1876_v14  ;;  %5001 = vrot.lane.b32.xlu1 %v13401_v28, %s13275_s12  ;;  %v15711_v14 = vld [vmem:[#allocation18_spill] sm:$0xff] }
 0x355   : > { %v13046_v47 = vpop.eup %13045  ;;  %13049 = vrcp.f32 %v1826_v58  ;;  %12404 = vmatpush3.msra.mxu0 %v13636_v17  ;;  %5919 = vrot.lane.b32.xlu0 %v13389_v24, %s13276_s13 }
 0x356   : > { %v1877_v16 = vmul.f32 %v13046_v47, %v13710_v9  ;;  %12405 = vmatprep.mubr.msk.f32.mxu0 %vm13270_vm1, %v15710_v11  ;;  %12413 = vmatprep.subr.mxu0 %v15710_v11  ;;  %v15712_v47 = vld [vmem:[#allocation12_spill] sm:$0xff] }
 0x358   : > { %12401 = vmatmul.mubr.msk.f32.vlgmr.msra.gmra.mxu1 %vm467_vm2, %v1877_v16  ;;  %5077 = vrot.lane.b32.xlu1 %v13399_v27, %s13275_s12  ;;  %v1850_v17 = vpop.xlane.xlu0 %1849 }
 0x359   : > { %12409 = vmatpush3.msra.mxu1 %v13638_v18  ;;  %5917 = vrot.lane.b32.xlu0 %v13389_v24, %s13277_s14 }
 0x35a   : > { %12410 = vmatprep.mubr.msk.f32.mxu1 %vm13270_vm1, %v15710_v11  ;;  %12418 = vmatprep.subr.mxu1 %v15710_v11 }
 0x35c   : > { %5153 = vrot.lane.b32.xlu1 %v13407_v30, %s13275_s12 }
 0x35d   : > { %v13048_v56 = vpop.eup %13047  ;;  %6075 = vrot.lane.b32.xlu0 %v13395_v26, %s13276_s13 }
 0x35e   : > { %v1879_v18 = vmul.f32 %v13048_v56, %v13720_v63  ;;  %v15714_v56 = vld [vmem:[#allocation14_spill] sm:$0xff] }
 0x35f   : > { %v1832_v9 = vpop.xlane.xlu0 %1831 }
 0x360   : > { %12411 = vmatmul.mubr.msk.f32.vlgmr.msra.gmra.mxu1 %vm467_vm2, %v1879_v18  ;;  %13051 = vrcp.f32 %v1832_v9  ;;  %5229 = vrot.lane.b32.xlu1 %v13405_v29, %s13275_s12 }
 0x361   : > { %12419 = vmatpush3.msra.mxu1 %v13646_v39  ;;  %6073 = vrot.lane.b32.xlu0 %v13395_v26, %s13277_s14  ;;  %13053 = vrcp.f32 %v1838_v5  ;;  %v1856_v39 = vpop.xlane.xlu1 %1855 }
 0x362   : > { %v13050_v13 = vpop.eup %13049  ;;  %12420 = vmatprep.mubr.msk.f32.mxu1 %vm13270_vm1, %v15710_v11  ;;  %12428 = vmatprep.subr.mxu1 %v15710_v11  ;;  %13055 = vrcp.f32 %v1844_v4 }
 0x363   : > { %v1878_v54 = vmul.f32 %v13050_v13, %v13728_v15  ;;  %13057 = vrcp.f32 %v1850_v17  ;;  %v15713_v17 = vld [vmem:[#allocation13_spill] sm:$0xff]  ;;  %v15715_v13 = vld [vmem:[#allocation15_spill] sm:$0xff] }
 0x364   : > { %5381 = vrot.lane.b32.xlu1 %v13411_v31, %s13275_s12  ;;  %13059 = vrcp.f32 %v1856_v39 }
 0x365   : > { %12406 = vmatmul.mubr.msk.f32.vlgmr.msra.gmra.mxu0 %vm467_vm2, %v1878_v54  ;;  %v15716_v54 = vld [vmem:[#allocation16_spill] sm:$0xff] }
 0x366   : > { %12414 = vmatpush3.msra.mxu0 %v13644_v38  ;;  %12415 = vmatprep.mubr.msk.f32.mxu0 %vm13270_vm1, %v15710_v11 }
 0x367   : > { %12423 = vmatprep.subr.mxu0 %v15710_v11 }
 0x368   : > { %5457 = vrot.lane.b32.xlu1 %v13419_v34, %s13275_s12 }
 0x36c   : > { %5533 = vrot.lane.b32.xlu1 %v13417_v33, %s13275_s12 }
 0x36d   : > { %v13052_v63 = vpop.eup %13051 }
 0x36e   : > { %v1880_v15 = vmul.f32 %v13052_v63, %v13740_v20  ;;  %v13054_v12 = vpop.eup %13053 }
 0x36f   : > { %v1882_v38 = vmul.f32 %v13054_v12, %v13715_v49  ;;  %v13056_v62 = vpop.eup %13055 }
 0x370   : > { %5609 = vrot.lane.b32.xlu1 %v13425_v36, %s13275_s12  ;;  %12416 = vmatmul.mubr.msk.f32.vlgmr.msra.gmra.mxu0 %vm467_vm2, %v1880_v15  ;;  %v13058_v20 = vpop.eup %13057  ;;  %v15717_v15 = vld [vmem:[#allocation17_spill] sm:$0xff] }
 0x371   : > { %12424 = vmatpush3.msra.mxu0 %v13654_v44  ;;  %12425 = vmatprep.mubr.msk.f32.mxu0 %vm13270_vm1, %v15710_v11  ;;  %v1884_v44 = vmul.f32 %v13056_v62, %v13722_v10  ;;  %v13060_v49 = vpop.eup %13059 }
 0x372   : > { %12433 = vmatprep.subr.mxu0 %v15710_v11 }
 0x374   : > { %5685 = vrot.lane.b32.xlu1 %v13423_v35, %s13275_s12  ;;  %12426 = vmatmul.mubr.msk.f32.vlgmr.msra.gmra.mxu0 %vm467_vm2, %v1882_v38 }
 0x375   : > { %12434 = vmatpush3.msra.mxu0 %v13650_v42  ;;  %12435 = vmatprep.mubr.msk.f32.mxu0 %vm13270_vm1, %v15710_v11  ;;  %v1886_v42 = vmul.f32 %v13058_v20, %v13732_v7 }
 0x376   : > { %12443 = vmatprep.subr.mxu0 %v15710_v11 }
 0x378   : > { %5841 = vrot.lane.b32.xlu1 %v13382_v21, %s13276_s13  ;;  %12436 = vmatmul.mubr.msk.f32.vlgmr.msra.gmra.mxu0 %vm467_vm2, %v1884_v44 }
 0x379   : > { %12444 = vmatpush3.msra.mxu0 %v13656_v45  ;;  %12445 = vmatprep.mubr.msk.f32.mxu0 %vm13270_vm1, %v15710_v11  ;;  %v1888_v45 = vmul.f32 %v13060_v49, %v13736_v37 }
 0x37a   : > { %12453 = vmatprep.subr.mxu0 %v15710_v11 }
 0x37c   : > { %5839 = vrot.lane.b32.xlu1 %v13382_v21, %s13277_s14  ;;  %12446 = vmatmul.mubr.msk.f32.vlgmr.msra.gmra.mxu0 %vm467_vm2, %v1886_v42 }
 0x37d   : > { %12454 = vmatpush3.msra.mxu0 %v13660_v48  ;;  %12455 = vmatprep.mubr.msk.f32.mxu0 %vm13270_vm1, %v15710_v11  ;;  %v13947_v48 = vpop.permute.xlu1 %3573 }
 0x37e   : > { %12463 = vmatprep.subr.mxu0 %v15710_v11 }
 0x380   : > { %5997 = vrot.lane.b32.xlu1 %v13387_v23, %s13276_s13  ;;  %12456 = vmatmul.mubr.msk.f32.vlgmr.msra.gmra.mxu0 %vm467_vm2, %v1888_v45 }
 0x381   : > { %12464 = vmatpush3.xpose.msk.msra.mxu0 %vm467_vm2, %v13664_v50  ;;  %12465 = vmatprep.mubr.msk.f32.mxu0 %vm13270_vm1, %v15710_v11  ;;  %v3654_v50 = vpop.permute.xlu0 %3653 }
 0x382   : > { %12473 = vmatprep.subr.mxu0 %v15710_v11 }
 0x384   : > { %5995 = vrot.lane.b32.xlu1 %v13387_v23, %s13277_s14  ;;  %12466 = vmatmul.mubr.msk.f32.vlgmr.msra.gmra.mxu0 %vm467_vm2, %v13668_v53 }
 0x385   : > { %12474 = vmatpush3.xpose.msk.msra.mxu0 %vm467_vm2, %v13672_v57  ;;  %12475 = vmatprep.mubr.msk.f32.mxu0 %vm13270_vm1, %v15710_v11 }
 0x386   : > { %12483 = vmatprep.subr.mxu0 %v15710_v11 }
 0x388   : > { %6153 = vrot.lane.b32.xlu1 %v13393_v25, %s13276_s13  ;;  %12476 = vmatmul.mubr.msk.f32.vlgmr.msra.gmra.mxu0 %vm467_vm2, %v13676_v61 }
 0x389   : > { %12484 = vmatpush3.xpose.msk.msra.mxu0 %vm467_vm2, %v13680_v1  ;;  %12485 = vmatprep.mubr.msk.f32.mxu0 %vm13270_vm1, %v15710_v11 }
 0x38a   : > { %12493 = vmatprep.subr.mxu0 %v15710_v11 }
 0x38c   : > { %6151 = vrot.lane.b32.xlu1 %v13393_v25, %s13277_s14  ;;  %12486 = vmatmul.mubr.msk.f32.vlgmr.msra.gmra.mxu0 %vm467_vm2, %v13794_v8 }
 0x38d   : > { %12494 = vmatpush3.xpose.msk.msra.mxu0 %vm467_vm2, %v3654_v50  ;;  %12495 = vmatprep.mubr.msk.f32.mxu0 %vm13270_vm1, %v15710_v11 }
 0x38e   : > { %12503 = vmatprep.subr.mxu0 %v15710_v11 }
 0x390   : > { %v1835_v53 = vpop.xlane.xlu1 %1834 }
 0x391   : > { %13061 = vrcp.f32 %v1835_v53 }
 0x394   : > { %v1841_v57 = vpop.xlane.xlu1 %1840  ;;  %v1853_v61 = vpop.xlane.xlu0 %1852 }
 0x395   : > { %13063 = vrcp.f32 %v1841_v57 }
 0x398   : > { %v1847_v1 = vpop.xlane.xlu1 %1846  ;;  %v3652_v10 = vpop.permute.xlu0 %3651 }
 0x399   : > { %13065 = vrcp.f32 %v1847_v1  ;;  %12496 = vmatmul.mubr.msk.f32.vlgmr.msra.gmra.mxu0 %vm467_vm2, %v3652_v10 }
 0x39a   : > { %12505 = vmatprep.mubr.msk.f32.mxu0 %vm13270_vm1, %v15710_v11  ;;  %13067 = vrcp.f32 %v1853_v61 }
 0x39c   : > { %v13960_v7 = vpop.permute.xlu1 %3731  ;;  %v3810_v37 = vpop.permute.xlu0 %3809 }
 0x39d   : > { %12504 = vmatpush3.xpose.msk.msra.mxu0 %vm467_vm2, %v3810_v37 }
 0x39e   : > { %v13062_v8 = vpop.eup %13061  ;;  %12513 = vmatprep.subr.mxu0 %v15710_v11 }
 0x39f   : > { %v1881_v19 = vmul.f32 %v13062_v8, %v13752_v55 }
 0x3a0   : > { %v13965_v60 = vpop.permute.xlu1 %3729  ;;  %v3808_v51 = vpop.permute.xlu0 %3807 }
 0x3a1   : > { %12421 = vmatmul.mubr.msk.f32.vlgmr.msra.gmra.mxu1 %vm467_vm2, %v1881_v19  ;;  %12506 = vmatmul.mubr.msk.f32.vlgmr.msra.gmra.mxu0 %vm467_vm2, %v3808_v51 }
 0x3a2   : > { %v13064_v5 = vpop.eup %13063  ;;  %12429 = vmatpush3.msra.mxu1 %v13648_v41  ;;  %12430 = vmatprep.mubr.msk.f32.mxu1 %vm13270_vm1, %v15710_v11 }
 0x3a3   : > { %12438 = vmatprep.subr.mxu1 %v15710_v11  ;;  %v1883_v6 = vmul.f32 %v13064_v5, %v13754_v2  ;;  %12515 = vmatprep.mubr.msk.f32.mxu0 %vm13270_vm1, %v15710_v11 }
 0x3a4   : > { %v3888_v55 = vpop.permute.xlu1 %3887  ;;  %v3966_v3 = vpop.permute.xlu0 %3965 }
 0x3a5   : > { %12431 = vmatmul.mubr.msk.f32.vlgmr.msra.gmra.mxu1 %vm467_vm2, %v1883_v6  ;;  %12514 = vmatpush3.xpose.msk.msra.mxu0 %vm467_vm2, %v3966_v3 }
 0x3a6   : > { %v13066_v0 = vpop.eup %13065  ;;  %12439 = vmatpush3.msra.mxu1 %v13652_v43  ;;  %12440 = vmatprep.mubr.msk.f32.mxu1 %vm13270_vm1, %v15710_v11 }
 0x3a7   : > { %12448 = vmatprep.subr.mxu1 %v15710_v11  ;;  %v1885_v41 = vmul.f32 %v13066_v0, %v13764_v40  ;;  %12523 = vmatprep.subr.mxu0 %v15710_v11  ;;  %v13068_v2 = vpop.eup %13067 }
 0x3a8   : > { %v3886_v4 = vpop.permute.xlu1 %3885  ;;  %v3964_v46 = vpop.permute.xlu0 %3963  ;;  %v1887_v43 = vmul.f32 %v13068_v2, %v13758_v59 }
 0x3a9   : > { %12441 = vmatmul.mubr.msk.f32.vlgmr.msra.gmra.mxu1 %vm467_vm2, %v1885_v41  ;;  %12516 = vmatmul.mubr.msk.f32.vlgmr.msra.gmra.mxu0 %vm467_vm2, %v3964_v46 }
 0x3aa   : > { %12449 = vmatpush3.msra.mxu1 %v15711_v14  ;;  %12450 = vmatprep.mubr.msk.f32.mxu1 %vm13270_vm1, %v15710_v11 }
 0x3ab   : > { %12458 = vmatprep.subr.mxu1 %v15710_v11  ;;  %12525 = vmatprep.mubr.msk.f32.mxu0 %vm13270_vm1, %v15710_v11 }
 0x3ac   : > { %v4044_v40 = vpop.permute.xlu1 %4043  ;;  %v4122_v58 = vpop.permute.xlu0 %4121 }
 0x3ad   : > { %12451 = vmatmul.mubr.msk.f32.vlgmr.msra.gmra.mxu1 %vm467_vm2, %v1887_v43  ;;  %12524 = vmatpush3.xpose.msk.msra.mxu0 %vm467_vm2, %v4122_v58 }
 0x3ae   : > { %12459 = vmatpush3.xpose.msk.msra.mxu1 %vm467_vm2, %v15712_v47  ;;  %12460 = vmatprep.mubr.msk.f32.mxu1 %vm13270_vm1, %v15710_v11 }
 0x3af   : > { %12468 = vmatprep.subr.mxu1 %v15710_v11  ;;  %12533 = vmatprep.subr.mxu0 %v15710_v11 }
 0x3b0   : > { %v4042_v59 = vpop.permute.xlu1 %4041  ;;  %v4120_v16 = vpop.permute.xlu0 %4119 }
 0x3b1   : > { %12461 = vmatmul.mubr.msk.f32.vlgmr.msra.gmra.mxu1 %vm467_vm2, %v15713_v17  ;;  %12526 = vmatmul.mubr.msk.f32.vlgmr.msra.gmra.mxu0 %vm467_vm2, %v4120_v16 }
 0x3b2   : > { %12469 = vmatpush3.xpose.msk.msra.mxu1 %vm467_vm2, %v15714_v56  ;;  %12470 = vmatprep.mubr.msk.f32.mxu1 %vm13270_vm1, %v15710_v11 }
 0x3b3   : > { %12478 = vmatprep.subr.mxu1 %v15710_v11  ;;  %12535 = vmatprep.mubr.msk.f32.mxu0 %vm13270_vm1, %v15710_v11 }
 0x3b4   : > { %v4200_v18 = vpop.permute.xlu1 %4199  ;;  %v4278_v9 = vpop.permute.xlu0 %4277 }
 0x3b5   : > { %12471 = vmatmul.mubr.msk.f32.vlgmr.msra.gmra.mxu1 %vm467_vm2, %v15715_v13  ;;  %12534 = vmatpush3.xpose.msk.msra.mxu0 %vm467_vm2, %v4278_v9 }
 0x3b6   : > { %12479 = vmatpush3.xpose.msk.msra.mxu1 %vm467_vm2, %v15716_v54  ;;  %12480 = vmatprep.mubr.msk.f32.mxu1 %vm13270_vm1, %v15710_v11 }
 0x3b7   : > { %12488 = vmatprep.subr.mxu1 %v15710_v11  ;;  %12543 = vmatprep.subr.mxu0 %v15710_v11 }
 0x3b8   : > { %v4198_v39 = vpop.permute.xlu1 %4197  ;;  %v4276_v63 = vpop.permute.xlu0 %4275 }
 0x3b9   : > { %12481 = vmatmul.mubr.msk.f32.vlgmr.msra.gmra.mxu1 %vm467_vm2, %v15717_v15  ;;  %12536 = vmatmul.mubr.msk.f32.vlgmr.msra.gmra.mxu0 %vm467_vm2, %v4276_v63 }
 0x3ba   : > { %12489 = vmatpush3.xpose.msk.msra.mxu1 %vm467_vm2, %v13788_v52  ;;  %12490 = vmatprep.mubr.msk.f32.mxu1 %vm13270_vm1, %v15710_v11 }
 0x3bb   : > { %12498 = vmatprep.subr.mxu1 %v15710_v11  ;;  %12545 = vmatprep.mubr.msk.f32.mxu0 %vm13270_vm1, %v15710_v11 }
 0x3bc   : > { %v4622_v12 = vpop.permute.xlu1 %4621  ;;  %v4546_v52 = vpop.permute.xlu0 %4545 }
 0x3bd   : > { %12491 = vmatmul.mubr.msk.f32.vlgmr.msra.gmra.mxu1 %vm467_vm2, %v13947_v48  ;;  %12544 = vmatpush3.msra.mxu0 %v4622_v12 }
 0x3be   : > { %12499 = vmatpush3.xpose.msk.msra.mxu1 %vm467_vm2, %v13960_v7  ;;  %12500 = vmatprep.mubr.msk.f32.mxu1 %vm13270_vm1, %v15710_v11 }
 0x3bf   : > { %12508 = vmatprep.subr.mxu1 %v15710_v11  ;;  %12553 = vmatprep.subr.mxu0 %v15710_v11 }
 0x3c1   : > { %12501 = vmatmul.mubr.msk.f32.vlgmr.msra.gmra.mxu1 %vm467_vm2, %v13965_v60 }
 0x3c2   : > { %12509 = vmatpush3.xpose.msk.msra.mxu1 %vm467_vm2, %v3888_v55  ;;  %12510 = vmatprep.mubr.msk.f32.mxu1 %vm13270_vm1, %v15710_v11 }
 0x3c3   : > { %12518 = vmatprep.subr.mxu1 %v15710_v11 }
 0x3c5   : > { %12511 = vmatmul.mubr.msk.f32.vlgmr.msra.gmra.mxu1 %vm467_vm2, %v3886_v4 }
 0x3c6   : > { %12519 = vmatpush3.xpose.msk.msra.mxu1 %vm467_vm2, %v4044_v40  ;;  %12520 = vmatprep.mubr.msk.f32.mxu1 %vm13270_vm1, %v15710_v11 }
 0x3c7   : > { %12528 = vmatprep.subr.mxu1 %v15710_v11 }
 0x3c9   : > { %12521 = vmatmul.mubr.msk.f32.vlgmr.msra.gmra.mxu1 %vm467_vm2, %v4042_v59 }
 0x3ca   : > { %12529 = vmatpush3.xpose.msk.msra.mxu1 %vm467_vm2, %v4200_v18  ;;  %12530 = vmatprep.mubr.msk.f32.mxu1 %vm13270_vm1, %v15710_v11 }
 0x3cb   : > { %12538 = vmatprep.subr.mxu1 %v15710_v11 }
 0x3cd   : > { %12531 = vmatmul.mubr.msk.f32.vlgmr.msra.gmra.mxu1 %vm467_vm2, %v4198_v39 }
 0x3ce   : > { %12539 = vmatpush3.msra.mxu1 %v4546_v52  ;;  %12540 = vmatprep.mubr.msk.f32.mxu1 %vm13270_vm1, %v15710_v11 }
 0x3cf   : > { %12548 = vmatprep.subr.mxu1 %v15710_v11 }
 0x408   : > { %v14058_v38 = vpop.f32.mrf.mxu1 }
 0x409   : > { %15718 = vst [vmem:[#allocation18_spill] sm:$0xff] %v14058_v38 }
 0x40a   : > { %v12382_v62 = vpop.f32.mrf.mxu1 }
 0x40c   : > { %v14060_v44 = vpop.f32.mrf.mxu0 }
 0x40d   : > { %15719 = vst [vmem:[#allocation12_spill] sm:$0xff] %v14060_v44 }
 0x40e   : > { %v12387_v20 = vpop.f32.mrf.mxu0 }
 0x410   : > { %v14062_v42 = vpop.f32.mrf.mxu1 }
 0x411   : > { %15720 = vst [vmem:[#allocation13_spill] sm:$0xff] %v14062_v42 }
 0x412   : > { %v12392_v49 = vpop.f32.mrf.mxu1 }
 0x414   : > { %v14064_v45 = vpop.f32.mrf.mxu0 }
 0x415   : > { %15721 = vst [vmem:[#allocation14_spill] sm:$0xff] %v14064_v45 }
 0x416   : > { %v12397_v48 = vpop.f32.mrf.mxu0 }
 0x418   : > { %v14066_v50 = vpop.f32.mrf.mxu1 }
 0x419   : > { %15722 = vst [vmem:[#allocation15_spill] sm:$0xff] %v14066_v50 }
 0x41a   : > { %v12402_v53 = vpop.f32.mrf.mxu1 }
 0x420   : > { %v14068_v57 = vpop.f32.mrf.mxu1 }
 0x421   : > { %15723 = vst [vmem:[#allocation16_spill] sm:$0xff] %v14068_v57 }
 0x422   : > { %v12412_v61 = vpop.f32.mrf.mxu1 }
 0x425   : > { %v14070_v1 = vpop.f32.mrf.mxu0 }
 0x426   : > { %15724 = vst [vmem:[#allocation17_spill] sm:$0xff] %v14070_v1 }
 0x427   : > { %v12407_v10 = vpop.f32.mrf.mxu0 }
 0x430   : > { %v14072_v7 = vpop.f32.mrf.mxu0 }
 0x431   : > { %15725 = vst [vmem:[#allocation19_spill] sm:$0xff] %v14072_v7 }
 0x432   : > { %v12417_v37 = vpop.f32.mrf.mxu0 }
 0x434   : > { %v14074_v8 = vpop.f32.mrf.mxu0 }
 0x435   : > { %15726 = vst [vmem:[#allocation20_spill] sm:$0xff] %v14074_v8 }
 0x436   : > { %v12427_v19 = vpop.f32.mrf.mxu0 }
 0x438   : > { %v14076_v60 = vpop.f32.mrf.mxu0 }
 0x439   : > { %15727 = vst [vmem:[#allocation21_spill] sm:$0xff] %v14076_v60 }
 0x43a   : > { %v12437_v51 = vpop.f32.mrf.mxu0 }
 0x43c   : > { %v14078_v5 = vpop.f32.mrf.mxu0 }
 0x43d   : > { %15728 = vst [vmem:[#allocation22_spill] sm:$0xff] %v14078_v5 }
 0x43e   : > { %v12447_v6 = vpop.f32.mrf.mxu0 }
 0x440   : > { %v14080_v55 = vpop.f32.mrf.mxu0 }
 0x441   : > { %15729 = vst [vmem:[#allocation23_spill] sm:$0xff] %v14080_v55 }
 0x442   : > { %v12457_v3 = vpop.f32.mrf.mxu0 }
 0x444   : > { %v3257_v0 = vpop.f32.mrf.mxu0 }
 0x445   : > { %v14082_v41 = vmul.f32 0.35355338, %v3257_v0 }
 0x446   : > { %v12467_v2 = vpop.f32.mrf.mxu0 }
 0x447   : > { %v4372_v4 = vsel %vm467_vm2, %v14082_v41, -inf }
 0x448   : > { %4373 = vmax.xlane.f32.xlu0 %v4372_v4  ;;  %v3413_v46 = vpop.f32.mrf.mxu0 }
 0x449   : > { %v14096_v53 = vmul.f32 0.35355338, %v3413_v46 }
 0x44a   : > { %v12477_v14 = vpop.f32.mrf.mxu0 }
 0x44b   : > { %v4378_v3 = vsel %vm467_vm2, %v14096_v53, -inf }
 0x44c   : > { %v3569_v43 = vpop.f32.mrf.mxu0 }
 0x44d   : > { %v14102_v51 = vmul.f32 0.35355338, %v3569_v43 }
 0x44e   : > { %v12487_v40 = vpop.f32.mrf.mxu0 }
 0x459   : > { %v3725_v58 = vpop.f32.mrf.mxu0 }
 0x45a   : > { %v14110_v40 = vmul.f32 0.35355338, %v3725_v58 }
 0x45b   : > { %v12497_v47 = vpop.f32.mrf.mxu0 }
 0x45c   : > { %v4384_v47 = vsel %vm467_vm2, %v14102_v51, -inf  ;;  %v4390_v58 = vsel %vm467_vm2, %v14110_v40, -inf }
 0x461   : > { %v14086_v59 = vpop.f32.mrf.mxu1  ;;  %v3881_v16 = vpop.f32.mrf.mxu0 }
 0x462   : > { %15730 = vst [vmem:[#allocation24_spill] sm:$0xff] %v14086_v59 }
 0x463   : > { %v12422_v17 = vpop.f32.mrf.mxu1  ;;  %v12507_v56 = vpop.f32.mrf.mxu0 }
 0x465   : > { %v14088_v18 = vpop.f32.mrf.mxu1 }
 0x466   : > { %15731 = vst [vmem:[#allocation25_spill] sm:$0xff] %v14088_v18 }
 0x467   : > { %v12432_v9 = vpop.f32.mrf.mxu1 }
 0x469   : > { %v14090_v13 = vpop.f32.mrf.mxu1  ;;  %v4037_v54 = vpop.f32.mrf.mxu0 }
 0x46a   : > { %15732 = vst [vmem:[#allocation26_spill] sm:$0xff] %v14090_v13 }
 0x46b   : > { %v12442_v39 = vpop.f32.mrf.mxu1  ;;  %v12517_v63 = vpop.f32.mrf.mxu0 }
 0x46c   : > { %v14118_v39 = vmul.f32 0.35355338, %v3881_v16 }
 0x46d   : > { %v14092_v15 = vpop.f32.mrf.mxu1 }
 0x46e   : > { %15733 = vst [vmem:[#allocation27_spill] sm:$0xff] %v14092_v15  ;;  %v4396_v16 = vsel %vm467_vm2, %v14118_v39, -inf }
 0x46f   : > { %v12452_v12 = vpop.f32.mrf.mxu1 }
 0x471   : > { %v3179_v52 = vpop.f32.mrf.mxu1  ;;  %v4193_v62 = vpop.f32.mrf.mxu0 }
 0x472   : > { %v14094_v20 = vmul.f32 0.35355338, %v3179_v52 }
 0x473   : > { %v12462_v49 = vpop.f32.mrf.mxu1  ;;  %v12527_v48 = vpop.f32.mrf.mxu0 }
 0x474   : > { %v4369_v61 = vsel %vm467_vm2, %v14094_v20, -inf  ;;  %v14126_v48 = vmul.f32 0.35355338, %v4037_v54 }
 0x475   : > { %4370 = vmax.xlane.f32.xlu1 %v4369_v61  ;;  %v3335_v10 = vpop.f32.mrf.mxu1 }
 0x476   : > { %v14100_v37 = vmul.f32 0.35355338, %v3335_v10  ;;  %v4402_v54 = vsel %vm467_vm2, %v14126_v48, -inf }
 0x477   : > { %v12472_v19 = vpop.f32.mrf.mxu1 }
 0x478   : > { %v4375_v6 = vsel %vm467_vm2, %v14100_v37, -inf }
 0x479   : > { %v3491_v0 = vpop.f32.mrf.mxu1  ;;  %4376 = vmax.xlane.f32.xlu0 %v4375_v6  ;;  %4379 = vmax.xlane.f32.xlu1 %v4378_v3  ;;  %v4349_v2 = vpop.f32.mrf.mxu0  ;;  %v14134_v3 = vmul.f32 0.35355338, %v4193_v62 }
 0x47a   : > { %v14108_v4 = vmul.f32 0.35355338, %v3491_v0 }
 0x47b   : > { %v12482_v46 = vpop.f32.mrf.mxu1  ;;  %v12537_v14 = vpop.f32.mrf.mxu0  ;;  %v4408_v62 = vsel %vm467_vm2, %v14134_v3, -inf }
 0x47c   : > { %v4381_v43 = vsel %vm467_vm2, %v14108_v4, -inf }
 0x47d   : > { %v3647_v17 = vpop.f32.mrf.mxu1  ;;  %4382 = vmax.xlane.f32.xlu0 %v4381_v43  ;;  %4385 = vmax.xlane.f32.xlu1 %v4384_v47  ;;  %v14142_v47 = vmul.f32 0.35355338, %v4349_v2 }
 0x47e   : > { %v14116_v56 = vmul.f32 0.35355338, %v3647_v17 }
 0x47f   : > { %v12492_v9 = vpop.f32.mrf.mxu1  ;;  %v4414_v2 = vsel %vm467_vm2, %v14142_v47, -inf }
 0x480   : > { %v4387_v63 = vsel %vm467_vm2, %v14116_v56, -inf }
 0x481   : > { %v3803_v12 = vpop.f32.mrf.mxu1  ;;  %4388 = vmax.xlane.f32.xlu0 %v4387_v63  ;;  %4391 = vmax.xlane.f32.xlu1 %v4390_v58  ;;  %v14148_v63 = vpop.permute.xlu1 %4697 }
 0x482   : > { %v14124_v52 = vmul.f32 0.35355338, %v3803_v12 }
 0x483   : > { %v12502_v49 = vpop.f32.mrf.mxu1 }
 0x484   : > { %v4393_v61 = vsel %vm467_vm2, %v14124_v52, -inf }
 0x485   : > { %v3959_v10 = vpop.f32.mrf.mxu1  ;;  %4394 = vmax.xlane.f32.xlu0 %v4393_v61  ;;  %4397 = vmax.xlane.f32.xlu1 %v4396_v16  ;;  %v14156_v61 = vpop.permute.xlu1 %4773 }
 0x486   : > { %v14132_v19 = vmul.f32 0.35355338, %v3959_v10 }
 0x487   : > { %v12512_v6 = vpop.f32.mrf.mxu1 }
 0x488   : > { %v4399_v0 = vsel %vm467_vm2, %v14132_v19, -inf }
 0x489   : > { %v4115_v46 = vpop.f32.mrf.mxu1  ;;  %4400 = vmax.xlane.f32.xlu0 %v4399_v0  ;;  %4403 = vmax.xlane.f32.xlu1 %v4402_v54  ;;  %v14158_v16 = vpop.permute.xlu1 %4849 }
 0x48a   : > { %v14140_v14 = vmul.f32 0.35355338, %v4115_v46  ;;  %v14168_v0 = vpop.permute.xlu0 %5305 }
 0x48b   : > { %v12522_v43 = vpop.f32.mrf.mxu1 }
 0x48c   : > { %v4405_v17 = vsel %vm467_vm2, %v14140_v14, -inf }
 0x48d   : > { %v4271_v9 = vpop.f32.mrf.mxu1  ;;  %4406 = vmax.xlane.f32.xlu0 %v4405_v17  ;;  %4409 = vmax.xlane.f32.xlu1 %v4408_v62  ;;  %v14160_v10 = vpop.permute.xlu1 %4925 }
 0x48e   : > { %v14150_v58 = vmul.f32 0.35355338, %v4271_v9  ;;  %v14172_v46 = vpop.permute.xlu0 %5763 }
 0x48f   : > { %v12532_v12 = vpop.f32.mrf.mxu1 }
 0x490   : > { %v4411_v49 = vsel %vm467_vm2, %v14150_v58, -inf }
 0x491   : > { %4412 = vmax.xlane.f32.xlu0 %v4411_v49  ;;  %4415 = vmax.xlane.f32.xlu1 %v4414_v2  ;;  %v14164_v6 = vpop.permute.xlu1 %5001 }
 0x492   : > { %v14176_v17 = vpop.permute.xlu0 %5761 }
 0x495   : > { %v14170_v54 = vpop.permute.xlu1 %5077 }
 0x496   : > { %v14180_v9 = vpop.permute.xlu0 %5919 }
 0x497   : > { %15734 = vst [vmem:[#allocation28_spill] sm:$0xff] %v14180_v9 }
 0x499   : > { %v14174_v43 = vpop.permute.xlu1 %5153 }
 0x49a   : > { %v14184_v49 = vpop.permute.xlu0 %5917 }
 0x49b   : > { %15735 = vst [vmem:[#allocation29_spill] sm:$0xff] %v14184_v49 }
 0x49d   : > { %v14178_v62 = vpop.permute.xlu1 %5229 }
 0x49e   : > { %v14188_v55 = vpop.permute.xlu0 %6075 }
 0x49f   : > { %15736 = vst [vmem:[#allocation30_spill] sm:$0xff] %v14188_v55 }
 0x4a1   : > { %v14182_v12 = vpop.permute.xlu1 %5381 }
 0x4a2   : > { %6309 = vrot.lane.b32.xlu1 %v13399_v27, %s13276_s13  ;;  %v14192_v50 = vpop.permute.xlu0 %6073 }
 0x4a3   : > { %15737 = vst [vmem:[#allocation31_spill] sm:$0xff] %v14192_v50 }
 0x4a5   : > { %v14186_v2 = vpop.permute.xlu1 %5457 }
 0x4a7   : > { %6231 = vrot.lane.b32.xlu0 %v13401_v28, %s13276_s13 }
 0x4a9   : > { %v14190_v1 = vpop.permute.xlu1 %5533 }
 0x4ad   : > { %v14194_v8 = vpop.permute.xlu1 %5609 }
 0x4b1   : > { %v14197_v45 = vpop.permute.xlu1 %5685 }
 0x4b5   : > { %v14199_v42 = vpop.permute.xlu1 %5841 }
 0x4b9   : > { %v14201_v44 = vpop.permute.xlu1 %5839 }
 0x4ba   : > { %15738 = vst [vmem:[#allocation32_spill] sm:$0xff] %v14201_v44 }
 0x4bd   : > { %v14207_v5 = vpop.permute.xlu1 %5997 }
 0x4be   : > { %15739 = vst [vmem:[#allocation33_spill] sm:$0xff] %v14207_v5 }
 0x4c1   : > { %v14209_v13 = vpop.permute.xlu1 %5995 }
 0x4c2   : > { %15740 = vst [vmem:[#allocation34_spill] sm:$0xff] %v14209_v13 }
 0x4c5   : > { %v14211_v60 = vpop.permute.xlu1 %6153 }
 0x4c6   : > { %15741 = vst [vmem:[#allocation35_spill] sm:$0xff] %v14211_v60 }
 0x4d1   : > { %v4374_v15 = vpop.xlane.xlu0 %4373 }
 0x4d2   : > { %v4418_v7 = vsub.f32 %v14082_v41, %v4374_v15 }
 0x4d4   : > { %v4435_v38 = vmul.f32 1.442695, %v4418_v7  ;;  %v14213_v7 = vpop.permute.xlu1 %6151 }
 0x4d5   : > { %15742 = vst [vmem:[#allocation36_spill] sm:$0xff] %v14213_v7 }
 0x4d6   : > { %13069 = vpow2.f32 %v4435_v38 }
 0x4e3   : > { %v14203_v59 = vpop.eup %13069 }
 0x4e4   : > { %v4468_v57 = vsel %vm467_vm2, %v14203_v59, 0.0 }
 0x4e5   : > { %4469 = vadd.xlane.f32.xlu1 %v4468_v57 }
 0x4fe   : > { %v4371_v41 = vpop.xlane.xlu1 %4370 }
 0x4ff   : > { %v4417_v38 = vsub.f32 %v14094_v20, %v4371_v41 }
 0x501   : > { %v4433_v15 = vmul.f32 1.442695, %v4417_v38 }
 0x502   : > { %v4377_v18 = vpop.xlane.xlu0 %4376  ;;  %v4380_v50 = vpop.xlane.xlu1 %4379 }
 0x503   : > { %13071 = vpow2.f32 %v4433_v15  ;;  %v4419_v55 = vsub.f32 %v14100_v37, %v4377_v18  ;;  %v4420_v49 = vsub.f32 %v14096_v53, %v4380_v50 }
 0x505   : > { %v4437_v57 = vmul.f32 1.442695, %v4419_v55  ;;  %v4439_v9 = vmul.f32 1.442695, %v4420_v49 }
 0x506   : > { %v4383_v5 = vpop.xlane.xlu0 %4382  ;;  %v4386_v44 = vpop.xlane.xlu1 %4385 }
 0x507   : > { %13073 = vpow2.f32 %v4437_v57  ;;  %v4421_v60 = vsub.f32 %v14108_v4, %v4383_v5  ;;  %v4422_v7 = vsub.f32 %v14102_v51, %v4386_v44 }
 0x508   : > { %13075 = vpow2.f32 %v4439_v9 }
 0x509   : > { %v4441_v13 = vmul.f32 1.442695, %v4421_v60  ;;  %v4443_v20 = vmul.f32 1.442695, %v4422_v7 }
 0x50a   : > { %v4389_v41 = vpop.xlane.xlu0 %4388  ;;  %v4392_v38 = vpop.xlane.xlu1 %4391 }
 0x50b   : > { %13077 = vpow2.f32 %v4441_v13  ;;  %v4423_v15 = vsub.f32 %v14116_v56, %v4389_v41  ;;  %v4424_v18 = vsub.f32 %v14110_v40, %v4392_v38 }
 0x50c   : > { %13079 = vpow2.f32 %v4443_v20 }
 0x50d   : > { %v4445_v50 = vmul.f32 1.442695, %v4423_v15  ;;  %v4447_v55 = vmul.f32 1.442695, %v4424_v18 }
 0x50e   : > { %v4395_v53 = vpop.xlane.xlu0 %4394  ;;  %v4398_v37 = vpop.xlane.xlu1 %4397 }
 0x50f   : > { %13081 = vpow2.f32 %v4445_v50  ;;  %v4425_v5 = vsub.f32 %v14124_v52, %v4395_v53  ;;  %v4426_v44 = vsub.f32 %v14118_v39, %v4398_v37 }
 0x510   : > { %v14224_v51 = vpop.eup %13071  ;;  %13083 = vpow2.f32 %v4447_v55 }
 0x511   : > { %v4449_v60 = vmul.f32 1.442695, %v4425_v5  ;;  %v4451_v4 = vmul.f32 1.442695, %v4426_v44  ;;  %v4465_v13 = vsel %vm467_vm2, %v14224_v51, 0.0 }
 0x512   : > { %4466 = vadd.xlane.f32.xlu0 %v4465_v13  ;;  %v4401_v40 = vpop.xlane.xlu0 %4400  ;;  %v4404_v56 = vpop.xlane.xlu1 %4403 }
 0x513   : > { %13085 = vpow2.f32 %v4449_v60  ;;  %v4427_v9 = vsub.f32 %v14132_v19, %v4401_v40  ;;  %v4428_v49 = vsub.f32 %v14126_v48, %v4404_v56 }
 0x514   : > { %v14230_v7 = vpop.eup %13073  ;;  %13087 = vpow2.f32 %v4451_v4 }
 0x515   : > { %v14232_v39 = vpop.eup %13075  ;;  %v4453_v52 = vmul.f32 1.442695, %v4427_v9  ;;  %v4455_v57 = vmul.f32 1.442695, %v4428_v49  ;;  %v4471_v20 = vsel %vm467_vm2, %v14230_v7, 0.0 }
 0x516   : > { %4472 = vadd.xlane.f32.xlu0 %v4471_v20  ;;  %v4407_v41 = vpop.xlane.xlu0 %4406  ;;  %v4474_v38 = vsel %vm467_vm2, %v14232_v39, 0.0  ;;  %v4410_v20 = vpop.xlane.xlu1 %4409 }
 0x517   : > { %13089 = vpow2.f32 %v4453_v52  ;;  %v4429_v19 = vsub.f32 %v14140_v14, %v4407_v41  ;;  %4475 = vadd.xlane.f32.xlu1 %v4474_v38  ;;  %v4430_v41 = vsub.f32 %v14134_v3, %v4410_v20 }
 0x518   : > { %v14239_v48 = vpop.eup %13077  ;;  %13091 = vpow2.f32 %v4455_v57 }
 0x519   : > { %v14241_v15 = vpop.eup %13079  ;;  %v4457_v18 = vmul.f32 1.442695, %v4429_v19  ;;  %v4477_v50 = vsel %vm467_vm2, %v14239_v48, 0.0 }
 0x51a   : > { %4478 = vadd.xlane.f32.xlu0 %v4477_v50  ;;  %v4480_v55 = vsel %vm467_vm2, %v14241_v15, 0.0  ;;  %v4416_v38 = vpop.xlane.xlu1 %4415  ;;  %v4413_v19 = vpop.xlane.xlu0 %4412  ;;  %v4459_v50 = vmul.f32 1.442695, %v4430_v41 }
 0x51b   : > { %13093 = vpow2.f32 %v4457_v18  ;;  %4481 = vadd.xlane.f32.xlu1 %v4480_v55  ;;  %v4432_v18 = vsub.f32 %v14142_v47, %v4416_v38  ;;  %v4431_v55 = vsub.f32 %v14150_v58, %v4413_v19 }
 0x51c   : > { %v14247_v53 = vpop.eup %13081  ;;  %13095 = vpow2.f32 %v4459_v50 }
 0x51d   : > { %v14249_v37 = vpop.eup %13083  ;;  %v4483_v14 = vsel %vm467_vm2, %v14247_v53, 0.0 }
 0x51e   : > { %4484 = vadd.xlane.f32.xlu0 %v4483_v14  ;;  %v4486_v5 = vsel %vm467_vm2, %v14249_v37, 0.0  ;;  %v4463_v14 = vmul.f32 1.442695, %v4432_v18 }
 0x51f   : > { %4487 = vadd.xlane.f32.xlu1 %v4486_v5  ;;  %v4461_v5 = vmul.f32 1.442695, %v4431_v55 }
 0x520   : > { %v14255_v44 = vpop.eup %13085  ;;  %13097 = vpow2.f32 %v4463_v14 }
 0x521   : > { %v14257_v60 = vpop.eup %13087  ;;  %v4489_v4 = vsel %vm467_vm2, %v14255_v44, 0.0  ;;  %13099 = vpow2.f32 %v4461_v5 }
 0x522   : > { %4490 = vadd.xlane.f32.xlu0 %v4489_v4  ;;  %v4492_v13 = vsel %vm467_vm2, %v14257_v60, 0.0 }
 0x523   : > { %4493 = vadd.xlane.f32.xlu1 %v4492_v13 }
 0x524   : > { %v14263_v40 = vpop.eup %13089 }
 0x525   : > { %v14265_v56 = vpop.eup %13091  ;;  %v4495_v9 = vsel %vm467_vm2, %v14263_v40, 0.0 }
 0x526   : > { %4496 = vadd.xlane.f32.xlu0 %v4495_v9  ;;  %v4498_v49 = vsel %vm467_vm2, %v14265_v56, 0.0 }
 0x527   : > { %4499 = vadd.xlane.f32.xlu1 %v4498_v49  ;;  %v14294_v49 = vpop.permute.xlu1 %6309 }
 0x528   : > { %v14271_v52 = vpop.eup %13093 }
 0x529   : > { %v4501_v57 = vsel %vm467_vm2, %v14271_v52, 0.0  ;;  %v14282_v4 = vpop.eup %13095 }
 0x52a   : > { %4502 = vadd.xlane.f32.xlu0 %v4501_v57  ;;  %v4504_v9 = vsel %vm467_vm2, %v14282_v4, 0.0 }
 0x52d   : > { %v14284_v13 = vpop.eup %13097 }
 0x52e   : > { %v14288_v3 = vpop.eup %13099  ;;  %v4510_v47 = vsel %vm467_vm2, %v14284_v13, 0.0 }
 0x52f   : > { %v4507_v58 = vsel %vm467_vm2, %v14288_v3, 0.0 }
 0x538   : > { %6307 = vrot.lane.b32.xlu1 %v13399_v27, %s13277_s14 }
 0x540   : > { %6229 = vrot.lane.b32.xlu0 %v13401_v28, %s13277_s14 }
 0x55c   : > { %4505 = vadd.xlane.f32.xlu1 %v4504_v9 }
 0x55f   : > { %4511 = vadd.xlane.f32.xlu0 %v4510_v47 }
 0x560   : > { %4508 = vadd.xlane.f32.xlu1 %v4507_v58 }
 0x56e   : > { %v4470_v57 = vpop.xlane.xlu1 %4469 }
 0x56f   : > { %13101 = vrcp.f32 %v4470_v57 }
 0x571   : > { %6465 = vrot.lane.b32.xlu1 %v13405_v29, %s13276_s13 }
 0x575   : > { %6463 = vrot.lane.b32.xlu1 %v13405_v29, %s13277_s14  ;;  %6387 = vrot.lane.b32.xlu0 %v13407_v30, %s13276_s13 }
 0x579   : > { %6621 = vrot.lane.b32.xlu1 %v13411_v31, %s13276_s13  ;;  %6385 = vrot.lane.b32.xlu0 %v13407_v30, %s13277_s14 }
 0x57c   : > { %v13102_v20 = vpop.eup %13101 }
 0x57d   : > { %6619 = vrot.lane.b32.xlu1 %v13411_v31, %s13277_s14  ;;  %6543 = vrot.lane.b32.xlu0 %v13413_v32, %s13276_s13  ;;  %v4530_v41 = vmul.f32 %v13102_v20, %v14203_v59  ;;  %v14340_v59 = vpop.permute.xlu0 %6231 }
 0x57f   : > { %12546 = vmatmul.mubr.msk.f32.vlgmr.msra.gmra.mxu0 %vm467_vm2, %v4530_v41 }
 0x580   : > { %12554 = vmatpush3.msra.mxu0 %v14156_v61  ;;  %12555 = vmatprep.mubr.msk.f32.mxu0 %vm13270_vm1, %v15710_v11 }
 0x581   : > { %6777 = vrot.lane.b32.xlu1 %v13417_v33, %s13276_s13  ;;  %6541 = vrot.lane.b32.xlu0 %v13413_v32, %s13277_s14 }
 0x582   : > { %12563 = vmatprep.subr.mxu0 %v15710_v11 }
 0x585   : > { %6775 = vrot.lane.b32.xlu1 %v13417_v33, %s13277_s14  ;;  %6699 = vrot.lane.b32.xlu0 %v13419_v34, %s13276_s13 }
 0x589   : > { %6933 = vrot.lane.b32.xlu1 %v13423_v35, %s13276_s13  ;;  %6697 = vrot.lane.b32.xlu0 %v13419_v34, %s13277_s14 }
 0x58d   : > { %6931 = vrot.lane.b32.xlu1 %v13423_v35, %s13277_s14  ;;  %6855 = vrot.lane.b32.xlu0 %v13425_v36, %s13276_s13 }
 0x591   : > { %7201 = vrot.lane.b32.xlu1 %v13384_v22, %s13278_s15  ;;  %6853 = vrot.lane.b32.xlu0 %v13425_v36, %s13277_s14 }
 0x595   : > { %7885 = vrot.lane.b32.xlu1 %v13405_v29, %s13278_s15  ;;  %7277 = vrot.lane.b32.xlu0 %v13382_v21, %s13278_s15 }
 0x599   : > { %8265 = vrot.lane.b32.xlu1 %v13425_v36, %s13278_s15  ;;  %7353 = vrot.lane.b32.xlu0 %v13389_v24, %s13278_s15 }
 0x59b   : > { %v4467_v61 = vpop.xlane.xlu0 %4466 }
 0x59c   : > { %13103 = vrcp.f32 %v4467_v61 }
 0x59d   : > { %8419 = vrot.lane.b32.xlu1 %v13384_v22, %s13279_s16  ;;  %7429 = vrot.lane.b32.xlu0 %v13387_v23, %s13278_s15 }
 0x59f   : > { %v4473_v38 = vpop.xlane.xlu0 %4472 }
 0x5a0   : > { %13105 = vrcp.f32 %v4473_v38  ;;  %v4476_v19 = vpop.xlane.xlu1 %4475 }
 0x5a1   : > { %13107 = vrcp.f32 %v4476_v19  ;;  %8417 = vrot.lane.b32.xlu1 %v13384_v22, %s13280_s17  ;;  %7505 = vrot.lane.b32.xlu0 %v13395_v26, %s13278_s15 }
 0x5a3   : > { %v4479_v18 = vpop.xlane.xlu0 %4478 }
 0x5a4   : > { %13109 = vrcp.f32 %v4479_v18  ;;  %v4482_v50 = vpop.xlane.xlu1 %4481 }
 0x5a5   : > { %13111 = vrcp.f32 %v4482_v50  ;;  %8575 = vrot.lane.b32.xlu1 %v13389_v24, %s13279_s16  ;;  %7581 = vrot.lane.b32.xlu0 %v13393_v25, %s13278_s15 }
 0x5a7   : > { %v4485_v55 = vpop.xlane.xlu0 %4484 }
 0x5a8   : > { %13113 = vrcp.f32 %v4485_v55  ;;  %v4488_v14 = vpop.xlane.xlu1 %4487 }
 0x5a9   : > { %v13104_v5 = vpop.eup %13103  ;;  %13115 = vrcp.f32 %v4488_v14  ;;  %8573 = vrot.lane.b32.xlu1 %v13389_v24, %s13280_s17  ;;  %7657 = vrot.lane.b32.xlu0 %v13401_v28, %s13278_s15 }
 0x5aa   : > { %v4529_v9 = vmul.f32 %v13104_v5, %v14224_v51 }
 0x5ab   : > { %v4491_v47 = vpop.xlane.xlu0 %4490 }
 0x5ac   : > { %13117 = vrcp.f32 %v4491_v47  ;;  %v4494_v58 = vpop.xlane.xlu1 %4493  ;;  %12541 = vmatmul.mubr.msk.f32.vlgmr.msra.gmra.mxu1 %vm467_vm2, %v4529_v9 }
 0x5ad   : > { %v13106_v57 = vpop.eup %13105  ;;  %13119 = vrcp.f32 %v4494_v58  ;;  %12549 = vmatpush3.msra.mxu1 %v14148_v63  ;;  %8731 = vrot.lane.b32.xlu1 %v13395_v26, %s13279_s16 }
 0x5ae   : > { %v13108_v20 = vpop.eup %13107  ;;  %7733 = vrot.lane.b32.xlu0 %v13399_v27, %s13278_s15  ;;  %12550 = vmatprep.mubr.msk.f32.mxu1 %vm13270_vm1, %v15710_v11  ;;  %v4531_v51 = vmul.f32 %v13106_v57, %v14230_v7 }
 0x5af   : > { %12558 = vmatprep.subr.mxu1 %v15710_v11  ;;  %v4497_v41 = vpop.xlane.xlu0 %4496  ;;  %v4532_v61 = vmul.f32 %v13108_v20, %v14232_v39 }
 0x5b0   : > { %13121 = vrcp.f32 %v4497_v41  ;;  %v4500_v38 = vpop.xlane.xlu1 %4499  ;;  %12551 = vmatmul.mubr.msk.f32.vlgmr.msra.gmra.mxu1 %vm467_vm2, %v4531_v51 }
 0x5b1   : > { %v13110_v63 = vpop.eup %13109  ;;  %13123 = vrcp.f32 %v4500_v38  ;;  %12556 = vmatmul.mubr.msk.f32.vlgmr.msra.gmra.mxu0 %vm467_vm2, %v4532_v61  ;;  %12559 = vmatpush3.msra.mxu1 %v14158_v16  ;;  %v15746_v61 = vld [vmem:[#allocation29_spill] sm:$0xff]  ;;  %v15747_v38 = vld [vmem:[#allocation34_spill] sm:$0xff] }
 0x5b2   : > { %v13112_v19 = vpop.eup %13111  ;;  %12564 = vmatpush3.msra.mxu0 %v14160_v10  ;;  %7809 = vrot.lane.b32.xlu0 %v13407_v30, %s13278_s15  ;;  %v4533_v7 = vmul.f32 %v13110_v63, %v14239_v48  ;;  %v15748_v63 = vld [vmem:[#allocation30_spill] sm:$0xff] }
 0x5b3   : > { %12560 = vmatprep.mubr.msk.f32.mxu1 %vm13270_vm1, %v15710_v11  ;;  %12568 = vmatprep.subr.mxu1 %v15710_v11  ;;  %v4503_v39 = vpop.xlane.xlu0 %4502  ;;  %v4534_v18 = vmul.f32 %v13112_v19, %v14241_v15  ;;  %v15749_v19 = vld [vmem:[#allocation35_spill] sm:$0xff] }
 0x5b4   : > { %13125 = vrcp.f32 %v4503_v39  ;;  %12565 = vmatprep.mubr.msk.f32.mxu0 %vm13270_vm1, %v15710_v11  ;;  %12573 = vmatprep.subr.mxu0 %v15710_v11  ;;  %v15751_v39 = vld [vmem:[#allocation36_spill] sm:$0xff] }
 0x5b5   : > { %v13114_v16 = vpop.eup %13113  ;;  %12561 = vmatmul.mubr.msk.f32.vlgmr.msra.gmra.mxu1 %vm467_vm2, %v4533_v7  ;;  %12566 = vmatmul.mubr.msk.f32.vlgmr.msra.gmra.mxu0 %vm467_vm2, %v4534_v18  ;;  %v15750_v7 = vld [vmem:[#allocation31_spill] sm:$0xff] }
 0x5b6   : > { %v13116_v10 = vpop.eup %13115  ;;  %12569 = vmatpush3.msra.mxu1 %v14164_v6  ;;  %12574 = vmatpush3.msra.mxu0 %v14170_v54  ;;  %v4535_v48 = vmul.f32 %v13114_v16, %v14247_v53 }
 0x5b7   : > { %7961 = vrot.lane.b32.xlu0 %v13413_v32, %s13278_s15  ;;  %12570 = vmatprep.mubr.msk.f32.mxu1 %vm13270_vm1, %v15710_v11  ;;  %v4536_v15 = vmul.f32 %v13116_v10, %v14249_v37 }
 0x5b8   : > { %12578 = vmatprep.subr.mxu1 %v15710_v11  ;;  %12575 = vmatprep.mubr.msk.f32.mxu0 %vm13270_vm1, %v15710_v11 }
 0x5b9   : > { %v13118_v50 = vpop.eup %13117  ;;  %12583 = vmatprep.subr.mxu0 %v15710_v11  ;;  %12571 = vmatmul.mubr.msk.f32.vlgmr.msra.gmra.mxu1 %vm467_vm2, %v4535_v48 }
 0x5ba   : > { %v13120_v6 = vpop.eup %13119  ;;  %12576 = vmatmul.mubr.msk.f32.vlgmr.msra.gmra.mxu0 %vm467_vm2, %v4536_v15  ;;  %12579 = vmatpush3.msra.mxu1 %v14174_v43  ;;  %v4537_v54 = vmul.f32 %v13118_v50, %v14255_v44 }
 0x5bb   : > { %12584 = vmatpush3.msra.mxu0 %v14178_v62  ;;  %8037 = vrot.lane.b32.xlu0 %v13411_v31, %s13278_s15  ;;  %v4538_v53 = vmul.f32 %v13120_v6, %v14257_v60 }
 0x5bc   : > { %12580 = vmatprep.mubr.msk.f32.mxu1 %vm13270_vm1, %v15710_v11  ;;  %12585 = vmatprep.mubr.msk.f32.mxu0 %vm13270_vm1, %v15710_v11 }
 0x5bd   : > { %v13122_v37 = vpop.eup %13121  ;;  %12588 = vmatprep.subr.mxu1 %v15710_v11  ;;  %12593 = vmatprep.subr.mxu0 %v15710_v11 }
 0x5be   : > { %v13124_v43 = vpop.eup %13123  ;;  %12581 = vmatmul.mubr.msk.f32.vlgmr.msra.gmra.mxu1 %vm467_vm2, %v4537_v54  ;;  %12586 = vmatmul.mubr.msk.f32.vlgmr.msra.gmra.mxu0 %vm467_vm2, %v4538_v53  ;;  %v4539_v62 = vmul.f32 %v13122_v37, %v14263_v40 }
 0x5bf   : > { %12589 = vmatpush3.msra.mxu1 %v14168_v0  ;;  %12594 = vmatpush3.msra.mxu0 %v14182_v12  ;;  %v4540_v44 = vmul.f32 %v13124_v43, %v14265_v56 }
 0x5c0   : > { %8113 = vrot.lane.b32.xlu0 %v13419_v34, %s13278_s15  ;;  %12590 = vmatprep.mubr.msk.f32.mxu1 %vm13270_vm1, %v15710_v11 }
 0x5c1   : > { %v13126_v60 = vpop.eup %13125  ;;  %12595 = vmatprep.mubr.msk.f32.mxu0 %vm13270_vm1, %v15710_v11  ;;  %12598 = vmatprep.subr.mxu1 %v15710_v11 }
 0x5c2   : > { %12603 = vmatprep.subr.mxu0 %v15710_v11  ;;  %12591 = vmatmul.mubr.msk.f32.vlgmr.msra.gmra.mxu1 %vm467_vm2, %v4539_v62  ;;  %v4541_v0 = vmul.f32 %v13126_v60, %v14271_v52 }
 0x5c3   : > { %12596 = vmatmul.mubr.msk.f32.vlgmr.msra.gmra.mxu0 %vm467_vm2, %v4540_v44  ;;  %12599 = vmatpush3.msra.mxu1 %v14186_v2 }
 0x5c4   : > { %12604 = vmatpush3.msra.mxu0 %v14190_v1  ;;  %8189 = vrot.lane.b32.xlu0 %v13417_v33, %s13278_s15  ;;  %v14458_v1 = vpop.permute.xlu1 %6307 }
 0x5c5   : > { %12600 = vmatprep.mubr.msk.f32.mxu1 %vm13270_vm1, %v15710_v11  ;;  %12608 = vmatprep.subr.mxu1 %v15710_v11 }
 0x5c6   : > { %12601 = vmatmul.mubr.msk.f32.vlgmr.msra.gmra.mxu1 %vm467_vm2, %v4541_v0  ;;  %12605 = vmatprep.mubr.msk.f32.mxu0 %vm13270_vm1, %v15710_v11 }
 0x5c7   : > { %12609 = vmatpush3.msra.mxu1 %v14194_v8  ;;  %12613 = vmatprep.subr.mxu0 %v15710_v11  ;;  %v6230_v8 = vpop.permute.xlu0 %6229 }
 0x5c8   : > { %8341 = vrot.lane.b32.xlu0 %v13423_v35, %s13278_s15  ;;  %12610 = vmatprep.mubr.msk.f32.mxu1 %vm13270_vm1, %v15710_v11  ;;  %s15623_s15 = scalar_lea.vmem %s15680_s5, %s11740_s7 }
 0x5c9   : > { %12618 = vmatprep.subr.mxu1 %v15710_v11 }
 0x5cc   : > { %8497 = vrot.lane.b32.xlu0 %v13382_v21, %s13279_s16 }
 0x5d0   : > { %8495 = vrot.lane.b32.xlu0 %v13382_v21, %s13280_s17 }
 0x5d4   : > { %8653 = vrot.lane.b32.xlu0 %v13387_v23, %s13279_s16 }
 0x5d8   : > { %8651 = vrot.lane.b32.xlu0 %v13387_v23, %s13280_s17 }
 0x5e5   : > { %v4506_v12 = vpop.xlane.xlu1 %4505 }
 0x5e6   : > { %13127 = vrcp.f32 %v4506_v12 }
 0x5e8   : > { %v4512_v2 = vpop.xlane.xlu0 %4511 }
 0x5e9   : > { %13129 = vrcp.f32 %v4512_v2  ;;  %v4509_v40 = vpop.xlane.xlu1 %4508 }
 0x5ea   : > { %13131 = vrcp.f32 %v4509_v40 }
 0x5ec   : > { %v6388_v56 = vpop.permute.xlu0 %6387 }
 0x5ed   : > { %v6466_v52 = vpop.permute.xlu1 %6465 }
 0x5f0   : > { %v6386_v55 = vpop.permute.xlu0 %6385 }
 0x5f1   : > { %v6464_v14 = vpop.permute.xlu1 %6463 }
 0x5f3   : > { %v13128_v5 = vpop.eup %13127 }
 0x5f4   : > { %v4542_v9 = vmul.f32 %v13128_v5, %v14282_v4  ;;  %v6544_v58 = vpop.permute.xlu0 %6543 }
 0x5f5   : > { %v6622_v57 = vpop.permute.xlu1 %6621 }
 0x5f6   : > { %v13130_v47 = vpop.eup %13129  ;;  %12606 = vmatmul.mubr.msk.f32.vlgmr.msra.gmra.mxu0 %vm467_vm2, %v4542_v9 }
 0x5f7   : > { %v13132_v20 = vpop.eup %13131  ;;  %12614 = vmatpush3.msra.mxu0 %v14197_v45  ;;  %12615 = vmatprep.mubr.msk.f32.mxu0 %vm13270_vm1, %v15710_v11  ;;  %v4544_v51 = vmul.f32 %v13130_v47, %v14284_v13  ;;  %v15743_v13 = vld [vmem:[#allocation32_spill] sm:$0xff] }
 0x5f8   : > { %12623 = vmatprep.subr.mxu0 %v15710_v11  ;;  %v4543_v41 = vmul.f32 %v13132_v20, %v14288_v3  ;;  %v6542_v45 = vpop.permute.xlu0 %6541 }
 0x5f9   : > { %v6620_v4 = vpop.permute.xlu1 %6619 }
 0x5fa   : > { %12611 = vmatmul.mubr.msk.f32.vlgmr.msra.gmra.mxu1 %vm467_vm2, %v4543_v41  ;;  %12616 = vmatmul.mubr.msk.f32.vlgmr.msra.gmra.mxu0 %vm467_vm2, %v4544_v51 }
 0x5fb   : > { %12619 = vmatpush3.xpose.msk.msra.mxu1 %vm467_vm2, %v14172_v46  ;;  %12624 = vmatpush3.xpose.msk.msra.mxu0 %vm467_vm2, %v14199_v42  ;;  %v15744_v46 = vld [vmem:[#allocation28_spill] sm:$0xff]  ;;  %v15745_v42 = vld [vmem:[#allocation33_spill] sm:$0xff] }
 0x5fc   : > { %12620 = vmatprep.mubr.msk.f32.mxu1 %vm13270_vm1, %v15710_v11  ;;  %12625 = vmatprep.mubr.msk.f32.mxu0 %vm13270_vm1, %v15710_v11 }
 0x5fd   : > { %12628 = vmatprep.subr.mxu1 %v15710_v11  ;;  %12633 = vmatprep.subr.mxu0 %v15710_v11  ;;  %v6778_v3 = vpop.permute.xlu1 %6777 }
 0x5fe   : > { %12621 = vmatmul.mubr.msk.f32.vlgmr.msra.gmra.mxu1 %vm467_vm2, %v14176_v17  ;;  %12626 = vmatmul.mubr.msk.f32.vlgmr.msra.gmra.mxu0 %vm467_vm2, %v15743_v13  ;;  %v6700_v17 = vpop.permute.xlu0 %6699 }
 0x5ff   : > { %12629 = vmatpush3.xpose.msk.msra.mxu1 %vm467_vm2, %v15744_v46  ;;  %12634 = vmatpush3.xpose.msk.msra.mxu0 %vm467_vm2, %v15745_v42 }
 0x600   : > { %12630 = vmatprep.mubr.msk.f32.mxu1 %vm13270_vm1, %v15710_v11  ;;  %12635 = vmatprep.mubr.msk.f32.mxu0 %vm13270_vm1, %v15710_v11 }
 0x601   : > { %12638 = vmatprep.subr.mxu1 %v15710_v11  ;;  %12643 = vmatprep.subr.mxu0 %v15710_v11  ;;  %v6776_v16 = vpop.permute.xlu1 %6775 }
 0x602   : > { %12631 = vmatmul.mubr.msk.f32.vlgmr.msra.gmra.mxu1 %vm467_vm2, %v15746_v61  ;;  %12636 = vmatmul.mubr.msk.f32.vlgmr.msra.gmra.mxu0 %vm467_vm2, %v15747_v38  ;;  %v6698_v18 = vpop.permute.xlu0 %6697 }
 0x603   : > { %12639 = vmatpush3.xpose.msk.msra.mxu1 %vm467_vm2, %v15748_v63  ;;  %12644 = vmatpush3.xpose.msk.msra.mxu0 %vm467_vm2, %v15749_v19 }
 0x604   : > { %12640 = vmatprep.mubr.msk.f32.mxu1 %vm13270_vm1, %v15710_v11  ;;  %12645 = vmatprep.mubr.msk.f32.mxu0 %vm13270_vm1, %v15710_v11 }
 0x605   : > { %12648 = vmatprep.subr.mxu1 %v15710_v11  ;;  %12653 = vmatprep.subr.mxu0 %v15710_v11 }
 0x606   : > { %12641 = vmatmul.mubr.msk.f32.vlgmr.msra.gmra.mxu1 %vm467_vm2, %v15750_v7  ;;  %12646 = vmatmul.mubr.msk.f32.vlgmr.msra.gmra.mxu0 %vm467_vm2, %v15751_v39 }
 0x607   : > { %12649 = vmatpush3.xpose.msk.msra.mxu1 %vm467_vm2, %v14340_v59  ;;  %12654 = vmatpush3.xpose.msk.msra.mxu0 %vm467_vm2, %v14294_v49  ;;  %v6856_v49 = vpop.permute.xlu0 %6855  ;;  %v6934_v59 = vpop.permute.xlu1 %6933 }
 0x608   : > { %12650 = vmatprep.mubr.msk.f32.mxu1 %vm13270_vm1, %v15710_v11  ;;  %12655 = vmatprep.mubr.msk.f32.mxu0 %vm13270_vm1, %v15710_v11 }
 0x609   : > { %12658 = vmatprep.subr.mxu1 %v15710_v11  ;;  %12663 = vmatprep.subr.mxu0 %v15710_v11 }
 0x60a   : > { %12651 = vmatmul.mubr.msk.f32.vlgmr.msra.gmra.mxu1 %vm467_vm2, %v6230_v8  ;;  %12656 = vmatmul.mubr.msk.f32.vlgmr.msra.gmra.mxu0 %vm467_vm2, %v14458_v1 }
 0x60b   : > { %12659 = vmatpush3.xpose.msk.msra.mxu1 %vm467_vm2, %v6388_v56  ;;  %12664 = vmatpush3.xpose.msk.msra.mxu0 %vm467_vm2, %v6466_v52  ;;  %v6854_v10 = vpop.permute.xlu0 %6853  ;;  %v6932_v48 = vpop.permute.xlu1 %6931 }
 0x60c   : > { %12660 = vmatprep.mubr.msk.f32.mxu1 %vm13270_vm1, %v15710_v11  ;;  %12665 = vmatprep.mubr.msk.f32.mxu0 %vm13270_vm1, %v15710_v11 }
 0x60d   : > { %12668 = vmatprep.subr.mxu1 %v15710_v11  ;;  %12673 = vmatprep.subr.mxu0 %v15710_v11 }
 0x60e   : > { %12661 = vmatmul.mubr.msk.f32.vlgmr.msra.gmra.mxu1 %vm467_vm2, %v6386_v55  ;;  %12666 = vmatmul.mubr.msk.f32.vlgmr.msra.gmra.mxu0 %vm467_vm2, %v6464_v14 }
 0x60f   : > { %12669 = vmatpush3.xpose.msk.msra.mxu1 %vm467_vm2, %v6544_v58  ;;  %12674 = vmatpush3.xpose.msk.msra.mxu0 %vm467_vm2, %v6622_v57  ;;  %v7278_v15 = vpop.permute.xlu0 %7277  ;;  %v7202_v50 = vpop.permute.xlu1 %7201 }
 0x610   : > { %12670 = vmatprep.mubr.msk.f32.mxu1 %vm13270_vm1, %v15710_v11  ;;  %12675 = vmatprep.mubr.msk.f32.mxu0 %vm13270_vm1, %v15710_v11 }
 0x611   : > { %12678 = vmatprep.subr.mxu1 %v15710_v11  ;;  %12683 = vmatprep.subr.mxu0 %v15710_v11 }
 0x612   : > { %12671 = vmatmul.mubr.msk.f32.vlgmr.msra.gmra.mxu1 %vm467_vm2, %v6542_v45  ;;  %12676 = vmatmul.mubr.msk.f32.vlgmr.msra.gmra.mxu0 %vm467_vm2, %v6620_v4 }
 0x613   : > { %12679 = vmatpush3.xpose.msk.msra.mxu1 %vm467_vm2, %v6700_v17  ;;  %12684 = vmatpush3.xpose.msk.msra.mxu0 %vm467_vm2, %v6778_v3 }
 0x614   : > { %12680 = vmatprep.mubr.msk.f32.mxu1 %vm13270_vm1, %v15710_v11  ;;  %12685 = vmatprep.mubr.msk.f32.mxu0 %vm13270_vm1, %v15710_v11 }
 0x615   : > { %12688 = vmatprep.subr.mxu1 %v15710_v11  ;;  %12693 = vmatprep.subr.mxu0 %v15710_v11 }
 0x616   : > { %12681 = vmatmul.mubr.msk.f32.vlgmr.msra.gmra.mxu1 %vm467_vm2, %v6698_v18  ;;  %12686 = vmatmul.mubr.msk.f32.vlgmr.msra.gmra.mxu0 %vm467_vm2, %v6776_v16 }
 0x617   : > { %12689 = vmatpush3.xpose.msk.msra.mxu1 %vm467_vm2, %v6856_v49  ;;  %12694 = vmatpush3.xpose.msk.msra.mxu0 %vm467_vm2, %v6934_v59 }
 0x618   : > { %12690 = vmatprep.mubr.msk.f32.mxu1 %vm13270_vm1, %v15710_v11  ;;  %12695 = vmatprep.mubr.msk.f32.mxu0 %vm13270_vm1, %v15710_v11 }
 0x619   : > { %12698 = vmatprep.subr.mxu1 %v15710_v11  ;;  %12703 = vmatprep.subr.mxu0 %v15710_v11 }
 0x61a   : > { %12691 = vmatmul.mubr.msk.f32.vlgmr.msra.gmra.mxu1 %vm467_vm2, %v6854_v10  ;;  %12696 = vmatmul.mubr.msk.f32.vlgmr.msra.gmra.mxu0 %vm467_vm2, %v6932_v48 }
 0x61b   : > { %12699 = vmatpush3.msra.mxu1 %v7202_v50  ;;  %12704 = vmatpush3.msra.mxu0 %v7278_v15 }
 0x61c   : > { %12700 = vmatprep.mubr.msk.f32.mxu1 %vm13270_vm1, %v15710_v11  ;;  %12705 = vmatprep.mubr.msk.f32.mxu0 %vm13270_vm1, %v15710_v11 }
 0x61d   : > { %12708 = vmatprep.subr.mxu1 %v15710_v11  ;;  %12713 = vmatprep.subr.mxu0 %v15710_v11 }
 0x63f   : > { %v14571_v6 = vpop.f32.mrf.mxu0 }
 0x640   : > { %15752 = vst [vmem:[#allocation32_spill] sm:$0xff] %v14571_v6 }
 0x641   : > { %v12547_v54 = vpop.f32.mrf.mxu0 }
 0x66c   : > { %v14573_v53 = vpop.f32.mrf.mxu1 }
 0x66d   : > { %15753 = vst [vmem:[#allocation28_spill] sm:$0xff] %v14573_v53 }
 0x66e   : > { %v12542_v37 = vpop.f32.mrf.mxu1 }
 0x670   : > { %v14575_v43 = vpop.f32.mrf.mxu1 }
 0x671   : > { %15754 = vst [vmem:[#allocation33_spill] sm:$0xff] %v14575_v43  ;;  %v14577_v62 = vpop.f32.mrf.mxu0 }
 0x672   : > { %15755 = vst [vmem:[#allocation29_spill] sm:$0xff] %v14577_v62  ;;  %v12552_v44 = vpop.f32.mrf.mxu1 }
 0x673   : > { %v12557_v60 = vpop.f32.mrf.mxu0 }
 0x675   : > { %v14579_v0 = vpop.f32.mrf.mxu1  ;;  %v14581_v1 = vpop.f32.mrf.mxu0 }
 0x676   : > { %15756 = vst [vmem:[#allocation34_spill] sm:$0xff] %v14579_v0  ;;  %15757 = vst [vmem:[#allocation30_spill] sm:$0xff] %v14581_v1 }
 0x677   : > { %v12562_v8 = vpop.f32.mrf.mxu1  ;;  %v12567_v12 = vpop.f32.mrf.mxu0 }
 0x679   : > { %v14583_v2 = vpop.f32.mrf.mxu1 }
 0x67a   : > { %15758 = vst [vmem:[#allocation35_spill] sm:$0xff] %v14583_v2  ;;  %v14585_v40 = vpop.f32.mrf.mxu0 }
 0x67b   : > { %15759 = vst [vmem:[#allocation31_spill] sm:$0xff] %v14585_v40  ;;  %v12572_v56 = vpop.f32.mrf.mxu1 }
 0x67c   : > { %v12577_v52 = vpop.f32.mrf.mxu0 }
 0x67e   : > { %v14587_v55 = vpop.f32.mrf.mxu1  ;;  %v14589_v14 = vpop.f32.mrf.mxu0 }
 0x67f   : > { %15760 = vst [vmem:[#allocation36_spill] sm:$0xff] %v14587_v55  ;;  %15761 = vst [vmem:[#allocation37_spill] sm:$0xff] %v14589_v14 }
 0x680   : > { %v12582_v5 = vpop.f32.mrf.mxu1  ;;  %v12587_v9 = vpop.f32.mrf.mxu0 }
 0x682   : > { %v14591_v47 = vpop.f32.mrf.mxu1 }
 0x683   : > { %15762 = vst [vmem:[#allocation38_spill] sm:$0xff] %v14591_v47  ;;  %v14593_v58 = vpop.f32.mrf.mxu0 }
 0x684   : > { %15763 = vst [vmem:[#allocation39_spill] sm:$0xff] %v14593_v58  ;;  %v12592_v57 = vpop.f32.mrf.mxu1 }
 0x685   : > { %v12597_v20 = vpop.f32.mrf.mxu0 }
 0x686   : > { %v14595_v51 = vpop.f32.mrf.mxu1 }
 0x687   : > { %15764 = vst [vmem:[#allocation40_spill] sm:$0xff] %v14595_v51 }
 0x688   : > { %v12602_v41 = vpop.f32.mrf.mxu1 }
 0x6b6   : > { %v14597_v45 = vpop.f32.mrf.mxu0 }
 0x6b7   : > { %15765 = vst [vmem:[#allocation41_spill] sm:$0xff] %v14597_v45 }
 0x6b8   : > { %v12607_v4 = vpop.f32.mrf.mxu0 }
 0x6ba   : > { %v14599_v13 = vpop.f32.mrf.mxu1  ;;  %v14601_v46 = vpop.f32.mrf.mxu0 }
 0x6bb   : > { %15766 = vst [vmem:[#allocation42_spill] sm:$0xff] %v14599_v13  ;;  %15767 = vst [vmem:[#allocation43_spill] sm:$0xff] %v14601_v46 }
 0x6bc   : > { %v12612_v42 = vpop.f32.mrf.mxu1  ;;  %v12617_v17 = vpop.f32.mrf.mxu0 }
 0x6be   : > { %v5835_v3 = vpop.f32.mrf.mxu1  ;;  %v5913_v61 = vpop.f32.mrf.mxu0 }
 0x6bf   : > { %v14603_v38 = vmul.f32 0.35355338, %v5835_v3  ;;  %v14605_v63 = vmul.f32 0.35355338, %v5913_v61 }
 0x6c0   : > { %v12622_v19 = vpop.f32.mrf.mxu1  ;;  %v12627_v7 = vpop.f32.mrf.mxu0 }
 0x6c1   : > { %v7025_v39 = vsel %vm467_vm2, %v14603_v38, -inf  ;;  %v7028_v18 = vsel %vm467_vm2, %v14605_v63, -inf }
 0x6c2   : > { %7026 = vmax.xlane.f32.xlu0 %v7025_v39  ;;  %v5991_v16 = vpop.f32.mrf.mxu1  ;;  %7029 = vmax.xlane.f32.xlu1 %v7028_v18  ;;  %v6069_v49 = vpop.f32.mrf.mxu0 }
 0x6c3   : > { %v14611_v59 = vmul.f32 0.35355338, %v5991_v16  ;;  %v14613_v15 = vmul.f32 0.35355338, %v6069_v49 }
 0x6c4   : > { %v12632_v10 = vpop.f32.mrf.mxu1  ;;  %v12637_v48 = vpop.f32.mrf.mxu0 }
 0x6c5   : > { %v7031_v50 = vsel %vm467_vm2, %v14611_v59, -inf  ;;  %v7034_v52 = vsel %vm467_vm2, %v14613_v15, -inf }
 0x6c6   : > { %7032 = vmax.xlane.f32.xlu0 %v7031_v50  ;;  %v6147_v54 = vpop.f32.mrf.mxu1  ;;  %v6225_v37 = vpop.f32.mrf.mxu0 }
 0x6c7   : > { %v14617_v44 = vmul.f32 0.35355338, %v6147_v54  ;;  %v14619_v12 = vmul.f32 0.35355338, %v6225_v37 }
 0x6c8   : > { %v12642_v60 = vpop.f32.mrf.mxu1  ;;  %v12647_v8 = vpop.f32.mrf.mxu0 }
 0x6c9   : > { %v7037_v56 = vsel %vm467_vm2, %v14617_v44, -inf  ;;  %v7040_v17 = vsel %vm467_vm2, %v14619_v12, -inf }
 0x6ca   : > { %v6303_v5 = vpop.f32.mrf.mxu1  ;;  %7038 = vmax.xlane.f32.xlu1 %v7037_v56  ;;  %7035 = vmax.xlane.f32.xlu0 %v7034_v52  ;;  %v6381_v9 = vpop.f32.mrf.mxu0 }
 0x6cb   : > { %v14625_v57 = vmul.f32 0.35355338, %v6303_v5  ;;  %v14627_v4 = vmul.f32 0.35355338, %v6381_v9 }
 0x6cc   : > { %v12652_v20 = vpop.f32.mrf.mxu1  ;;  %v12657_v41 = vpop.f32.mrf.mxu0 }
 0x6cd   : > { %v7043_v42 = vsel %vm467_vm2, %v14625_v57, -inf  ;;  %v7046_v49 = vsel %vm467_vm2, %v14627_v4, -inf }
 0x6ce   : > { %v6459_v3 = vpop.f32.mrf.mxu1  ;;  %7044 = vmax.xlane.f32.xlu1 %v7043_v42  ;;  %7041 = vmax.xlane.f32.xlu0 %v7040_v17  ;;  %v6537_v61 = vpop.f32.mrf.mxu0 }
 0x6cf   : > { %v14633_v19 = vmul.f32 0.35355338, %v6459_v3  ;;  %v14635_v18 = vmul.f32 0.35355338, %v6537_v61 }
 0x6d0   : > { %v12662_v7 = vpop.f32.mrf.mxu1  ;;  %v12667_v39 = vpop.f32.mrf.mxu0 }
 0x6d1   : > { %v7049_v16 = vsel %vm467_vm2, %v14633_v19, -inf  ;;  %v7052_v56 = vsel %vm467_vm2, %v14635_v18, -inf }
 0x6d2   : > { %v6615_v10 = vpop.f32.mrf.mxu1  ;;  %7050 = vmax.xlane.f32.xlu1 %v7049_v16  ;;  %7047 = vmax.xlane.f32.xlu0 %v7046_v49  ;;  %v6693_v48 = vpop.f32.mrf.mxu0 }
 0x6d3   : > { %v14641_v50 = vmul.f32 0.35355338, %v6615_v10  ;;  %v14643_v60 = vmul.f32 0.35355338, %v6693_v48 }
 0x6d4   : > { %v12672_v54 = vpop.f32.mrf.mxu1  ;;  %v12677_v37 = vpop.f32.mrf.mxu0 }
 0x6d5   : > { %v7055_v8 = vsel %vm467_vm2, %v14641_v50, -inf  ;;  %v7058_v3 = vsel %vm467_vm2, %v14643_v60, -inf }
 0x6d6   : > { %v6771_v52 = vpop.f32.mrf.mxu1  ;;  %7056 = vmax.xlane.f32.xlu1 %v7055_v8  ;;  %7053 = vmax.xlane.f32.xlu0 %v7052_v56  ;;  %v6849_v5 = vpop.f32.mrf.mxu0 }
 0x6d7   : > { %v14649_v9 = vmul.f32 0.35355338, %v6771_v52  ;;  %v14651_v42 = vmul.f32 0.35355338, %v6849_v5  ;;  %v14667_v8 = vpop.permute.xlu0 %7353 }
 0x6d8   : > { %v12682_v20 = vpop.f32.mrf.mxu1  ;;  %v12687_v41 = vpop.f32.mrf.mxu0 }
 0x6d9   : > { %v7061_v17 = vsel %vm467_vm2, %v14649_v9, -inf  ;;  %v7064_v54 = vsel %vm467_vm2, %v14651_v42, -inf }
 0x6da   : > { %v6927_v61 = vpop.f32.mrf.mxu1  ;;  %7062 = vmax.xlane.f32.xlu1 %v7061_v17  ;;  %7059 = vmax.xlane.f32.xlu0 %v7058_v3  ;;  %v7005_v7 = vpop.f32.mrf.mxu0 }
 0x6db   : > { %v14657_v39 = vmul.f32 0.35355338, %v6927_v61  ;;  %v14659_v10 = vmul.f32 0.35355338, %v7005_v7  ;;  %v14671_v56 = vpop.permute.xlu0 %7429  ;;  %v14697_v7 = vpop.permute.xlu1 %7885 }
 0x6dc   : > { %v12692_v16 = vpop.f32.mrf.mxu1  ;;  %v12697_v49 = vpop.f32.mrf.mxu0 }
 0x6dd   : > { %v7067_v48 = vsel %vm467_vm2, %v14657_v39, -inf  ;;  %v7070_v37 = vsel %vm467_vm2, %v14659_v10, -inf }
 0x6de   : > { %7068 = vmax.xlane.f32.xlu1 %v7067_v48  ;;  %7065 = vmax.xlane.f32.xlu0 %v7064_v54 }
 0x6df   : > { %v14679_v52 = vpop.permute.xlu0 %7505  ;;  %v14701_v49 = vpop.permute.xlu1 %8265 }
 0x6e2   : > { %7071 = vmax.xlane.f32.xlu0 %v7070_v37 }
 0x6e3   : > { %v14683_v5 = vpop.permute.xlu0 %7581  ;;  %v14705_v54 = vpop.permute.xlu1 %8419 }
 0x6e7   : > { %v14687_v20 = vpop.permute.xlu0 %7657  ;;  %v14709_v1 = vpop.permute.xlu1 %8417 }
 0x6eb   : > { %v14689_v41 = vpop.permute.xlu0 %7733  ;;  %v14713_v62 = vpop.permute.xlu1 %8575 }
 0x6ef   : > { %8729 = vrot.lane.b32.xlu1 %v13395_v26, %s13280_s17  ;;  %v14691_v17 = vpop.permute.xlu0 %7809  ;;  %v14717_v6 = vpop.permute.xlu1 %8573 }
 0x6f3   : > { %8887 = vrot.lane.b32.xlu1 %v13401_v28, %s13279_s16  ;;  %v14693_v3 = vpop.permute.xlu0 %7961  ;;  %v14721_v55 = vpop.permute.xlu1 %8731 }
 0x6f7   : > { %8885 = vrot.lane.b32.xlu1 %v13401_v28, %s13280_s17  ;;  %v14695_v61 = vpop.permute.xlu0 %8037 }
 0x6f8   : > { %8809 = vrot.lane.b32.xlu0 %v13393_v25, %s13279_s16 }
 0x6fb   : > { %v14699_v16 = vpop.permute.xlu0 %8113 }
 0x6fc   : > { %8807 = vrot.lane.b32.xlu0 %v13393_v25, %s13280_s17 }
 0x6ff   : > { %v14703_v48 = vpop.permute.xlu0 %8189 }
 0x700   : > { %8965 = vrot.lane.b32.xlu0 %v13399_v27, %s13279_s16 }
 0x703   : > { %v14707_v37 = vpop.permute.xlu0 %8341 }
 0x707   : > { %v14711_v0 = vpop.permute.xlu0 %8497 }
 0x70b   : > { %v14715_v43 = vpop.permute.xlu0 %8495 }
 0x70f   : > { %v14719_v53 = vpop.permute.xlu0 %8653 }
 0x713   : > { %v14723_v2 = vpop.permute.xlu0 %8651 }
 0x74b   : > { %v7027_v46 = vpop.xlane.xlu0 %7026  ;;  %v7030_v13 = vpop.xlane.xlu1 %7029 }
 0x74c   : > { %v7073_v45 = vsub.f32 %v14603_v38, %v7027_v46  ;;  %v7074_v51 = vsub.f32 %v14605_v63, %v7030_v13 }
 0x74e   : > { %v7089_v58 = vmul.f32 1.442695, %v7073_v45  ;;  %v7091_v47 = vmul.f32 1.442695, %v7074_v51 }
 0x74f   : > { %v7033_v14 = vpop.xlane.xlu0 %7032 }
 0x750   : > { %13133 = vpow2.f32 %v7089_v58  ;;  %v7075_v40 = vsub.f32 %v14611_v59, %v7033_v14 }
 0x751   : > { %13135 = vpow2.f32 %v7091_v47 }
 0x752   : > { %v7093_v28 = vmul.f32 1.442695, %v7075_v40 }
 0x753   : > { %v7039_v25 = vpop.xlane.xlu1 %7038  ;;  %v7036_v26 = vpop.xlane.xlu0 %7035 }
 0x754   : > { %13137 = vpow2.f32 %v7093_v28  ;;  %v7077_v22 = vsub.f32 %v14617_v44, %v7039_v25  ;;  %v7076_v23 = vsub.f32 %v14613_v15, %v7036_v26 }
 0x756   : > { %v7097_v24 = vmul.f32 1.442695, %v7077_v22  ;;  %v7095_v21 = vmul.f32 1.442695, %v7076_v23 }
 0x757   : > { %v7045_v46 = vpop.xlane.xlu1 %7044  ;;  %v7042_v38 = vpop.xlane.xlu0 %7041 }
 0x758   : > { %13139 = vpow2.f32 %v7097_v24  ;;  %v7079_v51 = vsub.f32 %v14625_v57, %v7045_v46  ;;  %v7078_v58 = vsub.f32 %v14619_v12, %v7042_v38 }
 0x759   : > { %13141 = vpow2.f32 %v7095_v21 }
 0x75a   : > { %v7101_v14 = vmul.f32 1.442695, %v7079_v51  ;;  %v7099_v47 = vmul.f32 1.442695, %v7078_v58 }
 0x75b   : > { %v7051_v40 = vpop.xlane.xlu1 %7050  ;;  %v7048_v45 = vpop.xlane.xlu0 %7047 }
 0x75c   : > { %13143 = vpow2.f32 %v7101_v14  ;;  %v7081_v28 = vsub.f32 %v14633_v19, %v7051_v40  ;;  %v7080_v25 = vsub.f32 %v14627_v4, %v7048_v45 }
 0x75d   : > { %v14734_v26 = vpop.eup %13133  ;;  %13145 = vpow2.f32 %v7099_v47 }
 0x75e   : > { %v14736_v22 = vpop.eup %13135  ;;  %v7105_v23 = vmul.f32 1.442695, %v7081_v28  ;;  %v7103_v24 = vmul.f32 1.442695, %v7080_v25  ;;  %v7121_v13 = vsel %vm467_vm2, %v14734_v26, 0.0 }
 0x75f   : > { %7122 = vadd.xlane.f32.xlu1 %v7121_v13  ;;  %v7057_v21 = vpop.xlane.xlu1 %7056  ;;  %v7054_v63 = vpop.xlane.xlu0 %7053  ;;  %v7124_v59 = vsel %vm467_vm2, %v14736_v22, 0.0 }
 0x760   : > { %13147 = vpow2.f32 %v7105_v23  ;;  %v7083_v15 = vsub.f32 %v14641_v50, %v7057_v21  ;;  %v7082_v44 = vsub.f32 %v14635_v18, %v7054_v63  ;;  %7125 = vadd.xlane.f32.xlu0 %v7124_v59 }
 0x761   : > { %v14744_v12 = vpop.eup %13137  ;;  %13149 = vpow2.f32 %v7103_v24 }
 0x762   : > { %v7109_v57 = vmul.f32 1.442695, %v7083_v15  ;;  %v7107_v4 = vmul.f32 1.442695, %v7082_v44  ;;  %v7127_v19 = vsel %vm467_vm2, %v14744_v12, 0.0 }
 0x763   : > { %7128 = vadd.xlane.f32.xlu1 %v7127_v19  ;;  %v7063_v46 = vpop.xlane.xlu1 %7062  ;;  %v7060_v38 = vpop.xlane.xlu0 %7059 }
 0x764   : > { %13151 = vpow2.f32 %v7109_v57  ;;  %v7085_v51 = vsub.f32 %v14649_v9, %v7063_v46  ;;  %v7084_v58 = vsub.f32 %v14643_v60, %v7060_v38 }
 0x765   : > { %v14750_v50 = vpop.eup %13139  ;;  %13153 = vpow2.f32 %v7107_v4 }
 0x766   : > { %v14752_v18 = vpop.eup %13141  ;;  %v7113_v14 = vmul.f32 1.442695, %v7085_v51  ;;  %v7111_v47 = vmul.f32 1.442695, %v7084_v58  ;;  %v7133_v40 = vsel %vm467_vm2, %v14750_v50, 0.0 }
 0x767   : > { %7134 = vadd.xlane.f32.xlu1 %v7133_v40  ;;  %v7069_v45 = vpop.xlane.xlu1 %7068  ;;  %v7066_v28 = vpop.xlane.xlu0 %7065  ;;  %v7130_v25 = vsel %vm467_vm2, %v14752_v18, 0.0 }
 0x768   : > { %13155 = vpow2.f32 %v7113_v14  ;;  %v7087_v9 = vsub.f32 %v14657_v39, %v7069_v45  ;;  %v7086_v60 = vsub.f32 %v14651_v42, %v7066_v28  ;;  %7131 = vadd.xlane.f32.xlu0 %v7130_v25 }
 0x769   : > { %v14760_v23 = vpop.eup %13143  ;;  %13157 = vpow2.f32 %v7111_v47 }
 0x76a   : > { %v14762_v24 = vpop.eup %13145  ;;  %v7115_v13 = vmul.f32 1.442695, %v7086_v60  ;;  %v7139_v21 = vsel %vm467_vm2, %v14760_v23, 0.0  ;;  %v7117_v63 = vmul.f32 1.442695, %v7087_v9 }
 0x76b   : > { %7140 = vadd.xlane.f32.xlu1 %v7139_v21  ;;  %v7136_v59 = vsel %vm467_vm2, %v14762_v24, 0.0  ;;  %v7072_v25 = vpop.xlane.xlu0 %7071  ;;  %v14839_v21 = vpop.permute.xlu1 %8729 }
 0x76c   : > { %7137 = vadd.xlane.f32.xlu0 %v7136_v59  ;;  %13159 = vpow2.f32 %v7115_v13  ;;  %v7088_v9 = vsub.f32 %v14659_v10, %v7072_v25 }
 0x76d   : > { %v14768_v15 = vpop.eup %13147  ;;  %13161 = vpow2.f32 %v7117_v63 }
 0x76e   : > { %v14770_v42 = vpop.eup %13149  ;;  %v7145_v39 = vsel %vm467_vm2, %v14768_v15, 0.0  ;;  %v7119_v60 = vmul.f32 1.442695, %v7088_v9 }
 0x76f   : > { %7146 = vadd.xlane.f32.xlu1 %v7145_v39  ;;  %v7142_v44 = vsel %vm467_vm2, %v14770_v42, 0.0  ;;  %v14841_v63 = vpop.permute.xlu0 %8809  ;;  %v14843_v59 = vpop.permute.xlu1 %8887 }
 0x770   : > { %7143 = vadd.xlane.f32.xlu0 %v7142_v44  ;;  %13163 = vpow2.f32 %v7119_v60 }
 0x771   : > { %v14776_v57 = vpop.eup %13151 }
 0x772   : > { %v14778_v4 = vpop.eup %13153  ;;  %v7151_v19 = vsel %vm467_vm2, %v14776_v57, 0.0 }
 0x773   : > { %7152 = vadd.xlane.f32.xlu1 %v7151_v19  ;;  %v7148_v46 = vsel %vm467_vm2, %v14778_v4, 0.0  ;;  %v14845_v39 = vpop.permute.xlu0 %8807  ;;  %v14847_v44 = vpop.permute.xlu1 %8885 }
 0x774   : > { %7149 = vadd.xlane.f32.xlu0 %v7148_v46 }
 0x775   : > { %v14784_v38 = vpop.eup %13155 }
 0x776   : > { %v14786_v51 = vpop.eup %13157  ;;  %v7157_v58 = vsel %vm467_vm2, %v14784_v38, 0.0 }
 0x777   : > { %7158 = vadd.xlane.f32.xlu1 %v7157_v58  ;;  %v7154_v14 = vsel %vm467_vm2, %v14786_v51, 0.0  ;;  %v14849_v19 = vpop.permute.xlu0 %8965 }
 0x778   : > { %7155 = vadd.xlane.f32.xlu0 %v7154_v14 }
 0x779   : > { %v14792_v47 = vpop.eup %13159 }
 0x77a   : > { %v7160_v40 = vsel %vm467_vm2, %v14792_v47, 0.0  ;;  %v14796_v45 = vpop.eup %13161 }
 0x77b   : > { %v7163_v28 = vsel %vm467_vm2, %v14796_v45, 0.0 }
 0x77c   : > { %7161 = vadd.xlane.f32.xlu0 %v7160_v40 }
 0x77d   : > { %v14813_v13 = vpop.eup %13163 }
 0x77e   : > { %v7166_v10 = vsel %vm467_vm2, %v14813_v13, 0.0 }
 0x780   : > { %7164 = vadd.xlane.f32.xlu0 %v7163_v28 }
 0x788   : > { %9043 = vrot.lane.b32.xlu1 %v13407_v30, %s13279_s16 }
 0x796   : > { %8963 = vrot.lane.b32.xlu0 %v13399_v27, %s13280_s17 }
 0x79a   : > { %9121 = vrot.lane.b32.xlu0 %v13405_v29, %s13279_s16 }
 0x79e   : > { %9119 = vrot.lane.b32.xlu0 %v13405_v29, %s13280_s17 }
 0x7a2   : > { %9277 = vrot.lane.b32.xlu0 %v13411_v31, %s13279_s16 }
 0x7a6   : > { %9275 = vrot.lane.b32.xlu0 %v13411_v31, %s13280_s17 }
 0x7aa   : > { %9433 = vrot.lane.b32.xlu0 %v13417_v33, %s13279_s16 }
 0x7ac   : > { %7167 = vadd.xlane.f32.xlu1 %v7166_v10 }
 0x7ae   : > { %9431 = vrot.lane.b32.xlu0 %v13417_v33, %s13280_s17 }
 0x7b2   : > { %9589 = vrot.lane.b32.xlu0 %v13423_v35, %s13279_s16 }
 0x7b6   : > { %9587 = vrot.lane.b32.xlu0 %v13423_v35, %s13280_s17 }
 0x7bd   : > { %9041 = vrot.lane.b32.xlu1 %v13407_v30, %s13280_s17 }
 0x7c1   : > { %9199 = vrot.lane.b32.xlu1 %v13413_v32, %s13279_s16 }
 0x7c5   : > { %9197 = vrot.lane.b32.xlu1 %v13413_v32, %s13280_s17 }
 0x7c9   : > { %9355 = vrot.lane.b32.xlu1 %v13419_v34, %s13279_s16 }
 0x7cd   : > { %9353 = vrot.lane.b32.xlu1 %v13419_v34, %s13280_s17 }
 0x7d1   : > { %9511 = vrot.lane.b32.xlu1 %v13425_v36, %s13279_s16 }
 0x7d5   : > { %9509 = vrot.lane.b32.xlu1 %v13425_v36, %s13280_s17 }
 0x7e8   : > { %v7123_v46 = vpop.xlane.xlu1 %7122 }
 0x7e9   : > { %13165 = vrcp.f32 %v7123_v46  ;;  %v7126_v58 = vpop.xlane.xlu0 %7125 }
 0x7ea   : > { %13167 = vrcp.f32 %v7126_v58 }
 0x7ec   : > { %v7129_v14 = vpop.xlane.xlu1 %7128 }
 0x7ed   : > { %13169 = vrcp.f32 %v7129_v14 }
 0x7f0   : > { %v7135_v40 = vpop.xlane.xlu1 %7134 }
 0x7f1   : > { %13171 = vrcp.f32 %v7135_v40  ;;  %v7132_v28 = vpop.xlane.xlu0 %7131 }
 0x7f2   : > { %13173 = vrcp.f32 %v7132_v28 }
 0x7f4   : > { %v7141_v25 = vpop.xlane.xlu1 %7140 }
 0x7f5   : > { %13175 = vrcp.f32 %v7141_v25  ;;  %v7138_v9 = vpop.xlane.xlu0 %7137 }
 0x7f6   : > { %v13166_v60 = vpop.eup %13165  ;;  %13177 = vrcp.f32 %v7138_v9 }
 0x7f7   : > { %v13168_v10 = vpop.eup %13167  ;;  %v7185_v32 = vmul.f32 %v13166_v60, %v14734_v26 }
 0x7f8   : > { %v7147_v35 = vpop.xlane.xlu1 %7146  ;;  %v7186_v36 = vmul.f32 %v13168_v10, %v14736_v22 }
 0x7f9   : > { %13179 = vrcp.f32 %v7147_v35  ;;  %v7144_v46 = vpop.xlane.xlu0 %7143  ;;  %12701 = vmatmul.mubr.msk.f32.vlgmr.msra.gmra.mxu1 %vm467_vm2, %v7185_v32 }
 0x7fa   : > { %v13170_v58 = vpop.eup %13169  ;;  %13181 = vrcp.f32 %v7144_v46  ;;  %12706 = vmatmul.mubr.msk.f32.vlgmr.msra.gmra.mxu0 %vm467_vm2, %v7186_v36  ;;  %12709 = vmatpush3.msra.mxu1 %v14667_v8 }
 0x7fb   : > { %12714 = vmatpush3.msra.mxu0 %v14671_v56  ;;  %12710 = vmatprep.mubr.msk.f32.mxu1 %vm13270_vm1, %v15710_v11  ;;  %v7187_v26 = vmul.f32 %v13170_v58, %v14744_v12 }
 0x7fc   : > { %12718 = vmatprep.subr.mxu1 %v15710_v11  ;;  %v7153_v22 = vpop.xlane.xlu1 %7152  ;;  %12715 = vmatprep.mubr.msk.f32.mxu0 %vm13270_vm1, %v15710_v11 }
 0x7fd   : > { %13183 = vrcp.f32 %v7153_v22  ;;  %v7150_v32 = vpop.xlane.xlu0 %7149  ;;  %12711 = vmatmul.mubr.msk.f32.vlgmr.msra.gmra.mxu1 %vm467_vm2, %v7187_v26  ;;  %12723 = vmatprep.subr.mxu0 %v15710_v11 }
 0x7fe   : > { %v13172_v35 = vpop.eup %13171  ;;  %13185 = vrcp.f32 %v7150_v32  ;;  %12719 = vmatpush3.msra.mxu1 %v14679_v52  ;;  %12720 = vmatprep.mubr.msk.f32.mxu1 %vm13270_vm1, %v15710_v11 }
 0x7ff   : > { %v13174_v36 = vpop.eup %13173  ;;  %12728 = vmatprep.subr.mxu1 %v15710_v11  ;;  %v7189_v8 = vmul.f32 %v13172_v35, %v14750_v50 }
 0x800   : > { %v7159_v56 = vpop.xlane.xlu1 %7158  ;;  %v7188_v12 = vmul.f32 %v13174_v36, %v14752_v18 }
 0x801   : > { %13187 = vrcp.f32 %v7159_v56  ;;  %v7156_v14 = vpop.xlane.xlu0 %7155  ;;  %12721 = vmatmul.mubr.msk.f32.vlgmr.msra.gmra.mxu1 %vm467_vm2, %v7189_v8 }
 0x802   : > { %v13176_v40 = vpop.eup %13175  ;;  %13189 = vrcp.f32 %v7156_v14  ;;  %12716 = vmatmul.mubr.msk.f32.vlgmr.msra.gmra.mxu0 %vm467_vm2, %v7188_v12  ;;  %12729 = vmatpush3.msra.mxu1 %v14687_v20 }
 0x803   : > { %v13178_v52 = vpop.eup %13177  ;;  %12724 = vmatpush3.msra.mxu0 %v14683_v5  ;;  %12730 = vmatprep.mubr.msk.f32.mxu1 %vm13270_vm1, %v15710_v11  ;;  %v7191_v50 = vmul.f32 %v13176_v40, %v14760_v23 }
 0x804   : > { %12738 = vmatprep.subr.mxu1 %v15710_v11  ;;  %12725 = vmatprep.mubr.msk.f32.mxu0 %vm13270_vm1, %v15710_v11  ;;  %v7190_v18 = vmul.f32 %v13178_v52, %v14762_v24 }
 0x805   : > { %12733 = vmatprep.subr.mxu0 %v15710_v11  ;;  %v7162_v28 = vpop.xlane.xlu0 %7161  ;;  %12731 = vmatmul.mubr.msk.f32.vlgmr.msra.gmra.mxu1 %vm467_vm2, %v7191_v50 }
 0x806   : > { %v13180_v20 = vpop.eup %13179  ;;  %13191 = vrcp.f32 %v7162_v28  ;;  %12726 = vmatmul.mubr.msk.f32.vlgmr.msra.gmra.mxu0 %vm467_vm2, %v7190_v18  ;;  %12739 = vmatpush3.msra.mxu1 %v14691_v17 }
 0x807   : > { %v13182_v5 = vpop.eup %13181  ;;  %12734 = vmatpush3.msra.mxu0 %v14689_v41  ;;  %12735 = vmatprep.mubr.msk.f32.mxu0 %vm13270_vm1, %v15710_v11  ;;  %v7193_v23 = vmul.f32 %v13180_v20, %v14768_v15 }
 0x808   : > { %12740 = vmatprep.mubr.msk.f32.mxu1 %vm13270_vm1, %v15710_v11  ;;  %12743 = vmatprep.subr.mxu0 %v15710_v11  ;;  %v7192_v24 = vmul.f32 %v13182_v5, %v14770_v42 }
 0x809   : > { %12748 = vmatprep.subr.mxu1 %v15710_v11  ;;  %v7165_v25 = vpop.xlane.xlu0 %7164  ;;  %12741 = vmatmul.mubr.msk.f32.vlgmr.msra.gmra.mxu1 %vm467_vm2, %v7193_v23 }
 0x80a   : > { %v13184_v17 = vpop.eup %13183  ;;  %13193 = vrcp.f32 %v7165_v25  ;;  %12736 = vmatmul.mubr.msk.f32.vlgmr.msra.gmra.mxu0 %vm467_vm2, %v7192_v24  ;;  %12749 = vmatpush3.msra.mxu1 %v14693_v3 }
 0x80b   : > { %v13186_v41 = vpop.eup %13185  ;;  %12744 = vmatpush3.msra.mxu0 %v14697_v7  ;;  %12745 = vmatprep.mubr.msk.f32.mxu0 %vm13270_vm1, %v15710_v11  ;;  %v7195_v15 = vmul.f32 %v13184_v17, %v14776_v57 }
 0x80c   : > { %12750 = vmatprep.mubr.msk.f32.mxu1 %vm13270_vm1, %v15710_v11  ;;  %12753 = vmatprep.subr.mxu0 %v15710_v11  ;;  %v7194_v42 = vmul.f32 %v13186_v41, %v14778_v4 }
 0x80d   : > { %12758 = vmatprep.subr.mxu1 %v15710_v11  ;;  %12751 = vmatmul.mubr.msk.f32.vlgmr.msra.gmra.mxu1 %vm467_vm2, %v7195_v15 }
 0x80e   : > { %v13188_v3 = vpop.eup %13187  ;;  %12746 = vmatmul.mubr.msk.f32.vlgmr.msra.gmra.mxu0 %vm467_vm2, %v7194_v42  ;;  %12759 = vmatpush3.msra.mxu1 %v14699_v16 }
 0x80f   : > { %v13190_v7 = vpop.eup %13189  ;;  %12754 = vmatpush3.msra.mxu0 %v14695_v61  ;;  %12755 = vmatprep.mubr.msk.f32.mxu0 %vm13270_vm1, %v15710_v11  ;;  %v7197_v57 = vmul.f32 %v13188_v3, %v14784_v38 }
 0x810   : > { %12760 = vmatprep.mubr.msk.f32.mxu1 %vm13270_vm1, %v15710_v11  ;;  %12763 = vmatprep.subr.mxu0 %v15710_v11  ;;  %v7196_v4 = vmul.f32 %v13190_v7, %v14786_v51 }
 0x811   : > { %12768 = vmatprep.subr.mxu1 %v15710_v11  ;;  %12761 = vmatmul.mubr.msk.f32.vlgmr.msra.gmra.mxu1 %vm467_vm2, %v7197_v57 }
 0x812   : > { %12756 = vmatmul.mubr.msk.f32.vlgmr.msra.gmra.mxu0 %vm467_vm2, %v7196_v4  ;;  %12769 = vmatpush3.msra.mxu1 %v14701_v49 }
 0x813   : > { %v13192_v61 = vpop.eup %13191  ;;  %12764 = vmatpush3.msra.mxu0 %v14703_v48  ;;  %12765 = vmatprep.mubr.msk.f32.mxu0 %vm13270_vm1, %v15710_v11 }
 0x814   : > { %12773 = vmatprep.subr.mxu0 %v15710_v11  ;;  %v7198_v16 = vmul.f32 %v13192_v61, %v14792_v47  ;;  %12770 = vmatprep.mubr.msk.f32.mxu1 %vm13270_vm1, %v15710_v11 }
 0x815   : > { %12778 = vmatprep.subr.mxu1 %v15710_v11 }
 0x816   : > { %12766 = vmatmul.mubr.msk.f32.vlgmr.msra.gmra.mxu0 %vm467_vm2, %v7198_v16 }
 0x817   : > { %v13194_v38 = vpop.eup %13193  ;;  %12774 = vmatpush3.msra.mxu0 %v14707_v37  ;;  %12775 = vmatprep.mubr.msk.f32.mxu0 %vm13270_vm1, %v15710_v11 }
 0x818   : > { %v7199_v49 = vmul.f32 %v13194_v38, %v14796_v45  ;;  %12783 = vmatprep.subr.mxu0 %v15710_v11 }
 0x81a   : > { %12771 = vmatmul.mubr.msk.f32.vlgmr.msra.gmra.mxu1 %vm467_vm2, %v7199_v49 }
 0x81b   : > { %12779 = vmatpush3.xpose.msk.msra.mxu1 %vm467_vm2, %v14705_v54  ;;  %12780 = vmatprep.mubr.msk.f32.mxu1 %vm13270_vm1, %v15710_v11 }
 0x81c   : > { %12788 = vmatprep.subr.mxu1 %v15710_v11 }
 0x81e   : > { %12781 = vmatmul.mubr.msk.f32.vlgmr.msra.gmra.mxu1 %vm467_vm2, %v14709_v1 }
 0x81f   : > { %12789 = vmatpush3.xpose.msk.msra.mxu1 %vm467_vm2, %v14713_v62  ;;  %12790 = vmatprep.mubr.msk.f32.mxu1 %vm13270_vm1, %v15710_v11  ;;  %v8964_v62 = vpop.permute.xlu0 %8963 }
 0x820   : > { %12798 = vmatprep.subr.mxu1 %v15710_v11 }
 0x822   : > { %12791 = vmatmul.mubr.msk.f32.vlgmr.msra.gmra.mxu1 %vm467_vm2, %v14717_v6  ;;  %v9044_v6 = vpop.permute.xlu1 %9043 }
 0x823   : > { %12799 = vmatpush3.xpose.msk.msra.mxu1 %vm467_vm2, %v14721_v55  ;;  %12800 = vmatprep.mubr.msk.f32.mxu1 %vm13270_vm1, %v15710_v11  ;;  %v9122_v48 = vpop.permute.xlu0 %9121 }
 0x824   : > { %12808 = vmatprep.subr.mxu1 %v15710_v11 }
 0x826   : > { %12801 = vmatmul.mubr.msk.f32.vlgmr.msra.gmra.mxu1 %vm467_vm2, %v14839_v21 }
 0x827   : > { %12809 = vmatpush3.xpose.msk.msra.mxu1 %vm467_vm2, %v14843_v59  ;;  %12810 = vmatprep.mubr.msk.f32.mxu1 %vm13270_vm1, %v15710_v11  ;;  %v9120_v37 = vpop.permute.xlu0 %9119 }
 0x828   : > { %12818 = vmatprep.subr.mxu1 %v15710_v11 }
 0x82a   : > { %12811 = vmatmul.mubr.msk.f32.vlgmr.msra.gmra.mxu1 %vm467_vm2, %v14847_v44 }
 0x82b   : > { %12819 = vmatpush3.xpose.msk.msra.mxu1 %vm467_vm2, %v9044_v6  ;;  %12820 = vmatprep.mubr.msk.f32.mxu1 %vm13270_vm1, %v15710_v11  ;;  %v9278_v59 = vpop.permute.xlu0 %9277 }
 0x82c   : > { %12828 = vmatprep.subr.mxu1 %v15710_v11 }
 0x835   : > { %v7168_v1 = vpop.xlane.xlu1 %7167 }
 0x836   : > { %13195 = vrcp.f32 %v7168_v1 }
 0x839   : > { %v9042_v55 = vpop.permute.xlu1 %9041 }
 0x83a   : > { %12821 = vmatmul.mubr.msk.f32.vlgmr.msra.gmra.mxu1 %vm467_vm2, %v9042_v55 }
 0x83b   : > { %12830 = vmatprep.mubr.msk.f32.mxu1 %vm13270_vm1, %v15710_v11 }
 0x83d   : > { %v9200_v54 = vpop.permute.xlu1 %9199 }
 0x83e   : > { %12829 = vmatpush3.xpose.msk.msra.mxu1 %vm467_vm2, %v9200_v54 }
 0x83f   : > { %12838 = vmatprep.subr.mxu1 %v15710_v11 }
 0x841   : > { %v9198_v51 = vpop.permute.xlu1 %9197 }
 0x842   : > { %12831 = vmatmul.mubr.msk.f32.vlgmr.msra.gmra.mxu1 %vm467_vm2, %v9198_v51 }
 0x843   : > { %v13196_v47 = vpop.eup %13195  ;;  %12840 = vmatprep.mubr.msk.f32.mxu1 %vm13270_vm1, %v15710_v11 }
 0x844   : > { %v7200_v45 = vmul.f32 %v13196_v47, %v14813_v13 }
 0x845   : > { %v9356_v21 = vpop.permute.xlu1 %9355 }
 0x846   : > { %12776 = vmatmul.mubr.msk.f32.vlgmr.msra.gmra.mxu0 %vm467_vm2, %v7200_v45  ;;  %12839 = vmatpush3.xpose.msk.msra.mxu1 %vm467_vm2, %v9356_v21 }
 0x847   : > { %12784 = vmatpush3.xpose.msk.msra.mxu0 %vm467_vm2, %v14711_v0  ;;  %12785 = vmatprep.mubr.msk.f32.mxu0 %vm13270_vm1, %v15710_v11  ;;  %v9276_v0 = vpop.permute.xlu0 %9275 }
 0x848   : > { %12793 = vmatprep.subr.mxu0 %v15710_v11  ;;  %12848 = vmatprep.subr.mxu1 %v15710_v11 }
 0x849   : > { %v9354_v44 = vpop.permute.xlu1 %9353 }
 0x84a   : > { %12786 = vmatmul.mubr.msk.f32.vlgmr.msra.gmra.mxu0 %vm467_vm2, %v14715_v43  ;;  %12841 = vmatmul.mubr.msk.f32.vlgmr.msra.gmra.mxu1 %vm467_vm2, %v9354_v44 }
 0x84b   : > { %12794 = vmatpush3.xpose.msk.msra.mxu0 %vm467_vm2, %v14719_v53  ;;  %12795 = vmatprep.mubr.msk.f32.mxu0 %vm13270_vm1, %v15710_v11  ;;  %v9434_v43 = vpop.permute.xlu0 %9433 }
 0x84c   : > { %12803 = vmatprep.subr.mxu0 %v15710_v11  ;;  %12850 = vmatprep.mubr.msk.f32.mxu1 %vm13270_vm1, %v15710_v11 }
 0x84d   : > { %v9512_v13 = vpop.permute.xlu1 %9511 }
 0x84e   : > { %12796 = vmatmul.mubr.msk.f32.vlgmr.msra.gmra.mxu0 %vm467_vm2, %v14723_v2  ;;  %12849 = vmatpush3.xpose.msk.msra.mxu1 %vm467_vm2, %v9512_v13 }
 0x84f   : > { %12804 = vmatpush3.xpose.msk.msra.mxu0 %vm467_vm2, %v14841_v63  ;;  %12805 = vmatprep.mubr.msk.f32.mxu0 %vm13270_vm1, %v15710_v11  ;;  %v9432_v2 = vpop.permute.xlu0 %9431 }
 0x850   : > { %12813 = vmatprep.subr.mxu0 %v15710_v11  ;;  %12858 = vmatprep.subr.mxu1 %v15710_v11 }
 0x851   : > { %v9510_v53 = vpop.permute.xlu1 %9509 }
 0x852   : > { %12806 = vmatmul.mubr.msk.f32.vlgmr.msra.gmra.mxu0 %vm467_vm2, %v14845_v39  ;;  %12851 = vmatmul.mubr.msk.f32.vlgmr.msra.gmra.mxu1 %vm467_vm2, %v9510_v53 }
 0x853   : > { %12814 = vmatpush3.xpose.msk.msra.mxu0 %vm467_vm2, %v14849_v19  ;;  %12815 = vmatprep.mubr.msk.f32.mxu0 %vm13270_vm1, %v15710_v11  ;;  %v9590_v63 = vpop.permute.xlu0 %9589 }
 0x854   : > { %12823 = vmatprep.subr.mxu0 %v15710_v11  ;;  %12860 = vmatprep.mubr.msk.f32.mxu1 %vm13270_vm1, %v15710_v11 }
 0x856   : > { %12816 = vmatmul.mubr.msk.f32.vlgmr.msra.gmra.mxu0 %vm467_vm2, %v8964_v62 }
 0x857   : > { %12824 = vmatpush3.xpose.msk.msra.mxu0 %vm467_vm2, %v9122_v48  ;;  %12825 = vmatprep.mubr.msk.f32.mxu0 %vm13270_vm1, %v15710_v11  ;;  %v9588_v39 = vpop.permute.xlu0 %9587 }
 0x858   : > { %12833 = vmatprep.subr.mxu0 %v15710_v11 }
 0x85a   : > { %12826 = vmatmul.mubr.msk.f32.vlgmr.msra.gmra.mxu0 %vm467_vm2, %v9120_v37 }
 0x85b   : > { %12834 = vmatpush3.xpose.msk.msra.mxu0 %vm467_vm2, %v9278_v59  ;;  %12835 = vmatprep.mubr.msk.f32.mxu0 %vm13270_vm1, %v15710_v11 }
 0x85c   : > { %12843 = vmatprep.subr.mxu0 %v15710_v11 }
 0x85e   : > { %12836 = vmatmul.mubr.msk.f32.vlgmr.msra.gmra.mxu0 %vm467_vm2, %v9276_v0 }
 0x85f   : > { %12844 = vmatpush3.xpose.msk.msra.mxu0 %vm467_vm2, %v9434_v43  ;;  %12845 = vmatprep.mubr.msk.f32.mxu0 %vm13270_vm1, %v15710_v11 }
 0x860   : > { %12853 = vmatprep.subr.mxu0 %v15710_v11 }
 0x862   : > { %12846 = vmatmul.mubr.msk.f32.vlgmr.msra.gmra.mxu0 %vm467_vm2, %v9432_v2 }
 0x863   : > { %12854 = vmatpush3.xpose.msk.msra.mxu0 %vm467_vm2, %v9590_v63  ;;  %12855 = vmatprep.mubr.msk.f32.mxu0 %vm13270_vm1, %v15710_v11 }
 0x864   : > { %12863 = vmatprep.subr.mxu0 %v15710_v11 }
 0x866   : > { %12856 = vmatmul.mubr.msk.f32.vlgmr.msra.gmra.mxu0 %vm467_vm2, %v9588_v39 }
 0x867   : > { %12865 = vmatprep.mubr.msk.f32.mxu0 %vm13270_vm1, %v15710_v11 }
 0x8b9   : > { %v15038_v19 = vpop.f32.mrf.mxu1 }
 0x8ba   : > { %v15040_v9 = vpop.f32.mrf.mxu0 }
 0x8bb   : > { %v12702_v60 = vpop.f32.mrf.mxu1 }
 0x8bc   : > { %v12707_v10 = vpop.f32.mrf.mxu0 }
 0x8bd   : > { %v15042_v46 = vpop.f32.mrf.mxu1 }
 0x8bf   : > { %v12712_v58 = vpop.f32.mrf.mxu1 }
 0x8c1   : > { %v15044_v26 = vpop.f32.mrf.mxu1 }
 0x8c2   : > { %v15046_v22 = vpop.f32.mrf.mxu0 }
 0x8c3   : > { %v12722_v32 = vpop.f32.mrf.mxu1 }
 0x8c4   : > { %v12717_v35 = vpop.f32.mrf.mxu0 }
 0x8c5   : > { %v15048_v36 = vpop.f32.mrf.mxu1 }
 0x8c6   : > { %v15050_v8 = vpop.f32.mrf.mxu0 }
 0x8c7   : > { %v12732_v56 = vpop.f32.mrf.mxu1 }
 0x8c8   : > { %v12727_v12 = vpop.f32.mrf.mxu0 }
 0x8c9   : > { %v15052_v14 = vpop.f32.mrf.mxu1 }
 0x8ca   : > { %v15054_v40 = vpop.f32.mrf.mxu0 }
 0x8cb   : > { %v12742_v52 = vpop.f32.mrf.mxu1 }
 0x8cc   : > { %v12737_v50 = vpop.f32.mrf.mxu0 }
 0x8cd   : > { %v15056_v18 = vpop.f32.mrf.mxu1 }
 0x8ce   : > { %v15058_v28 = vpop.f32.mrf.mxu0 }
 0x8cf   : > { %v12752_v20 = vpop.f32.mrf.mxu1 }
 0x8d0   : > { %v12747_v5 = vpop.f32.mrf.mxu0 }
 0x8d1   : > { %v15060_v23 = vpop.f32.mrf.mxu1 }
 0x8d2   : > { %v15062_v24 = vpop.f32.mrf.mxu0 }
 0x8d3   : > { %v12762_v25 = vpop.f32.mrf.mxu1 }
 0x8d4   : > { %v12757_v17 = vpop.f32.mrf.mxu0 }
 0x8d6   : > { %v15064_v41 = vpop.f32.mrf.mxu0 }
 0x8d8   : > { %v12767_v15 = vpop.f32.mrf.mxu0 }
 0x8da   : > { %v15066_v42 = vpop.f32.mrf.mxu1 }
 0x8dc   : > { %v12772_v3 = vpop.f32.mrf.mxu1 }
 0x8de   : > { %v8491_v7 = vpop.f32.mrf.mxu1 }
 0x8df   : > { %v15068_v57 = vmul.f32 0.35355338, %v8491_v7 }
 0x8e0   : > { %v12782_v4 = vpop.f32.mrf.mxu1 }
 0x8e1   : > { %v9681_v61 = vsel %vm467_vm2, %v15068_v57, -inf }
 0x8e2   : > { %9682 = vmax.xlane.f32.xlu1 %v9681_v61  ;;  %v8647_v16 = vpop.f32.mrf.mxu1 }
 0x8e3   : > { %v15076_v13 = vmul.f32 0.35355338, %v8647_v16 }
 0x8e4   : > { %v12792_v38 = vpop.f32.mrf.mxu1 }
 0x8e5   : > { %v9687_v60 = vsel %vm467_vm2, %v15076_v13, -inf }
 0x8e6   : > { %v8803_v49 = vpop.f32.mrf.mxu1 }
 0x8e7   : > { %v15082_v39 = vmul.f32 0.35355338, %v8803_v49 }
 0x8e8   : > { %v12802_v6 = vpop.f32.mrf.mxu1 }
 0x8e9   : > { %v9693_v50 = vsel %vm467_vm2, %v15082_v39, -inf }
 0x8ea   : > { %v8959_v62 = vpop.f32.mrf.mxu1 }
 0x8eb   : > { %v15090_v52 = vmul.f32 0.35355338, %v8959_v62 }
 0x8ec   : > { %v12812_v1 = vpop.f32.mrf.mxu1 }
 0x8ed   : > { %v9699_v3 = vsel %vm467_vm2, %v15090_v52, -inf }
 0x8fa   : > { %v9115_v55 = vpop.f32.mrf.mxu1 }
 0x8fb   : > { %v15098_v15 = vmul.f32 0.35355338, %v9115_v55 }
 0x8fc   : > { %v12822_v48 = vpop.f32.mrf.mxu1 }
 0x8fd   : > { %v9705_v49 = vsel %vm467_vm2, %v15098_v15, -inf }
 0x902   : > { %v9271_v54 = vpop.f32.mrf.mxu1 }
 0x903   : > { %v15106_v38 = vmul.f32 0.35355338, %v9271_v54 }
 0x904   : > { %v12832_v37 = vpop.f32.mrf.mxu1 }
 0x905   : > { %v9711_v37 = vsel %vm467_vm2, %v15106_v38, -inf }
 0x906   : > { %v15072_v51 = vpop.f32.mrf.mxu0 }
 0x908   : > { %v12777_v47 = vpop.f32.mrf.mxu0 }
 0x90a   : > { %v8569_v45 = vpop.f32.mrf.mxu0  ;;  %v9427_v21 = vpop.f32.mrf.mxu1 }
 0x90b   : > { %v15074_v59 = vmul.f32 0.35355338, %v8569_v45  ;;  %v15114_v48 = vmul.f32 0.35355338, %v9427_v21 }
 0x90c   : > { %v12787_v44 = vpop.f32.mrf.mxu0  ;;  %v12842_v0 = vpop.f32.mrf.mxu1 }
 0x90d   : > { %v9684_v53 = vsel %vm467_vm2, %v15074_v59, -inf }
 0x90e   : > { %9685 = vmax.xlane.f32.xlu0 %v9684_v53  ;;  %v8725_v43 = vpop.f32.mrf.mxu0  ;;  %v9717_v53 = vsel %vm467_vm2, %v15114_v48, -inf }
 0x90f   : > { %v15080_v2 = vmul.f32 0.35355338, %v8725_v43 }
 0x910   : > { %v12797_v63 = vpop.f32.mrf.mxu0 }
 0x911   : > { %v9690_v10 = vsel %vm467_vm2, %v15080_v2, -inf }
 0x912   : > { %v9583_v58 = vpop.f32.mrf.mxu1  ;;  %9688 = vmax.xlane.f32.xlu0 %v9687_v60  ;;  %9691 = vmax.xlane.f32.xlu1 %v9690_v10  ;;  %v8881_v32 = vpop.f32.mrf.mxu0  ;;  %v15768_v10 = vld [vmem:[#allocation2_spill] sm:$0xff] }
 0x913   : > { %v15088_v35 = vmul.f32 0.35355338, %v8881_v32  ;;  %v15122_v0 = vmul.f32 0.35355338, %v9583_v58  ;;  %v15769_v58 = vld [vmem:[#allocation5_spill] sm:$0xff]  ;;  %v15770_v32 = vld [vmem:[#allocation4_spill] sm:$0xff] }
 0x914   : > { %v12807_v56 = vpop.f32.mrf.mxu0  ;;  %v12852_v12 = vpop.f32.mrf.mxu1 }
 0x915   : > { %v9696_v20 = vsel %vm467_vm2, %v15088_v35, -inf  ;;  %v9723_v60 = vsel %vm467_vm2, %v15122_v0, -inf  ;;  %v15771_v56 = vld [vmem:[#allocation3_spill] sm:$0xff] }
 0x916   : > { %9694 = vmax.xlane.f32.xlu0 %v9693_v50  ;;  %9697 = vmax.xlane.f32.xlu1 %v9696_v20  ;;  %v9037_v5 = vpop.f32.mrf.mxu0  ;;  %v15772_v12 = vld [vmem:[#allocation7_spill] sm:$0xff]  ;;  %v15773_v50 = vld [vmem:[#allocation6_spill] sm:$0xff]  ;;  %v15774_v20 = vld [vmem:[#allocation8_spill] sm:$0xff] }
 0x917   : > { %v15096_v25 = vmul.f32 0.35355338, %v9037_v5 }
 0x918   : > { %v12817_v17 = vpop.f32.mrf.mxu0 }
 0x919   : > { %v9702_v7 = vsel %vm467_vm2, %v15096_v25, -inf }
 0x91a   : > { %9700 = vmax.xlane.f32.xlu0 %v9699_v3  ;;  %9703 = vmax.xlane.f32.xlu1 %v9702_v7  ;;  %v9193_v4 = vpop.f32.mrf.mxu0 }
 0x91b   : > { %v15104_v61 = vmul.f32 0.35355338, %v9193_v4 }
 0x91c   : > { %v12827_v16 = vpop.f32.mrf.mxu0 }
 0x91d   : > { %v9708_v6 = vsel %vm467_vm2, %v15104_v61, -inf }
 0x91e   : > { %9706 = vmax.xlane.f32.xlu0 %v9705_v49  ;;  %9709 = vmax.xlane.f32.xlu1 %v9708_v6  ;;  %v9349_v62 = vpop.f32.mrf.mxu0 }
 0x91f   : > { %v15112_v1 = vmul.f32 0.35355338, %v9349_v62 }
 0x920   : > { %v12837_v55 = vpop.f32.mrf.mxu0 }
 0x921   : > { %v9714_v54 = vsel %vm467_vm2, %v15112_v1, -inf }
 0x922   : > { %9712 = vmax.xlane.f32.xlu0 %v9711_v37  ;;  %9715 = vmax.xlane.f32.xlu1 %v9714_v54  ;;  %v9505_v47 = vpop.f32.mrf.mxu0 }
 0x923   : > { %v15120_v45 = vmul.f32 0.35355338, %v9505_v47 }
 0x924   : > { %v12847_v44 = vpop.f32.mrf.mxu0 }
 0x925   : > { %v9720_v21 = vsel %vm467_vm2, %v15120_v45, -inf }
 0x926   : > { %9718 = vmax.xlane.f32.xlu0 %v9717_v53  ;;  %9721 = vmax.xlane.f32.xlu1 %v9720_v21  ;;  %v9661_v43 = vpop.f32.mrf.mxu0 }
 0x927   : > { %v15149_v7 = vmul.f32 0.35355338, %v9661_v43 }
 0x928   : > { %v12857_v63 = vpop.f32.mrf.mxu0 }
 0x929   : > { %v9726_v4 = vsel %vm467_vm2, %v15149_v7, -inf }
 0x92a   : > { %9724 = vmax.xlane.f32.xlu0 %v9723_v60 }
 0x937   : > { %9933 = vrot.lane.b32.xlu1 %v15768_v10, %s13281_s19 }
 0x93b   : > { %10009 = vrot.lane.b32.xlu1 %v15769_v58, %s13281_s19 }
 0x93f   : > { %10085 = vrot.lane.b32.xlu1 %v15770_v32, %s13281_s19 }
 0x940   : > { %9857 = vrot.lane.b32.xlu0 %v15771_v56, %s13281_s19 }
 0x943   : > { %10161 = vrot.lane.b32.xlu1 %v15772_v12, %s13281_s19 }
 0x947   : > { %10237 = vrot.lane.b32.xlu1 %v15773_v50, %s13281_s19 }
 0x94b   : > { %10313 = vrot.lane.b32.xlu1 %v15774_v20, %s13281_s19 }
 0x94f   : > { %10389 = vrot.lane.b32.xlu1 %v13399_v27, %s13281_s19 }
 0x953   : > { %10465 = vrot.lane.b32.xlu1 %v13407_v30, %s13281_s19 }
 0x96b   : > { %v9683_v5 = vpop.xlane.xlu1 %9682 }
 0x96c   : > { %v9729_v17 = vsub.f32 %v15068_v57, %v9683_v5 }
 0x96e   : > { %v9745_v3 = vmul.f32 1.442695, %v9729_v17 }
 0x970   : > { %13197 = vpow2.f32 %v9745_v3 }
 0x977   : > { %9727 = vmax.xlane.f32.xlu1 %v9726_v4 }
 0x97d   : > { %v15153_v16 = vpop.eup %13197 }
 0x97e   : > { %v9777_v49 = vsel %vm467_vm2, %v15153_v16, 0.0 }
 0x97f   : > { %9778 = vadd.xlane.f32.xlu0 %v9777_v49 }
 0x988   : > { %10541 = vrot.lane.b32.xlu1 %v13405_v29, %s13281_s19 }
 0x997   : > { %v9686_v27 = vpop.xlane.xlu0 %9685 }
 0x998   : > { %v9730_v30 = vsub.f32 %v15074_v59, %v9686_v27 }
 0x99a   : > { %v9747_v57 = vmul.f32 1.442695, %v9730_v30 }
 0x99b   : > { %v9689_v6 = vpop.xlane.xlu0 %9688  ;;  %v9692_v62 = vpop.xlane.xlu1 %9691 }
 0x99c   : > { %13199 = vpow2.f32 %v9747_v57  ;;  %v9731_v55 = vsub.f32 %v15076_v13, %v9689_v6  ;;  %v9732_v37 = vsub.f32 %v15080_v2, %v9692_v62 }
 0x99e   : > { %v9749_v54 = vmul.f32 1.442695, %v9731_v55  ;;  %v9751_v47 = vmul.f32 1.442695, %v9732_v37 }
 0x99f   : > { %v9695_v44 = vpop.xlane.xlu0 %9694  ;;  %v9698_v53 = vpop.xlane.xlu1 %9697 }
 0x9a0   : > { %13201 = vpow2.f32 %v9749_v54  ;;  %v9733_v21 = vsub.f32 %v15082_v39, %v9695_v44  ;;  %v9734_v29 = vsub.f32 %v15088_v35, %v9698_v53 }
 0x9a1   : > { %13203 = vpow2.f32 %v9751_v47 }
 0x9a2   : > { %v9753_v43 = vmul.f32 1.442695, %v9733_v21  ;;  %v9755_v59 = vmul.f32 1.442695, %v9734_v29 }
 0x9a3   : > { %v9701_v63 = vpop.xlane.xlu0 %9700  ;;  %v9704_v60 = vpop.xlane.xlu1 %9703 }
 0x9a4   : > { %13205 = vpow2.f32 %v9753_v43  ;;  %v9735_v10 = vsub.f32 %v15090_v52, %v9701_v63  ;;  %v9736_v13 = vsub.f32 %v15096_v25, %v9704_v60 }
 0x9a5   : > { %13207 = vpow2.f32 %v9755_v59 }
 0x9a6   : > { %v9757_v2 = vmul.f32 1.442695, %v9735_v10  ;;  %v9759_v58 = vmul.f32 1.442695, %v9736_v13 }
 0x9a7   : > { %v9707_v32 = vpop.xlane.xlu0 %9706  ;;  %v9710_v56 = vpop.xlane.xlu1 %9709 }
 0x9a8   : > { %13209 = vpow2.f32 %v9757_v2  ;;  %v9737_v39 = vsub.f32 %v15098_v15, %v9707_v32  ;;  %v9738_v35 = vsub.f32 %v15104_v61, %v9710_v56 }
 0x9a9   : > { %v15168_v12 = vpop.eup %13199  ;;  %13211 = vpow2.f32 %v9759_v58 }
 0x9aa   : > { %v9761_v50 = vmul.f32 1.442695, %v9737_v39  ;;  %v9763_v20 = vmul.f32 1.442695, %v9738_v35  ;;  %v9780_v52 = vsel %vm467_vm2, %v15168_v12, 0.0 }
 0x9ab   : > { %v9713_v5 = vpop.xlane.xlu0 %9712  ;;  %v9716_v25 = vpop.xlane.xlu1 %9715 }
 0x9ac   : > { %13213 = vpow2.f32 %v9761_v50  ;;  %v9739_v17 = vsub.f32 %v15106_v38, %v9713_v5  ;;  %v9740_v3 = vsub.f32 %v15112_v1, %v9716_v25  ;;  %9781 = vadd.xlane.f32.xlu1 %v9780_v52 }
 0x9ad   : > { %v15174_v4 = vpop.eup %13201  ;;  %13215 = vpow2.f32 %v9763_v20 }
 0x9ae   : > { %v15176_v15 = vpop.eup %13203  ;;  %v9765_v61 = vmul.f32 1.442695, %v9739_v17  ;;  %v9767_v49 = vmul.f32 1.442695, %v9740_v3  ;;  %v9783_v27 = vsel %vm467_vm2, %v15174_v4, 0.0 }
 0x9af   : > { %9784 = vadd.xlane.f32.xlu0 %v9783_v27  ;;  %v9719_v30 = vpop.xlane.xlu0 %9718  ;;  %v9722_v57 = vpop.xlane.xlu1 %9721  ;;  %v9786_v6 = vsel %vm467_vm2, %v15176_v15, 0.0  ;;  %v15776_v27 = vld [vmem:[#allocation10_spill] sm:$0xff] }
 0x9b0   : > { %13217 = vpow2.f32 %v9765_v61  ;;  %v9741_v38 = vsub.f32 %v15114_v48, %v9719_v30  ;;  %v9742_v1 = vsub.f32 %v15120_v45, %v9722_v57  ;;  %9787 = vadd.xlane.f32.xlu1 %v9786_v6 }
 0x9b1   : > { %v15184_v62 = vpop.eup %13205  ;;  %13219 = vpow2.f32 %v9767_v49  ;;  %v15775_v49 = vld [vmem:[#allocation11_spill] sm:$0xff] }
 0x9b2   : > { %v15186_v55 = vpop.eup %13207  ;;  %v9769_v37 = vmul.f32 1.442695, %v9741_v38  ;;  %v9771_v54 = vmul.f32 1.442695, %v9742_v1  ;;  %v9789_v47 = vsel %vm467_vm2, %v15184_v62, 0.0  ;;  %v15779_v38 = vld [vmem:[#allocation38_spill] sm:$0xff] }
 0x9b3   : > { %9790 = vadd.xlane.f32.xlu0 %v9789_v47  ;;  %v9725_v44 = vpop.xlane.xlu0 %9724  ;;  %v9934_v53 = vpop.permute.xlu1 %9933  ;;  %v9792_v21 = vsel %vm467_vm2, %v15186_v55, 0.0 }
 0x9b4   : > { %13221 = vpow2.f32 %v9769_v37  ;;  %v9743_v48 = vsub.f32 %v15122_v0, %v9725_v44  ;;  %12864 = vmatpush3.msra.mxu0 %v9934_v53  ;;  %9793 = vadd.xlane.f32.xlu1 %v9792_v21  ;;  %v15782_v44 = vld [vmem:[#allocation41_spill] sm:$0xff] }
 0x9b5   : > { %v15193_v45 = vpop.eup %13209  ;;  %13223 = vpow2.f32 %v9771_v54  ;;  %12873 = vmatprep.subr.mxu0 %v15710_v11  ;;  %v15780_v54 = vld [vmem:[#allocation39_spill] sm:$0xff] }
 0x9b6   : > { %v15196_v29 = vpop.eup %13211  ;;  %v9773_v43 = vmul.f32 1.442695, %v9743_v48  ;;  %v9795_v59 = vsel %vm467_vm2, %v15193_v45, 0.0  ;;  %v15784_v48 = vld [vmem:[#allocation43_spill] sm:$0xff] }
 0x9b7   : > { %9796 = vadd.xlane.f32.xlu0 %v9795_v59  ;;  %v9858_v63 = vpop.permute.xlu0 %9857  ;;  %v9798_v60 = vsel %vm467_vm2, %v15196_v29, 0.0  ;;  %v10010_v17 = vpop.permute.xlu1 %10009  ;;  %v15787_v59 = vld [vmem:[#allocation36_spill] sm:$0xff] }
 0x9b8   : > { %13225 = vpow2.f32 %v9773_v43  ;;  %12859 = vmatpush3.msra.mxu1 %v9858_v63  ;;  %9799 = vadd.xlane.f32.xlu1 %v9798_v60 }
 0x9b9   : > { %v15202_v0 = vpop.eup %13213  ;;  %12868 = vmatprep.subr.mxu1 %v15710_v11 }
 0x9ba   : > { %v15205_v10 = vpop.eup %13215  ;;  %v9801_v13 = vsel %vm467_vm2, %v15202_v0, 0.0 }
 0x9bb   : > { %9802 = vadd.xlane.f32.xlu0 %v9801_v13  ;;  %v9804_v2 = vsel %vm467_vm2, %v15205_v10, 0.0  ;;  %v15235_v3 = vpop.permute.xlu1 %10085 }
 0x9bc   : > { %9805 = vadd.xlane.f32.xlu1 %v9804_v2 }
 0x9bd   : > { %v15211_v58 = vpop.eup %13217 }
 0x9be   : > { %v15213_v32 = vpop.eup %13219  ;;  %v9807_v56 = vsel %vm467_vm2, %v15211_v58, 0.0 }
 0x9bf   : > { %9808 = vadd.xlane.f32.xlu0 %v9807_v56  ;;  %v9810_v39 = vsel %vm467_vm2, %v15213_v32, 0.0  ;;  %v15239_v61 = vpop.permute.xlu1 %10161  ;;  %v15788_v56 = vld [vmem:[#allocation28_spill] sm:$0xff] }
 0x9c0   : > { %9811 = vadd.xlane.f32.xlu1 %v9810_v39 }
 0x9c1   : > { %v15219_v35 = vpop.eup %13221 }
 0x9c2   : > { %v15221_v50 = vpop.eup %13223  ;;  %v9813_v20 = vsel %vm467_vm2, %v15219_v35, 0.0 }
 0x9c3   : > { %9814 = vadd.xlane.f32.xlu0 %v9813_v20  ;;  %v9816_v52 = vsel %vm467_vm2, %v15221_v50, 0.0  ;;  %v15245_v30 = vpop.permute.xlu1 %10237  ;;  %v15789_v20 = vld [vmem:[#allocation32_spill] sm:$0xff] }
 0x9c4   : > { %9817 = vadd.xlane.f32.xlu1 %v9816_v52 }
 0x9c5   : > { %v15227_v5 = vpop.eup %13225 }
 0x9c6   : > { %v9819_v25 = vsel %vm467_vm2, %v15227_v5, 0.0 }
 0x9c8   : > { %9820 = vadd.xlane.f32.xlu1 %v9819_v25 }
 0x9d9   : > { %10693 = vrot.lane.b32.xlu1 %v13411_v31, %s13281_s19  ;;  %v15777_v31 = vld [vmem:[#allocation31_spill] sm:$0xff] }
 0x9dd   : > { %10769 = vrot.lane.b32.xlu1 %v13419_v34, %s13281_s19  ;;  %v15249_v34 = vpop.permute.xlu1 %10313 }
 0x9e1   : > { %10845 = vrot.lane.b32.xlu1 %v13417_v33, %s13281_s19  ;;  %v15778_v33 = vld [vmem:[#allocation37_spill] sm:$0xff]  ;;  %v15255_v57 = vpop.permute.xlu1 %10389 }
 0x9e5   : > { %10921 = vrot.lane.b32.xlu1 %v15775_v49, %s13281_s19  ;;  %v15259_v6 = vpop.permute.xlu1 %10465 }
 0x9e9   : > { %10997 = vrot.lane.b32.xlu1 %v15776_v27, %s13281_s19 }
 0x9ed   : > { %11103 = vrot.lane.b32.xlu1 %v15777_v31, %s13282_s20 }
 0x9f1   : > { %11167 = vrot.lane.b32.xlu1 %v15054_v40, %s13283_s21 }
 0x9f5   : > { %11107 = vrot.lane.b32.xlu1 %v15778_v33, %s13282_s20 }
 0x9f9   : > { %11171 = vrot.lane.b32.xlu1 %v15058_v28, %s13283_s21  ;;  %v15781_v28 = vld [vmem:[#allocation40_spill] sm:$0xff] }
 0x9fd   : > { %11109 = vrot.lane.b32.xlu1 %v15779_v38, %s13282_s20 }
 0xa00   : > { %v9728_v1 = vpop.xlane.xlu1 %9727 }
 0xa01   : > { %v9744_v37 = vsub.f32 %v15149_v7, %v9728_v1  ;;  %11111 = vrot.lane.b32.xlu1 %v15780_v54, %s13282_s20 }
 0xa03   : > { %v9775_v40 = vmul.f32 1.442695, %v9744_v37 }
 0xa04   : > { %v15295_v43 = vpop.permute.xlu1 %10541 }
 0xa05   : > { %13227 = vpow2.f32 %v9775_v40  ;;  %11173 = vrot.lane.b32.xlu1 %v15056_v18, %s13283_s21 }
 0xa08   : > { %v9779_v47 = vpop.xlane.xlu0 %9778 }
 0xa09   : > { %13229 = vrcp.f32 %v9779_v47  ;;  %11175 = vrot.lane.b32.xlu1 %v15062_v24, %s13283_s21  ;;  %v15783_v24 = vld [vmem:[#allocation42_spill] sm:$0xff] }
 0xa0a   : > { %v15792_v47 = vld [vmem:[#allocation34_spill] sm:$0xff] }
 0xa0d   : > { %11113 = vrot.lane.b32.xlu1 %v15781_v28, %s13282_s20 }
 0xa11   : > { %11115 = vrot.lane.b32.xlu1 %v15782_v44, %s13282_s20 }
 0xa12   : > { %v15274_v7 = vpop.eup %13227 }
 0xa13   : > { %v9822_v53 = vsel %vm467_vm2, %v15274_v7, 0.0 }
 0xa14   : > { %9823 = vadd.xlane.f32.xlu0 %v9822_v53 }
 0xa15   : > { %11177 = vrot.lane.b32.xlu1 %v15060_v23, %s13283_s21  ;;  %v15785_v23 = vld [vmem:[#allocation9_spill] sm:$0xff] }
 0xa16   : > { %v13230_v18 = vpop.eup %13229 }
 0xa17   : > { %v9841_v21 = vmul.f32 %v13230_v18, %v15153_v16  ;;  %v15786_v16 = vld [vmem:[#allocation35_spill] sm:$0xff] }
 0xa19   : > { %12861 = vmatmul.mubr.msk.f32.vlgmr.msra.gmra.mxu1 %vm467_vm2, %v9841_v21  ;;  %11179 = vrot.lane.b32.xlu1 %v15064_v41, %s13283_s21 }
 0xa1a   : > { %12869 = vmatpush3.msra.mxu1 %v10010_v17  ;;  %12870 = vmatprep.mubr.msk.f32.mxu1 %vm13270_vm1, %v15710_v11 }
 0xa1b   : > { %12878 = vmatprep.subr.mxu1 %v15710_v11 }
 0xa1d   : > { %11117 = vrot.lane.b32.xlu1 %v15783_v24, %s13282_s20 }
 0xa21   : > { %11119 = vrot.lane.b32.xlu1 %v15784_v48, %s13282_s20 }
 0xa2a   : > { %10617 = vrot.lane.b32.xlu0 %v15785_v23, %s13281_s19  ;;  %v15794_v23 = vld [vmem:[#allocation25_spill] sm:$0xff] }
 0xa2e   : > { %11101 = vrot.lane.b32.xlu0 %v15786_v16, %s13282_s20 }
 0xa32   : > { %11165 = vrot.lane.b32.xlu0 %v15048_v36, %s13283_s21 }
 0xa35   : > { %v9782_v41 = vpop.xlane.xlu1 %9781 }
 0xa36   : > { %13231 = vrcp.f32 %v9782_v41  ;;  %11105 = vrot.lane.b32.xlu0 %v15787_v59, %s13282_s20  ;;  %v15795_v59 = vld [vmem:[#allocation21_spill] sm:$0xff] }
 0xa38   : > { %v9785_v63 = vpop.xlane.xlu0 %9784 }
 0xa39   : > { %13233 = vrcp.f32 %v9785_v63  ;;  %v9788_v60 = vpop.xlane.xlu1 %9787 }
 0xa3a   : > { %13235 = vrcp.f32 %v9788_v60  ;;  %11169 = vrot.lane.b32.xlu0 %v15052_v14, %s13283_s21 }
 0xa3c   : > { %v9791_v13 = vpop.xlane.xlu0 %9790 }
 0xa3d   : > { %13237 = vrcp.f32 %v9791_v13  ;;  %v9794_v2 = vpop.xlane.xlu1 %9793 }
 0xa3e   : > { %13239 = vrcp.f32 %v9794_v2  ;;  %11089 = vrot.lane.b32.xlu0 %v15788_v56, %s13282_s20 }
 0xa40   : > { %v9797_v36 = vpop.xlane.xlu0 %9796 }
 0xa41   : > { %13241 = vrcp.f32 %v9797_v36  ;;  %v9800_v39 = vpop.xlane.xlu1 %9799 }
 0xa42   : > { %13243 = vrcp.f32 %v9800_v39  ;;  %11091 = vrot.lane.b32.xlu0 %v15789_v20, %s13282_s20  ;;  %v15796_v39 = vld [vmem:[#allocation26_spill] sm:$0xff] }
 0xa43   : > { %v13232_v52 = vpop.eup %13231 }
 0xa44   : > { %v9842_v25 = vmul.f32 %v13232_v52, %v15168_v12  ;;  %v9803_v17 = vpop.xlane.xlu0 %9802 }
 0xa45   : > { %13245 = vrcp.f32 %v9803_v17  ;;  %v9806_v14 = vpop.xlane.xlu1 %9805 }
 0xa46   : > { %v13234_v49 = vpop.eup %13233  ;;  %13247 = vrcp.f32 %v9806_v14  ;;  %11153 = vrot.lane.b32.xlu0 %v15038_v19, %s13283_s21  ;;  %12866 = vmatmul.mubr.msk.f32.vlgmr.msra.gmra.mxu0 %vm467_vm2, %v9842_v25  ;;  %v15797_v14 = vld [vmem:[#allocation22_spill] sm:$0xff] }
 0xa47   : > { %v13236_v27 = vpop.eup %13235  ;;  %v9843_v31 = vmul.f32 %v13234_v49, %v15174_v4  ;;  %12874 = vmatpush3.msra.mxu0 %v15235_v3  ;;  %12875 = vmatprep.mubr.msk.f32.mxu0 %vm13270_vm1, %v15710_v11 }
 0xa48   : > { %v9844_v12 = vmul.f32 %v13236_v27, %v15176_v15  ;;  %12883 = vmatprep.subr.mxu0 %v15710_v11  ;;  %v9809_v56 = vpop.xlane.xlu0 %9808 }
 0xa49   : > { %12871 = vmatmul.mubr.msk.f32.vlgmr.msra.gmra.mxu1 %vm467_vm2, %v9843_v31  ;;  %v9812_v33 = vpop.xlane.xlu1 %9811 }
 0xa4a   : > { %v13238_v38 = vpop.eup %13237  ;;  %12879 = vmatpush3.msra.mxu1 %v15239_v61  ;;  %13249 = vrcp.f32 %v9812_v33  ;;  %11155 = vrot.lane.b32.xlu0 %v15040_v9, %s13283_s21 }
 0xa4b   : > { %v13240_v19 = vpop.eup %13239  ;;  %v9845_v4 = vmul.f32 %v13238_v38, %v15184_v62  ;;  %12876 = vmatmul.mubr.msk.f32.vlgmr.msra.gmra.mxu0 %vm467_vm2, %v9844_v12  ;;  %12880 = vmatprep.mubr.msk.f32.mxu1 %vm13270_vm1, %v15710_v11 }
 0xa4c   : > { %v9846_v15 = vmul.f32 %v13240_v19, %v15186_v55  ;;  %12884 = vmatpush3.msra.mxu0 %v15245_v30  ;;  %12888 = vmatprep.subr.mxu1 %v15710_v11  ;;  %v15790_v55 = vld [vmem:[#allocation33_spill] sm:$0xff]  ;;  %v9815_v25 = vpop.xlane.xlu0 %9814 }
 0xa4d   : > { %12881 = vmatmul.mubr.msk.f32.vlgmr.msra.gmra.mxu1 %vm467_vm2, %v9845_v4  ;;  %12885 = vmatprep.mubr.msk.f32.mxu0 %vm13270_vm1, %v15710_v11  ;;  %v9818_v9 = vpop.xlane.xlu1 %9817 }
 0xa4e   : > { %v13242_v3 = vpop.eup %13241  ;;  %12889 = vmatpush3.msra.mxu1 %v15249_v34  ;;  %12893 = vmatprep.subr.mxu0 %v15710_v11  ;;  %13251 = vrcp.f32 %v9818_v9 }
 0xa4f   : > { %v13244_v62 = vpop.eup %13243  ;;  %v9847_v61 = vmul.f32 %v13242_v3, %v15193_v45  ;;  %11093 = vrot.lane.b32.xlu0 %v15790_v55, %s13282_s20  ;;  %12886 = vmatmul.mubr.msk.f32.vlgmr.msra.gmra.mxu0 %vm467_vm2, %v9846_v15  ;;  %13253 = vrcp.f32 %v9809_v56 }
 0xa50   : > { %v9848_v30 = vmul.f32 %v13244_v62, %v15196_v29  ;;  %12894 = vmatpush3.msra.mxu0 %v15255_v57  ;;  %12890 = vmatprep.mubr.msk.f32.mxu1 %vm13270_vm1, %v15710_v11  ;;  %v15791_v57 = vld [vmem:[#allocation29_spill] sm:$0xff]  ;;  %13255 = vrcp.f32 %v9815_v25  ;;  %v15798_v62 = vld [vmem:[#allocation16_spill] sm:$0xff] }
 0xa51   : > { %12898 = vmatprep.subr.mxu1 %v15710_v11  ;;  %12891 = vmatmul.mubr.msk.f32.vlgmr.msra.gmra.mxu1 %vm467_vm2, %v9847_v61  ;;  %v15343_v34 = vpop.xlane.xlu1 %9820 }
 0xa52   : > { %v13246_v1 = vpop.eup %13245  ;;  %12895 = vmatprep.mubr.msk.f32.mxu0 %vm13270_vm1, %v15710_v11  ;;  %12899 = vmatpush3.msra.mxu1 %v15259_v6  ;;  %13257 = vrcp.f32 %v15343_v34 }
 0xa53   : > { %v13248_v45 = vpop.eup %13247  ;;  %v9849_v29 = vmul.f32 %v13246_v1, %v15202_v0  ;;  %12903 = vmatprep.subr.mxu0 %v15710_v11  ;;  %11095 = vrot.lane.b32.xlu0 %v15791_v57, %s13282_s20 }
 0xa54   : > { %v9850_v37 = vmul.f32 %v13248_v45, %v15205_v10  ;;  %12896 = vmatmul.mubr.msk.f32.vlgmr.msra.gmra.mxu0 %vm467_vm2, %v9848_v30  ;;  %12900 = vmatprep.mubr.msk.f32.mxu1 %vm13270_vm1, %v15710_v11  ;;  %v15799_v45 = vld [vmem:[#allocation24_spill] sm:$0xff] }
 0xa55   : > { %12904 = vmatpush3.msra.mxu0 %v15295_v43  ;;  %12901 = vmatmul.mubr.msk.f32.vlgmr.msra.gmra.mxu1 %vm467_vm2, %v9849_v29  ;;  %v10694_v6 = vpop.permute.xlu1 %10693 }
 0xa56   : > { %12905 = vmatprep.mubr.msk.f32.mxu0 %vm13270_vm1, %v15710_v11  ;;  %12913 = vmatprep.subr.mxu0 %v15710_v11 }
 0xa57   : > { %v13250_v0 = vpop.eup %13249  ;;  %11157 = vrot.lane.b32.xlu0 %v15042_v46, %s13283_s21  ;;  %12908 = vmatprep.subr.mxu1 %v15710_v11 }
 0xa58   : > { %v9852_v10 = vmul.f32 %v13250_v0, %v15213_v32  ;;  %12906 = vmatmul.mubr.msk.f32.vlgmr.msra.gmra.mxu0 %vm467_vm2, %v9850_v37  ;;  %12910 = vmatprep.mubr.msk.f32.mxu1 %vm13270_vm1, %v15710_v11  ;;  %v15800_v0 = vld [vmem:[#allocation12_spill] sm:$0xff] }
 0xa59   : > { %12914 = vmatpush3.msra.mxu0 %v10694_v6  ;;  %12915 = vmatprep.mubr.msk.f32.mxu0 %vm13270_vm1, %v15710_v11  ;;  %v10770_v54 = vpop.permute.xlu1 %10769 }
 0xa5a   : > { %12923 = vmatprep.subr.mxu0 %v15710_v11 }
 0xa5b   : > { %v13252_v40 = vpop.eup %13251  ;;  %11159 = vrot.lane.b32.xlu0 %v15046_v22, %s13283_s21  ;;  %v15793_v22 = vld [vmem:[#allocation30_spill] sm:$0xff] }
 0xa5c   : > { %v9854_v46 = vmul.f32 %v13252_v40, %v15221_v50  ;;  %12916 = vmatmul.mubr.msk.f32.vlgmr.msra.gmra.mxu0 %vm467_vm2, %v9852_v10  ;;  %v13254_v33 = vpop.eup %13253 }
 0xa5d   : > { %v10846_v32 = vpop.permute.xlu1 %10845  ;;  %12925 = vmatprep.mubr.msk.f32.mxu0 %vm13270_vm1, %v15710_v11  ;;  %v9851_v38 = vmul.f32 %v13254_v33, %v15211_v58  ;;  %v13256_v4 = vpop.eup %13255 }
 0xa5e   : > { %12924 = vmatpush3.msra.mxu0 %v10846_v32  ;;  %v9853_v15 = vmul.f32 %v13256_v4, %v15219_v35  ;;  %v15801_v32 = vld [vmem:[#allocation13_spill] sm:$0xff] }
 0xa5f   : > { %11097 = vrot.lane.b32.xlu0 %v15792_v47, %s13282_s20  ;;  %12933 = vmatprep.subr.mxu0 %v15710_v11  ;;  %v13258_v3 = vpop.eup %13257 }
 0xa60   : > { %12926 = vmatmul.mubr.msk.f32.vlgmr.msra.gmra.mxu0 %vm467_vm2, %v9854_v46  ;;  %v9855_v58 = vmul.f32 %v13258_v3, %v15227_v5 }
 0xa61   : > { %v10922_v28 = vpop.permute.xlu1 %10921  ;;  %12935 = vmatprep.mubr.msk.f32.mxu0 %vm13270_vm1, %v15710_v11 }
 0xa63   : > { %11099 = vrot.lane.b32.xlu0 %v15793_v22, %s13282_s20 }
 0xa65   : > { %v10998_v50 = vpop.permute.xlu1 %10997 }
 0xa66   : > { %12934 = vmatpush3.msra.mxu0 %v10998_v50  ;;  %v15802_v50 = vld [vmem:[#allocation14_spill] sm:$0xff] }
 0xa69   : > { %v15385_v44 = vpop.permute.xlu1 %11103 }
 0xa6d   : > { %v15387_v53 = vpop.permute.xlu1 %11167 }
 0xa71   : > { %v15389_v18 = vpop.permute.xlu1 %11107 }
 0xa75   : > { %v15391_v21 = vpop.permute.xlu1 %11171 }
 0xa79   : > { %v11110_v24 = vpop.permute.xlu1 %11109 }
 0xa7a   : > { %v11275_v16 = vsel %vm467_vm2, %v15794_v23, %v11110_v24 }
 0xa7d   : > { %v11112_v48 = vpop.permute.xlu1 %11111 }
 0xa7e   : > { %v11276_v63 = vsel %vm467_vm2, %v15795_v59, %v11112_v48  ;;  %v11318_v59 = vld [vmem:[%s15678_s3 + $0x18] sm:$0xff] }
 0xa7f   : > { %12938 = vmatprep.subr.mxu0 %v11318_v59 }
 0xa81   : > { %v11174_v43 = vpop.permute.xlu1 %11173 }
 0xa82   : > { %v15396_v41 = vsel %vm11281_vm3, %v11275_v16, %v11174_v43 }
 0xa85   : > { %v11176_v60 = vpop.permute.xlu1 %11175 }
 0xa86   : > { %v15401_v13 = vsel %vm11281_vm3, %v11276_v63, %v11176_v60  ;;  %v11317_v63 = vld [vmem:[%s15678_s3 + $0x10] sm:$0xff]  ;;  %v11316_v60 = vld [vmem:[%s15678_s3 + $0x8] sm:$0xff] }
 0xa89   : > { %v11114_v2 = vpop.permute.xlu1 %11113 }
 0xa8a   : > { %v11277_v20 = vsel %vm467_vm2, %v15796_v39, %v11114_v2  ;;  %v11315_v2 = vld [vmem:[%s15678_s3] sm:$0xff] }
 0xa8d   : > { %v11116_v36 = vpop.permute.xlu1 %11115 }
 0xa8e   : > { %v11278_v49 = vsel %vm467_vm2, %v15797_v14, %v11116_v36 }
 0xa91   : > { %v11178_v52 = vpop.permute.xlu1 %11177 }
 0xa92   : > { %v15406_v17 = vsel %vm11281_vm3, %v11277_v20, %v11178_v52 }
 0xa95   : > { %v11180_v27 = vpop.permute.xlu1 %11179 }
 0xa96   : > { %v15411_v31 = vsel %vm11281_vm3, %v11278_v49, %v11180_v27 }
 0xa9d   : > { %v9824_v12 = vpop.xlane.xlu0 %9823 }
 0xa9e   : > { %13259 = vrcp.f32 %v9824_v12 }
 0xaa1   : > { %v10618_v19 = vpop.permute.xlu0 %10617 }
 0xaa2   : > { %12909 = vmatpush3.msra.mxu1 %v10618_v19 }
 0xaa3   : > { %12911 = vmatmul.mubr.msk.f32.vlgmr.msra.gmra.mxu1 %vm467_vm2, %v9851_v38  ;;  %12918 = vmatprep.subr.mxu1 %v15710_v11 }
 0xaa4   : > { %12919 = vmatpush3.msra.mxu1 %v10770_v54  ;;  %12920 = vmatprep.mubr.msk.f32.mxu1 %vm13270_vm1, %v15710_v11 }
 0xaa5   : > { %v11102_v9 = vpop.permute.xlu0 %11101  ;;  %12928 = vmatprep.subr.mxu1 %v15710_v11 }
 0xaa6   : > { %v11271_v61 = vsel %vm467_vm2, %v15798_v62, %v11102_v9 }
 0xaa7   : > { %12921 = vmatmul.mubr.msk.f32.vlgmr.msra.gmra.mxu1 %vm467_vm2, %v9853_v15 }
 0xaa8   : > { %12929 = vmatpush3.msra.mxu1 %v10922_v28  ;;  %12930 = vmatprep.mubr.msk.f32.mxu1 %vm13270_vm1, %v15710_v11 }
 0xaa9   : > { %v11166_v55 = vpop.permute.xlu0 %11165  ;;  %12970 = vmatprep.subr.mxu1 %v11318_v59 }
 0xaaa   : > { %v15428_v30 = vsel %vm11281_vm3, %v11271_v61, %v11166_v55  ;;  %v13285_v61 = vmov 0  }
 0xaab   : > { %v13260_v35 = vpop.eup %13259  ;;  %12931 = vmatmul.mubr.msk.f32.vlgmr.msra.gmra.mxu1 %vm467_vm2, %v9855_v58  ;;  %13004 = vset.pattern.permute.xlu1 %v13285_v61 }
 0xaac   : > { %v9856_v34 = vmul.f32 %v13260_v35, %v15274_v7  ;;  %12974 = vmatpush3.msra.mxu1 %v11318_v59  ;;  %13003 = vset.pattern.permute.xlu0 %v13285_v61  ;;  %v11519_v35 = vld [vmem:[%s15492_s10] sm:$0x7] }
 0xaad   : > { %v11106_v1 = vpop.permute.xlu0 %11105  ;;  %12971 = vmatprep.subr.mxu1 %v11317_v63  ;;  %vm11535_vm4 = vcmp.ne.f32.partialorder %v11519_v35, 0.0 }
 0xaae   : > { %12936 = vmatmul.mubr.msk.f32.vlgmr.msra.gmra.mxu0 %vm467_vm2, %v9856_v34  ;;  %v11273_v11 = vsel %vm467_vm2, %v15799_v45, %v11106_v1  ;;  %12975 = vmatpush3.msra.mxu1 %v11317_v63  ;;  %v11524_v34 = vld [vmem:[%s15492_s10 + $0x14] sm:$0x7]  ;;  %v11526_v45 = vld [vmem:[%s15492_s10 + $0x1c] sm:$0x7] }
 0xaaf   : > { %12939 = vmatpush3.msra.mxu0 %v11318_v59  ;;  %12972 = vmatprep.subr.mxu1 %v11316_v60  ;;  %vm11540_vm6 = vcmp.ne.f32.partialorder %v11524_v34, 0.0  ;;  %vm11542_vm7 = vcmp.ne.f32.partialorder %v11526_v45, 0.0 }
 0xab0   : > { %12940 = vmatprep.subr.mxu0 %v11317_v63  ;;  %12976 = vmatpush3.msra.mxu1 %v11316_v60 }
 0xab1   : > { %v11170_v29 = vpop.permute.xlu0 %11169  ;;  %12941 = vmatpush3.msra.mxu0 %v11317_v63  ;;  %12973 = vmatprep.subr.mxu1 %v11315_v2 }
 0xab2   : > { %v15436_v5 = vsel %vm11281_vm3, %v11273_v11, %v11170_v29  ;;  %12942 = vmatprep.subr.mxu0 %v11316_v60  ;;  %12977 = vmatpush3.msra.mxu1 %v11315_v2  ;;  %v11556_v11 = vsel %vm11540_vm6, 1, %v13285_v61  ;;  %v11558_v29 = vsel %vm11542_vm7, 1, %v13285_v61 }
 0xab3   : > { %12943 = vmatpush3.msra.mxu0 %v11316_v60 }
 0xab4   : > { %12944 = vmatprep.subr.mxu0 %v11315_v2 }
 0xab5   : > { %v15438_v57 = vpop.permute.xlu0 %11089  ;;  %12945 = vmatpush3.msra.mxu0 %v11315_v2  ;;  %v11534_v2 = vld [vmem:[%s15492_s10 + $0x3c] sm:$0x7] }
 0xab6   : > { %vm11550_vm12 = vcmp.ne.f32.partialorder %v11534_v2, 0.0 }
 0xab9   : > { %v11092_v37 = vpop.permute.xlu0 %11091 }
 0xaba   : > { %v11266_v10 = vsel %vm467_vm2, %v15800_v0, %v11092_v37 }
 0xabd   : > { %v15440_v6 = vpop.permute.xlu0 %11153 }
 0xac1   : > { %v11156_v54 = vpop.permute.xlu0 %11155 }
 0xac2   : > { %v15445_v7 = vsel %vm11281_vm3, %v11266_v10, %v11156_v54  ;;  %v15803_v10 = vld [vmem:[#allocation18_spill] sm:$0xff] }
 0xac3   : > { %v11265_v54 = vsel %vm467_vm2, %v15803_v10, %v15438_v57 }
 0xac5   : > { %v11094_v40 = vpop.permute.xlu0 %11093 }
 0xac6   : > { %v11267_v47 = vsel %vm467_vm2, %v15801_v32, %v11094_v40  ;;  %v11282_v40 = vsel %vm11281_vm3, %v11265_v54, %v15440_v6 }
 0xac9   : > { %v11096_v46 = vpop.permute.xlu0 %11095 }
 0xaca   : > { %v11268_v24 = vsel %vm467_vm2, %v15802_v50, %v11096_v46 }
 0xacd   : > { %v11158_v28 = vpop.permute.xlu0 %11157 }
 0xace   : > { %v15450_v22 = vsel %vm11281_vm3, %v11267_v47, %v11158_v28  ;;  %v11528_v47 = vld [vmem:[%s15492_s10 + $0x24] sm:$0x7] }
 0xacf   : > { %vm11544_vm9 = vcmp.ne.f32.partialorder %v11528_v47, 0.0  ;;  %v15806_v47 = vld [vmem:[#allocation20_spill] sm:$0xff] }
 0xad0   : > { %v11560_v28 = vsel %vm11544_vm9, 1, %v13285_v61 }
 0xad1   : > { %v11160_v48 = vpop.permute.xlu0 %11159 }
 0xad2   : > { %v15455_v23 = vsel %vm11281_vm3, %v11268_v24, %v11160_v48 }
 0xad5   : > { %v15505_v37 = vpop.permute.xlu0 %11097 }
 0xad9   : > { %v9929_v16 = vpop.f32.mrf.mxu1  ;;  %v15507_v0 = vpop.permute.xlu0 %11099 }
 0xada   : > { %11217 = vrot.lane.b32.xlu0 %v9929_v16, %s13284_s22  ;;  %v11530_v16 = vld [vmem:[%s15492_s10 + $0x2c] sm:$0x7] }
 0xadb   : > { %v12862_v43 = vpop.f32.mrf.mxu1  ;;  %vm11546_vm10 = vcmp.ne.f32.partialorder %v11530_v16, 0.0 }
 0xadc   : > { %v11532_v43 = vld [vmem:[%s15492_s10 + $0x34] sm:$0x7]  ;;  %v11562_v60 = vsel %vm11546_vm10, 1, %v13285_v61 }
 0xadd   : > { %vm11548_vm11 = vcmp.ne.f32.partialorder %v11532_v43, 0.0 }
 0xb06   : > { %v10005_v56 = vpop.f32.mrf.mxu0 }
 0xb07   : > { %11219 = vrot.lane.b32.xlu0 %v10005_v56, %s13284_s22 }
 0xb08   : > { %v12867_v36 = vpop.f32.mrf.mxu0 }
 0xb09   : > { %v10081_v39 = vpop.f32.mrf.mxu1  ;;  %v11564_v36 = vsel %vm11548_vm11, 1, %v13285_v61 }
 0xb0b   : > { %v10157_v20 = vpop.f32.mrf.mxu0  ;;  %v12872_v52 = vpop.f32.mrf.mxu1  ;;  %11221 = vrot.lane.b32.xlu0 %v10081_v39, %s13284_s22  ;;  %v11520_v39 = vld [vmem:[%s15492_s10 + $0x4] sm:$0x7] }
 0xb0c   : > { %vm11536_vm13 = vcmp.ne.f32.partialorder %v11520_v39, 0.0  ;;  %v11521_v52 = vld [vmem:[%s15492_s10 + $0x8] sm:$0x7] }
 0xb0d   : > { %v12877_v25 = vpop.f32.mrf.mxu0  ;;  %v10233_v14 = vpop.f32.mrf.mxu1  ;;  %vm11537_vm14 = vcmp.ne.f32.partialorder %v11521_v52, 0.0 }
 0xb0f   : > { %v10309_v49 = vpop.f32.mrf.mxu0  ;;  %v12882_v27 = vpop.f32.mrf.mxu1  ;;  %11223 = vrot.lane.b32.xlu0 %v10157_v20, %s13284_s22  ;;  %v11566_v20 = vsel %vm11550_vm12, 1, %v13285_v61 }
 0xb10   : > { %v11523_v27 = vld [vmem:[%s15492_s10 + $0x10] sm:$0x7] }
 0xb11   : > { %v12887_v12 = vpop.f32.mrf.mxu0  ;;  %v10385_v33 = vpop.f32.mrf.mxu1  ;;  %vm11539_vm15 = vcmp.ne.f32.partialorder %v11523_v27, 0.0 }
 0xb12   : > { %v11118_v12 = vpop.permute.xlu1 %11117 }
 0xb13   : > { %v12892_v38 = vpop.f32.mrf.mxu1  ;;  %11229 = vrot.lane.b32.xlu0 %v10385_v33, %s13284_s22 }
 0xb14   : > { %v10461_v19 = vpop.f32.mrf.mxu0  ;;  %v11553_v38 = vsel %vm11537_vm14, 1, %v13285_v61 }
 0xb15   : > { %11231 = vrot.lane.b32.xlu1 %v10461_v19, %s13284_s22  ;;  %v10537_v4 = vpop.f32.mrf.mxu1 }
 0xb16   : > { %v12897_v15 = vpop.f32.mrf.mxu0 }
 0xb17   : > { %v12902_v9 = vpop.f32.mrf.mxu1  ;;  %11233 = vrot.lane.b32.xlu0 %v10537_v4, %s13284_s22  ;;  %v11525_v4 = vld [vmem:[%s15492_s10 + $0x18] sm:$0x7] }
 0xb18   : > { %v10613_v3 = vpop.f32.mrf.mxu0  ;;  %vm11541_vm1 = vcmp.ne.f32.partialorder %v11525_v4, 0.0 }
 0xb19   : > { %11181 = vrot.lane.b32.xlu1 %v15066_v42, %s13283_s21 }
 0xb1a   : > { %v12907_v58 = vpop.f32.mrf.mxu0 }
 0xb1b   : > { %11161 = vrot.lane.b32.xlu0 %v15044_v26, %s13283_s21  ;;  %v11527_v58 = vld [vmem:[%s15492_s10 + $0x20] sm:$0x7] }
 0xb1c   : > { %v10765_v62 = vpop.f32.mrf.mxu0 }
 0xb1d   : > { %11183 = vrot.lane.b32.xlu1 %v15072_v51, %s13283_s21  ;;  %v11522_v51 = vld [vmem:[%s15492_s10 + $0xc] sm:$0x7] }
 0xb1e   : > { %v12917_v55 = vpop.f32.mrf.mxu0  ;;  %vm11538_vm5 = vcmp.ne.f32.partialorder %v11522_v51, 0.0  ;;  %v11529_v51 = vld [vmem:[%s15492_s10 + $0x28] sm:$0x7] }
 0xb1f   : > { %11163 = vrot.lane.b32.xlu0 %v15050_v8, %s13283_s21  ;;  %v11551_v8 = vsel %vm11535_vm4, 1, %v13285_v61  ;;  %v11554_v1 = vsel %vm11538_vm5, 1, %v13285_v61  ;;  %v15804_v55 = vld [vmem:[#allocation19_spill] sm:$0xff]  ;;  %vm11543_vm4 = vcmp.ne.f32.partialorder %v11527_v58, 0.0  ;;  %vm11545_vm5 = vcmp.ne.f32.partialorder %v11529_v51, 0.0 }
 0xb20   : > { %v10917_v26 = vpop.f32.mrf.mxu0  ;;  %v11561_v54 = vsel %vm11545_vm5, 1, %v13285_v61 }
 0xb21   : > { %11235 = vrot.lane.b32.xlu1 %v10613_v3, %s13284_s22  ;;  %v15545_v3 = vpop.permute.xlu1 %11119 }
 0xb22   : > { %v12927_v42 = vpop.f32.mrf.mxu0 }
 0xb23   : > { %11225 = vrot.lane.b32.xlu0 %v10233_v14, %s13284_s22  ;;  %v11552_v14 = vsel %vm11536_vm13, 1, %v13285_v61 }
 0xb27   : > { %11227 = vrot.lane.b32.xlu0 %v10309_v49, %s13284_s22 }
 0xb2b   : > { %11568 = vperm.xlu0 %13003, %v11551_v8  }
 0xb2f   : > { %11577 = vperm.xlu0 %13003, %v11554_v1   ;;  %v15805_v1 = vld [vmem:[#allocation27_spill] sm:$0xff] }
 0xb33   : > { %11583 = vperm.xlu0 %13003, %v11556_v11   ;;  %v11531_v11 = vld [vmem:[%s15492_s10 + $0x30] sm:$0x7] }
 0xb34   : > { %vm11547_vm6 = vcmp.ne.f32.partialorder %v11531_v11, 0.0 }
 0xb37   : > { %11589 = vperm.xlu0 %13003, %v11558_v29  }
 0xb3b   : > { %11595 = vperm.xlu0 %13003, %v11560_v28   ;;  %v11274_v28 = vsel %vm467_vm2, %v15806_v47, %v15389_v18 }
 0xb3f   : > { %11601 = vperm.xlu0 %13003, %v11562_v60  }
 0xb43   : > { %11607 = vperm.xlu0 %13003, %v11564_v36  }
 0xb47   : > { %11613 = vperm.xlu0 %13003, %v11566_v20  }
 0xb4c   : > { %v11218_v46 = vpop.permute.xlu0 %11217 }
 0xb4d   : > { %v11299_v32 = vsel %vm11298_vm8, %v11282_v40, %v11218_v46  ;;  %v11533_v46 = vld [vmem:[%s15492_s10 + $0x38] sm:$0x7] }
 0xb4e   : > { %12946 = vmatprep.mubr.msk.f32.mxu0 %vm270_vm0, %v11299_v32  ;;  %vm11549_vm7 = vcmp.ne.f32.partialorder %v11533_v46, 0.0 }
 0xb63   : > { %v10689_v50 = vpop.f32.mrf.mxu1 }
 0xb64   : > { %11237 = vrot.lane.b32.xlu1 %v10689_v50, %s13284_s22  ;;  %v11291_v50 = vsel %vm11281_vm3, %v11274_v28, %v15391_v21  ;;  %v15808_v21 = vld [vmem:[#allocation17_spill] sm:$0xff] }
 0xb65   : > { %v12912_v57 = vpop.f32.mrf.mxu1 }
 0xb67   : > { %v10841_v24 = vpop.f32.mrf.mxu1 }
 0xb68   : > { %11239 = vrot.lane.b32.xlu1 %v10765_v62, %s13284_s22  ;;  %v11557_v62 = vsel %vm11541_vm1, 1, %v13285_v61 }
 0xb69   : > { %v12922_v6 = vpop.f32.mrf.mxu1 }
 0xb6b   : > { %v10993_v48 = vpop.f32.mrf.mxu1 }
 0xb6c   : > { %11241 = vrot.lane.b32.xlu1 %v10841_v24, %s13284_s22  ;;  %v15807_v24 = vld [vmem:[#allocation15_spill] sm:$0xff] }
 0xb6d   : > { %v12932_v59 = vpop.f32.mrf.mxu1  ;;  %v11269_v6 = vsel %vm467_vm2, %v15807_v24, %v15505_v37 }
 0xb6e   : > { %v11069_v63 = vpop.f32.mrf.mxu0  ;;  %v11565_v59 = vsel %vm11549_vm7, 1, %v13285_v61 }
 0xb70   : > { %11243 = vrot.lane.b32.xlu1 %v10917_v26, %s13284_s22  ;;  %v12937_v56 = vpop.f32.mrf.mxu0  ;;  %v11272_v26 = vsel %vm467_vm2, %v15804_v55, %v15385_v44  ;;  %v11559_v44 = vsel %vm11543_vm4, 1, %v13285_v61 }
 0xb74   : > { %11245 = vrot.lane.b32.xlu1 %v10993_v48, %s13284_s22 }
 0xb78   : > { %11247 = vrot.lane.b32.xlu1 %v11069_v63, %s13284_s22  ;;  %v11270_v63 = vsel %vm467_vm2, %v15808_v21, %v15507_v0 }
 0xb79   : > { %v11220_v25 = vpop.permute.xlu0 %11219 }
 0xb7a   : > { %v11300_v49 = vsel %vm11298_vm8, %v15445_v7, %v11220_v25  ;;  %v11555_v7 = vsel %vm11539_vm15, 1, %v13285_v61 }
 0xb7b   : > { %12947 = vmatmul.mubr.msk.f32.vlgmr.msra.gmra.mxu0 %vm270_vm0, %v11300_v49 }
 0xb7c   : > { %11571 = vperm.xlu1 %13004, %v11552_v14  }
 0xb7d   : > { %v11222_v33 = vpop.permute.xlu0 %11221 }
 0xb7e   : > { %v11301_v19 = vsel %vm11298_vm8, %v15450_v22, %v11222_v33 }
 0xb7f   : > { %12949 = vmatprep.mubr.msk.f32.mxu0 %vm270_vm0, %v11301_v19 }
 0xb80   : > { %11574 = vperm.xlu1 %13004, %v11553_v38   ;;  %v15615_v38 = vld [vmem:[%s15679_s4] ss:$0 sm:$0xff] }
 0xb81   : > { %v11224_v15 = vpop.permute.xlu0 %11223 }
 0xb82   : > { %v11302_v9 = vsel %vm11298_vm8, %v15455_v23, %v11224_v15  ;;  %v11289_v23 = vsel %vm11281_vm3, %v11272_v26, %v15387_v53  ;;  %v11279_v53 = vsel %vm467_vm2, %v15805_v1, %v11118_v12 }
 0xb83   : > { %12950 = vmatmul.mubr.msk.f32.gmra.mxu0 %vm270_vm0, %v11302_v9 }
 0xb84   : > { %11580 = vperm.xlu1 %13004, %v11555_v7  }
 0xb85   : > { %v11230_v22 = vpop.permute.xlu0 %11229 }
 0xb86   : > { %v11305_v42 = vsel %vm11298_vm8, %v15428_v30, %v11230_v22 }
 0xb87   : > { %v11232_v35 = vpop.permute.xlu1 %11231  ;;  %12955 = vmatprep.mubr.msk.f32.mxu1 %vm270_vm0, %v11305_v42 }
 0xb88   : > { %v11306_v8 = vsel %vm11298_vm8, %v11289_v23, %v11232_v35  ;;  %11586 = vperm.xlu1 %13004, %v11557_v62  }
 0xb89   : > { %12956 = vmatmul.mubr.msk.f32.vlgmr.msra.gmra.mxu1 %vm270_vm0, %v11306_v8  ;;  %v11234_v34 = vpop.permute.xlu0 %11233 }
 0xb8a   : > { %v11307_v30 = vsel %vm11298_vm8, %v15436_v5, %v11234_v34  ;;  %v11563_v5 = vsel %vm11547_vm6, 1, %v13285_v61 }
 0xb8b   : > { %v11182_v45 = vpop.permute.xlu1 %11181  ;;  %12958 = vmatprep.mubr.msk.f32.mxu1 %vm270_vm0, %v11307_v30 }
 0xb8c   : > { %v11296_v29 = vsel %vm11281_vm3, %v11279_v53, %v11182_v45  ;;  %11592 = vperm.xlu1 %13004, %v11559_v44  }
 0xb8d   : > { %v11162_v10 = vpop.permute.xlu0 %11161 }
 0xb8e   : > { %v11286_v16 = vsel %vm11281_vm3, %v11269_v6, %v11162_v10 }
 0xb8f   : > { %v11184_v40 = vpop.permute.xlu1 %11183 }
 0xb90   : > { %11598 = vperm.xlu1 %13004, %v11561_v54  }
 0xb91   : > { %v11164_v32 = vpop.permute.xlu0 %11163 }
 0xb92   : > { %v11287_v37 = vsel %vm11281_vm3, %v11270_v63, %v11164_v32 }
 0xb93   : > { %v11236_v57 = vpop.permute.xlu1 %11235 }
 0xb94   : > { %v11308_v48 = vsel %vm11298_vm8, %v11291_v50, %v11236_v57  ;;  %11604 = vperm.xlu1 %13004, %v11563_v5  }
 0xb95   : > { %12959 = vmatmul.mubr.msk.f32.gmra.mxu1 %vm270_vm0, %v11308_v48  ;;  %v11226_v43 = vpop.permute.xlu0 %11225 }
 0xb96   : > { %v11303_v18 = vsel %vm11298_vm8, %v11286_v16, %v11226_v43 }
 0xb97   : > { %12952 = vmatprep.mubr.msk.f32.mxu0 %vm270_vm0, %v11303_v18 }
 0xb98   : > { %11610 = vperm.xlu1 %13004, %v11565_v59  }
 0xb99   : > { %v11228_v60 = vpop.permute.xlu0 %11227 }
 0xb9a   : > { %v11304_v2 = vsel %vm11298_vm8, %v11287_v37, %v11228_v60 }
 0xb9b   : > { %12953 = vmatmul.mubr.msk.f32.gmra.mxu0 %vm270_vm0, %v11304_v2 }
 0xbd6   : > { %v11238_v56 = vpop.permute.xlu1 %11237 }
 0xbd7   : > { %v11309_v61 = vsel %vm11298_vm8, %v15396_v41, %v11238_v56 }
 0xbd8   : > { %12961 = vmatprep.mubr.msk.f32.mxu1 %vm270_vm0, %v11309_v61 }
 0xbda   : > { %v11240_v36 = vpop.permute.xlu1 %11239 }
 0xbdb   : > { %v11310_v39 = vsel %vm11298_vm8, %v15401_v13, %v11240_v36  ;;  %v15809_v13 = vld [vmem:[#allocation23_spill] sm:$0xff] }
 0xbdc   : > { %12962 = vmatmul.mubr.msk.f32.gmra.mxu1 %vm270_vm0, %v11310_v39  ;;  %v11280_v49 = vsel %vm467_vm2, %v15809_v13, %v15545_v3 }
 0xbde   : > { %v11242_v0 = vpop.permute.xlu1 %11241 }
 0xbdf   : > { %v11311_v20 = vsel %vm11298_vm8, %v15406_v17, %v11242_v0  ;;  %v11297_v17 = vsel %vm11281_vm3, %v11280_v49, %v11184_v40 }
 0xbe0   : > { %12964 = vmatprep.mubr.msk.f32.mxu1 %vm270_vm0, %v11311_v20 }
 0xbe2   : > { %v11244_v52 = vpop.permute.xlu1 %11243 }
 0xbe3   : > { %v11312_v25 = vsel %vm11298_vm8, %v15411_v31, %v11244_v52  ;;  %v11569_v31 = vpop.permute.xlu0 %11568 }
 0xbe4   : > { %12965 = vmatmul.mubr.msk.f32.gmra.mxu1 %vm270_vm0, %v11312_v25  ;;  %vm11615_vm2 = vcmp.eq.s32.totalorder %v11569_v31, 1 }
 0xbe6   : > { %v11246_v41 = vpop.permute.xlu1 %11245 }
 0xbe7   : > { %v11313_v14 = vsel %vm11298_vm8, %v11296_v29, %v11246_v41  ;;  %v11578_v19 = vpop.permute.xlu0 %11577 }
 0xbe8   : > { %12967 = vmatprep.mubr.msk.f32.mxu1 %vm270_vm0, %v11313_v14  ;;  %vm11618_vm3 = vcmp.eq.s32.totalorder %v11578_v19, 1 }
 0xbea   : > { %v11248_v27 = vpop.permute.xlu1 %11247 }
 0xbeb   : > { %v11314_v12 = vsel %vm11298_vm8, %v11297_v17, %v11248_v27  ;;  %v11584_v62 = vpop.permute.xlu0 %11583 }
 0xbec   : > { %12968 = vmatmul.mubr.msk.f32.gmra.mxu1 %vm270_vm0, %v11314_v12  ;;  %vm11647_vm0 = vcmask 256000   ;;  %vm11620_vm14 = vcmp.eq.s32.totalorder %v11584_v62, 1 }
 0xbef   : > { %v11590_v8 = vpop.permute.xlu0 %11589 }
 0xbf0   : > { %vm11622_vm10 = vcmp.eq.s32.totalorder %v11590_v8, 1 }
 0xbf3   : > { %v11596_v10 = vpop.permute.xlu0 %11595 }
 0xbf4   : > { %vm11624_vm12 = vcmp.eq.s32.totalorder %v11596_v10, 1 }
 0xbf7   : > { %v11572_v33 = vpop.permute.xlu1 %11571  ;;  %v11602_v18 = vpop.permute.xlu0 %11601 }
 0xbf8   : > { %vm11616_vm9 = vcmp.eq.s32.totalorder %v11572_v33, 1  ;;  %vm11626_vm1 = vcmp.eq.s32.totalorder %v11602_v18, 1 }
 0xbfb   : > { %v11575_v7 = vpop.permute.xlu1 %11574  ;;  %v11608_v36 = vpop.permute.xlu0 %11607 }
 0xbfc   : > { %vm11617_vm8 = vcmp.eq.s32.totalorder %v11575_v7, 1  ;;  %vm11628_vm5 = vcmp.eq.s32.totalorder %v11608_v36, 1 }
 0xbff   : > { %v11581_v55 = vpop.permute.xlu1 %11580  ;;  %v11614_v41 = vpop.permute.xlu0 %11613 }
 0xc00   : > { %vm11619_vm15 = vcmp.eq.s32.totalorder %v11581_v55, 1  ;;  %vm11630_vm7 = vcmp.eq.s32.totalorder %v11614_v41, 1 }
 0xc03   : > { %v11587_v44 = vpop.permute.xlu1 %11586 }
 0xc04   : > { %vm11621_vm11 = vcmp.eq.s32.totalorder %v11587_v44, 1 }
 0xc07   : > { %v11593_v54 = vpop.permute.xlu1 %11592 }
 0xc08   : > { %vm11623_vm13 = vcmp.eq.s32.totalorder %v11593_v54, 1 }
 0xc0b   : > { %v11599_v60 = vpop.permute.xlu1 %11598 }
 0xc0c   : > { %vm11625_vm4 = vcmp.eq.s32.totalorder %v11599_v60, 1 }
 0xc0f   : > { %v11605_v52 = vpop.permute.xlu1 %11604 }
 0xc10   : > { %vm11627_vm6 = vcmp.eq.s32.totalorder %v11605_v52, 1 }
 0xc13   : > { %v11611_v49 = vpop.permute.xlu1 %11610 }
 0xc3b   : > { %v12948_v4 = vpop.f32.mrf.mxu0 }
 0xc3c   : > { %v11446_v15 = vadd.f32 %v12948_v4, %v15615_v38 }
 0xc3d   : > { %v11440_v9 = vpop.f32.mrf.mxu0 }
 0xc3e   : > { %v11632_v3 = vsel %vm11616_vm9, 0.0, %v11446_v15  ;;  %v11441_v58 = vadd.f32 %v15615_v38, %v11440_v9  ;;  %vm11629_vm9 = vcmp.eq.s32.totalorder %v11611_v49, 1 }
 0xc3f   : > { %11649 = vst.msk [vmem:[%s15623_s15 + $0x4] sm:$0x7] %vm11647_vm0, %v11632_v3 }
 0xc40   : > { %v11631_v22 = vsel %vm11615_vm2, 0.0, %v11441_v58 }
 0xc41   : > { %11648 = vst.msk [vmem:[%s15623_s15] sm:$0x7] %vm11647_vm0, %v11631_v22 }
 0xc43   : > { %v12951_v26 = vpop.f32.mrf.mxu0 }
 0xc44   : > { %v11456_v42 = vadd.f32 %v12951_v26, %v15615_v38 }
 0xc45   : > { %v11450_v23 = vpop.f32.mrf.mxu0 }
 0xc46   : > { %v11634_v35 = vsel %vm11618_vm3, 0.0, %v11456_v42  ;;  %v11451_v51 = vadd.f32 %v15615_v38, %v11450_v23 }
 0xc47   : > { %11651 = vst.msk [vmem:[%s15623_s15 + $0xc] sm:$0x7] %vm11647_vm0, %v11634_v35 }
 0xc48   : > { %v11633_v34 = vsel %vm11617_vm8, 0.0, %v11451_v51 }
 0xc49   : > { %11650 = vst.msk [vmem:[%s15623_s15 + $0x8] sm:$0x7] %vm11647_vm0, %v11633_v34  ;;  %v12957_v30 = vpop.f32.mrf.mxu1 }
 0xc4a   : > { %v11476_v1 = vadd.f32 %v12957_v30, %v15615_v38 }
 0xc4b   : > { %v11470_v53 = vpop.f32.mrf.mxu1 }
 0xc4c   : > { %v11638_v45 = vsel %vm11622_vm10, 0.0, %v11476_v1  ;;  %v11471_v11 = vadd.f32 %v15615_v38, %v11470_v53 }
 0xc4d   : > { %11655 = vst.msk [vmem:[%s15623_s15 + $0x1c] sm:$0x7] %vm11647_vm0, %v11638_v45 }
 0xc4e   : > { %v11637_v29 = vsel %vm11621_vm11, 0.0, %v11471_v11 }
 0xc4f   : > { %11654 = vst.msk [vmem:[%s15623_s15 + $0x18] sm:$0x7] %vm11647_vm0, %v11637_v29 }
 0xc55   : > { %v12960_v40 = vpop.f32.mrf.mxu1 }
 0xc56   : > { %v11486_v46 = vadd.f32 %v12960_v40, %v15615_v38 }
 0xc57   : > { %v11480_v32 = vpop.f32.mrf.mxu1 }
 0xc58   : > { %v11640_v5 = vsel %vm11624_vm12, 0.0, %v11486_v46  ;;  %v11481_v47 = vadd.f32 %v15615_v38, %v11480_v32 }
 0xc59   : > { %11657 = vst.msk [vmem:[%s15623_s15 + $0x24] sm:$0x7] %vm11647_vm0, %v11640_v5 }
 0xc5a   : > { %v11639_v28 = vsel %vm11623_vm13, 0.0, %v11481_v47 }
 0xc5b   : > { %11656 = vst.msk [vmem:[%s15623_s15 + $0x20] sm:$0x7] %vm11647_vm0, %v11639_v28  ;;  %v12954_v50 = vpop.f32.mrf.mxu0 }
 0xc5c   : > { %v11466_v57 = vadd.f32 %v12954_v50, %v15615_v38 }
 0xc5d   : > { %v11460_v24 = vpop.f32.mrf.mxu0 }
 0xc5e   : > { %v11636_v6 = vsel %vm11620_vm14, 0.0, %v11466_v57  ;;  %v11461_v48 = vadd.f32 %v15615_v38, %v11460_v24 }
 0xc5f   : > { %11653 = vst.msk [vmem:[%s15623_s15 + $0x14] sm:$0x7] %vm11647_vm0, %v11636_v6 }
 0xc60   : > { %v11635_v16 = vsel %vm11619_vm15, 0.0, %v11461_v48 }
 0xc61   : > { %11652 = vst.msk [vmem:[%s15623_s15 + $0x10] sm:$0x7] %vm11647_vm0, %v11635_v16 }
 0xc9c   : > { %v12963_v43 = vpop.f32.mrf.mxu1 }
 0xc9d   : > { %v11496_v59 = vadd.f32 %v12963_v43, %v15615_v38 }
 0xc9e   : > { %v11490_v21 = vpop.f32.mrf.mxu1 }
 0xc9f   : > { %v11642_v63 = vsel %vm11626_vm1, 0.0, %v11496_v59  ;;  %v11491_v37 = vadd.f32 %v15615_v38, %v11490_v21 }
 0xca0   : > { %11659 = vst.msk [vmem:[%s15623_s15 + $0x2c] sm:$0x7] %vm11647_vm0, %v11642_v63 }
 0xca1   : > { %v11641_v2 = vsel %vm11625_vm4, 0.0, %v11491_v37 }
 0xca2   : > { %11658 = vst.msk [vmem:[%s15623_s15 + $0x28] sm:$0x7] %vm11647_vm0, %v11641_v2 }
 0xca4   : > { %v12966_v56 = vpop.f32.mrf.mxu1 }
 0xca5   : > { %v11506_v61 = vadd.f32 %v12966_v56, %v15615_v38 }
 0xca6   : > { %v11500_v39 = vpop.f32.mrf.mxu1 }
 0xca7   : > { %v11644_v0 = vsel %vm11628_vm5, 0.0, %v11506_v61  ;;  %v11501_v20 = vadd.f32 %v15615_v38, %v11500_v39 }
 0xca8   : > { %11661 = vst.msk [vmem:[%s15623_s15 + $0x34] sm:$0x7] %vm11647_vm0, %v11644_v0 }
 0xca9   : > { %v11643_v25 = vsel %vm11627_vm6, 0.0, %v11501_v20 }
 0xcaa   : > { %11660 = vst.msk [vmem:[%s15623_s15 + $0x30] sm:$0x7] %vm11647_vm0, %v11643_v25 }
 0xcac   : > { %v12969_v14 = vpop.f32.mrf.mxu1 }
 0xcad   : > { %v11516_v13 = vadd.f32 %v12969_v14, %v15615_v38 }
 0xcae   : > { %v11510_v17 = vpop.f32.mrf.mxu1 }
 0xcaf   : > { %v11646_v27 = vsel %vm11630_vm7, 0.0, %v11516_v13  ;;  %v11511_v12 = vadd.f32 %v15615_v38, %v11510_v17 }
 0xcb0   : > { %11663 = vst.msk [vmem:[%s15623_s15 + $0x3c] sm:$0x7] %vm11647_vm0, %v11646_v27 }
 0xcb1   : > { %v11645_v31 = vsel %vm11629_vm9, 0.0, %v11511_v12 }
 0xcb2   : > { %11662 = vst.msk [vmem:[%s15623_s15 + $0x38] sm:$0x7] %vm11647_vm0, %v11645_v31 }
 0xcb3 PF: > { %s15_s18 = sadd.s32 1, %s13267_s18  }
 0xcb4   : > { %p12_p4 = scmp.ge.s32.totalorder %s15_s18, 4  }
 0xcb6   :  { %14 = sbr.rel (!%p12_p4) target bundleno = 1 (0x1), region = 73 }

</bundles_post_ra>
